<compile_context>
chip_gen: v7x
topology: tpu7x:2x2x1
jax: 0.10.0
libtpu: 0.0.40
codegen_flags: <defaults>
</compile_context>

<pallas_src>
import functools

import jax
import jax.numpy as jnp
from jax.experimental import pallas as pl
from jax.experimental.pallas import tpu as pltpu


# ---------------------------------------------------------------------------
# Small helpers.
# ---------------------------------------------------------------------------
def _round_up(v, m):
    return -(-v // m) * m


def _tpu_vmem_capacity():
    """Per-core VMEM capacity in bytes (128 MiB fallback if the query fails)."""
    try:
        return int(pltpu.get_tpu_info().vmem_capacity_bytes)
    except Exception:   # interpret mode / older runtimes: assume v5e/v6e
        return 128 * 1024 * 1024


def _vmem_limit(cap):
    # ~96 MiB on v5e/v6e (128 MiB physical), ~48 MiB on v7x (64 MiB physical).
    return int(cap * 3 // 4)


def _pack_params(params, c0):
    """Pad every layer's out-channels to a multiple of 128 and column-concat
    [Wl | Wr] so H @ [Wl|Wr] is one wide MXU matmul.  Padding is exact: padded
    activation columns are identically zero (zero weights, zero bias, ReLU(0)=0)
    and the next layer's extra weight rows are zero."""
    packed = []
    c_in_pad = c0
    for p in params:
        c_in, c_out = p["w_l"].shape
        c_out_pad = _round_up(c_out, 128)
        wl = jnp.zeros((c_in_pad, c_out_pad), jnp.float32)
        wl = wl.at[:c_in, :c_out].set(p["w_l"])
        wr = jnp.zeros((c_in_pad, c_out_pad), jnp.float32)
        wr = wr.at[:c_in, :c_out].set(p["w_r"])
        b = jnp.zeros((1, c_out_pad), jnp.float32)
        b = b.at[:, :c_out].set(p["b"].reshape(1, -1))
        packed.append(dict(w_lr=jnp.concatenate([wl, wr], axis=1), b=b,
                           c_in=c_in_pad, c_out=c_out_pad))
        c_in_pad = c_out_pad
    return packed


# ---------------------------------------------------------------------------
# Fused whole-model kernel (primary path: the whole problem lives in VMEM).
# ---------------------------------------------------------------------------
def sage_fused_kernel(a_hbm, x_ref, *rest, num_layers, compute_dtype):
    """All SAGEConv layers in one kernel invocation.

    a_hbm : (Np, Np)  row-normalized adjacency, left in HBM (manual DMA)
    x_ref : (Np, C0)  input node features (f32, VMEM)
    rest  : (w_lr_0, b_0, ..., w_lr_{L-1}, b_{L-1}, o_ref, a_vmem, sem)
    """
    o_ref = rest[2 * num_layers]
    a_vmem = rest[2 * num_layers + 1]
    sem = rest[2 * num_layers + 2]

    # Start the big A HBM->VMEM transfer; layer 0's feature matmul (which only
    # needs X) runs underneath it, hiding the otherwise fully-exposed DMA.
    copy_a = pltpu.make_async_copy(a_hbm, a_vmem, sem)
    copy_a.start()

    h = x_ref[...].astype(jnp.float32)   # activations carried in f32
    a = None
    for l in range(num_layers):
        w_lr = rest[2 * l][...]          # (Cin, 2*Cout) in compute_dtype
        bias = rest[2 * l + 1][...]      # (1, Cout) f32
        c_in = w_lr.shape[0]
        c_out = w_lr.shape[1] // 2
        hc = h.astype(compute_dtype)

        if l == 0 or c_out <= c_in:
            # One wide feature matmul H @ [Wl|Wr] (2*Cout lanes), then the big
            # NxN contraction only carries Cout lanes: A @ (H @ Wl) + H @ Wr.
            # Layer 0 always takes this branch so the A DMA stays hidden.
            hw = jnp.dot(hc, w_lr, preferred_element_type=jnp.float32)
            if l == 0:
                copy_a.wait()
                a = a_vmem[...]
            agg = jnp.dot(a, hw[:, :c_out].astype(compute_dtype),
                          preferred_element_type=jnp.float32)
            out = agg + hw[:, c_out:] + bias
        else:
            # Widening layer: (A @ H) @ Wl keeps the NxN contraction narrow.
            ah = jnp.dot(a, hc, preferred_element_type=jnp.float32)
            out = (jnp.dot(ah.astype(compute_dtype), w_lr[:, :c_out],
                           preferred_element_type=jnp.float32)
                   + jnp.dot(hc, w_lr[:, c_out:],
                             preferred_element_type=jnp.float32)
                   + bias)

        if l < num_layers - 1:
            out = jnp.maximum(out, 0.0)   # ReLU on hidden layers only (f32)
        h = out

    o_ref[...] = h.astype(o_ref.dtype)


def sage_forward_fused(x, a_norm, params, *, compute_dtype=jnp.float32):
    """Full SAGE forward in a single pallas_call (small/medium graphs).

    compute_dtype=jnp.bfloat16 feeds bf16 into the MXU (a win on v5e/v6e/v7x
    alike); accumulation, carried activations and the bias/ReLU epilogue stay
    f32."""
    n, c0 = x.shape
    out_c = params[-1]["w_l"].shape[1]
    packed = _pack_params(params, c0)
    num_layers = len(packed)
    n_pad = _round_up(n, 128)
    cap = _tpu_vmem_capacity()
    itemsize = jnp.dtype(compute_dtype).itemsize

    a_pad = jnp.pad(a_norm, ((0, n_pad - n), (0, n_pad - n))).astype(compute_dtype)
    x_pad = jnp.pad(x, ((0, n_pad - n), (0, 0)))          # stays f32
    c_last = packed[-1]["c_out"]

    inputs = [a_pad, x_pad]
    for p in packed:
        inputs += [p["w_lr"].astype(compute_dtype), p["b"]]   # bias stays f32

    flops = 0
    for l, p in enumerate(packed):
        ci, co = p["c_in"], p["c_out"]
        if l == 0 or co <= ci:
            flops += 4 * n_pad * ci * co + 2 * n_pad * n_pad * co
        else:
            flops += 2 * n_pad * n_pad * ci + 4 * n_pad * ci * co
    bytes_accessed = (sum(int(v.size) * v.dtype.itemsize for v in inputs)
                      + n_pad * c_last * 4)

    kernel = functools.partial(sage_fused_kernel, num_layers=num_layers,
                               compute_dtype=compute_dtype)
    vmem_spec = pl.BlockSpec(memory_space=pltpu.MemorySpace.VMEM)
    out = pl.pallas_call(
        kernel,
        out_shape=jax.ShapeDtypeStruct((n_pad, c_last), jnp.float32),
        in_specs=[pl.BlockSpec(memory_space=pl.ANY)]           # A stays in HBM
                 + [vmem_spec] * (len(inputs) - 1),
        out_specs=vmem_spec,
        scratch_shapes=[pltpu.VMEM((n_pad, n_pad), compute_dtype),  # A landing buf
                        pltpu.SemaphoreType.DMA],
        compiler_params=pltpu.CompilerParams(vmem_limit_bytes=_vmem_limit(cap)),
        cost_estimate=pl.CostEstimate(flops=int(flops), transcendentals=0,
                                      bytes_accessed=int(bytes_accessed)),
    )(*inputs)
    return out[:n, :out_c]


# ---------------------------------------------------------------------------
# Per-layer tiled fallback (graphs too large to keep everything in VMEM).
# Two kernels per layer: (1) row-tiled feature transform HW = X @ [Wl|Wr],
# (2) (row, K)-gridded aggregation  out = A @ HWl + HWr + b  with an f32
#     accumulator -> per-step VMEM independent of N.
# ---------------------------------------------------------------------------
def _transform_kernel(x_ref, w_ref, hwl_ref, hwr_ref, *, compute_dtype):
    xc = x_ref[...].astype(compute_dtype)
    hw = jnp.dot(xc, w_ref[...], preferred_element_type=jnp.float32)
    c = hwl_ref.shape[1]
    hwl_ref[...] = hw[:, :c].astype(hwl_ref.dtype)   # neighbor half (streamed)
    hwr_ref[...] = hw[:, c:].astype(hwr_ref.dtype)   # root half (f32 epilogue)


def sage_transform(h, w_lr_c, *, compute_dtype, tile_m, vmem_limit):
    n_pad, c_in = h.shape
    c2 = w_lr_c.shape[1]
    c_out_p = c2 // 2
    grid = (n_pad // tile_m,)
    kernel = functools.partial(_transform_kernel, compute_dtype=compute_dtype)
    flops = 2 * n_pad * c_in * c2
    bytes_accessed = (int(h.size) * h.dtype.itemsize
                      + int(w_lr_c.size) * w_lr_c.dtype.itemsize
                      + n_pad * c_out_p * (jnp.dtype(compute_dtype).itemsize + 4))
    return pl.pallas_call(
        kernel,
        out_shape=(jax.ShapeDtypeStruct((n_pad, c_out_p), compute_dtype),
                   jax.ShapeDtypeStruct((n_pad, c_out_p), jnp.float32)),
        grid=grid,
        in_specs=[pl.BlockSpec((tile_m, c_in), lambda i: (i, 0)),
                  pl.BlockSpec((c_in, c2), lambda i: (0, 0))],
        out_specs=(pl.BlockSpec((tile_m, c_out_p), lambda i: (i, 0)),
                   pl.BlockSpec((tile_m, c_out_p), lambda i: (i, 0))),
        compiler_params=pltpu.CompilerParams(
            dimension_semantics=("parallel",), vmem_limit_bytes=vmem_limit),
        cost_estimate=pl.CostEstimate(flops=int(flops), transcendentals=0,
                                      bytes_accessed=int(bytes_accessed)),
    )(h, w_lr_c)


def _aggregate_kernel(a_ref, hwl_ref, hwr_ref, b_ref, o_ref, acc_ref, *,
                      apply_relu):
    k = pl.program_id(1)

    @pl.when(k == 0)
    def _():
        acc_ref[...] = hwr_ref[...].astype(jnp.float32) + b_ref[...]

    acc_ref[...] += jnp.dot(a_ref[...], hwl_ref[...],
                            preferred_element_type=jnp.float32)

    @pl.when(k == pl.num_programs(1) - 1)
    def _():
        out = acc_ref[...]
        if apply_relu:
            out = jnp.maximum(out, 0.0)
        o_ref[...] = out.astype(o_ref.dtype)


def sage_aggregate(a_c, hwl, hwr, b, *, apply_relu, out_dtype, tile_n, tile_k,
                   vmem_limit):
    n_pad = a_c.shape[0]
    c_out_p = hwl.shape[1]
    grid = (n_pad // tile_n, n_pad // tile_k)
    flops = 2 * n_pad * n_pad * c_out_p
    bytes_accessed = (int(a_c.size) * a_c.dtype.itemsize
                      + int(hwl.size) * hwl.dtype.itemsize * grid[0]
                      + int(hwr.size) * 4 + int(b.size) * 4
                      + n_pad * c_out_p * jnp.dtype(out_dtype).itemsize)
    kernel = functools.partial(_aggregate_kernel, apply_relu=apply_relu)
    return pl.pallas_call(
        kernel,
        out_shape=jax.ShapeDtypeStruct((n_pad, c_out_p), out_dtype),
        grid=grid,
        in_specs=[
            pl.BlockSpec((tile_n, tile_k), lambda i, k: (i, k)),    # A tile
            pl.BlockSpec((tile_k, c_out_p), lambda i, k: (k, 0)),   # H@Wl (K-streamed)
            pl.BlockSpec((tile_n, c_out_p), lambda i, k: (i, 0)),   # H@Wr row block
            pl.BlockSpec((1, c_out_p), lambda i, k: (0, 0)),        # bias
        ],
        out_specs=pl.BlockSpec((tile_n, c_out_p), lambda i, k: (i, 0)),
        scratch_shapes=[pltpu.VMEM((tile_n, c_out_p), jnp.float32)],
        compiler_params=pltpu.CompilerParams(
            dimension_semantics=("parallel", "arbitrary"),
            vmem_limit_bytes=vmem_limit),
        cost_estimate=pl.CostEstimate(flops=int(flops), transcendentals=0,
                                      bytes_accessed=int(bytes_accessed)),
    )(a_c, hwl, hwr, b)


def _choose_tiles(n, c_out_p, a_itemsize, vmem_budget):
    """Pick (row, K) tiles so the per-step working set (double-buffered blocks
    + accumulator) fits the budget and there are >= 4 row blocks (>= 2
    pipelined steps per v7x TensorCore)."""
    def step_bytes(tn, tk):
        return (2 * tn * tk * a_itemsize          # A block
                + 2 * tk * c_out_p * a_itemsize   # H@Wl block
                + 2 * tn * c_out_p * 4            # H@Wr block
                + 2 * tn * c_out_p * 4            # output block
                + tn * c_out_p * 4                # f32 accumulator
                + 2 * c_out_p * 4)                # bias
    tile_n = 256
    while tile_n > 16 and -(-n // tile_n) < 4:
        tile_n //= 2
    tile_k = 1024
    while tile_k > 128 and (tile_k > _round_up(n, 128)
                            or step_bytes(tile_n, tile_k) > vmem_budget):
        tile_k //= 2
    while tile_n > 16 and step_bytes(tile_n, tile_k) > vmem_budget:
        tile_n //= 2
    return tile_n, tile_k


def sage_forward_tiled(x, a_norm, params, *, compute_dtype=jnp.float32):
    """Per-layer tiled SAGE forward (fallback for large graphs; also the
    preferred path on two-core (v7x-like) chips since its 'parallel' grid axes
    feed both TensorCores)."""
    n, c0 = x.shape
    out_c = params[-1]["w_l"].shape[1]
    packed = _pack_params(params, c0)
    cap = _tpu_vmem_capacity()
    vmem_limit = _vmem_limit(cap)
    itemsize = jnp.dtype(compute_dtype).itemsize
    max_cp = max(p["c_out"] for p in packed)
    tile_n, tile_k = _choose_tiles(n, max_cp, itemsize, int(cap * 0.45))
    n_pad = _round_up(n, max(tile_n, tile_k))
    tile_m = max(tile_n, 128)       # divides n_pad (powers of two)

    # Row padding is exact: padded A rows/cols are zero, padded rows sliced off.
    a_c = jnp.pad(a_norm, ((0, n_pad - n), (0, n_pad - n))).astype(compute_dtype)
    h = jnp.pad(x, ((0, n_pad - n), (0, 0))).astype(jnp.float32)

    for l, p in enumerate(packed):
        last = l == len(packed) - 1
        hwl, hwr = sage_transform(h, p["w_lr"].astype(compute_dtype),
                                  compute_dtype=compute_dtype, tile_m=tile_m,
                                  vmem_limit=vmem_limit)
        h = sage_aggregate(a_c, hwl, hwr, p["b"], apply_relu=not last,
                           out_dtype=jnp.float32 if last else compute_dtype,
                           tile_n=tile_n, tile_k=tile_k, vmem_limit=vmem_limit)
    return h[:n, :out_c]


# ---------------------------------------------------------------------------
# Dispatcher + parameter init.
# ---------------------------------------------------------------------------
def sage_forward(x, a_norm, params, *, compute_dtype=jnp.bfloat16):
    """Auto-select fused whole-model kernel vs. per-layer tiled path.

    bf16 MXU inputs (f32 accumulation + f32 epilogue) are the default on every
    TPU generation including v5e; pass compute_dtype=jnp.float32 for exact f32
    matmuls."""
    n, c0 = x.shape
    cap = _tpu_vmem_capacity()
    itemsize = jnp.dtype(compute_dtype).itemsize
    n_pad = _round_up(n, 128)
    dims = [c0] + [_round_up(p["w_l"].shape[1], 128) for p in params]
    max_c = max(dims + [128])
    weight_bytes = sum(itemsize * 2 * dims[l] * dims[l + 1] + 4 * dims[l + 1]
                       for l in range(len(params)))
    fused_bytes = (itemsize * n_pad * n_pad        # A landing buffer (scratch)
                   + 4 * n_pad * c0                # X
                   + weight_bytes
                   + 4 * n_pad * dims[-1]          # padded output
                   + 6 * 4 * n_pad * max_c)        # f32 temporaries (h/hw/agg/out)
    two_core_chip = cap <= 96 * 1024 * 1024        # v7x-like (64 MiB VMEM / TC)
    use_fused = fused_bytes <= int(0.55 * cap)
    if two_core_chip and n >= 4096:
        use_fused = False        # tiled path's parallel grid keeps both TCs busy
    if use_fused:
        return sage_forward_fused(x, a_norm, params, compute_dtype=compute_dtype)
    return sage_forward_tiled(x, a_norm, params, compute_dtype=compute_dtype)


def init_sage_params(key, in_channels, hidden_channels, out_channels,
                     num_layers):
    """Deterministic synthetic parameters for every SAGEConv layer."""
    dims = ([in_channels] + [hidden_channels] * (num_layers - 1)
            + [out_channels])
    params = []
    for l in range(num_layers):
        c_in, c_out = dims[l], dims[l + 1]
        key, k1, k2, k3 = jax.random.split(key, 4)
        scale = 1.0 / jnp.sqrt(jnp.float32(c_in))
        params.append(dict(
            w_l=jax.random.uniform(k1, (c_in, c_out), jnp.float32, -scale, scale),
            w_r=jax.random.uniform(k2, (c_in, c_out), jnp.float32, -scale, scale),
            b=jax.random.uniform(k3, (1, c_out), jnp.float32, -scale, scale),
        ))
    return params


if __name__ == "__main__":
    key = jax.random.PRNGKey(0)

    # Small synthetic graph / model sizes.
    N = 256            # nodes
    IN_C = 64          # in_channels
    HID_C = 128        # hidden_channels
    OUT_C = 32         # out_channels
    NUM_LAYERS = 3     # num_layers
    # dropout is identity in eval mode; norm_type='none' (no Batch/LayerNorm).
    # TODO(synk): training-mode dropout and norm_type='batch'/'layer' branches
    # are not implemented here.

    key, k_adj, k_x, k_p = jax.random.split(key, 4)

    # Random sparse-ish adjacency with self loops, then row-normalize (mean).
    adj = (jax.random.uniform(k_adj, (N, N)) < 0.05).astype(jnp.float32)
    adj = jnp.maximum(adj, jnp.eye(N, dtype=jnp.float32))
    deg = adj.sum(axis=1, keepdims=True)
    a_norm = adj / jnp.maximum(deg, 1.0)

    x = jax.random.normal(k_x, (N, IN_C), dtype=jnp.float32)
    params = init_sage_params(k_p, IN_C, HID_C, OUT_C, NUM_LAYERS)

    # Plain-JAX reference of the same math (SAGEConv mean aggregation).
    ref = x
    for layer in params[:-1]:
        ref = jnp.maximum(
            a_norm @ ref @ layer["w_l"] + ref @ layer["w_r"] + layer["b"], 0.0)
    last = params[-1]
    ref = a_norm @ ref @ last["w_l"] + ref @ last["w_r"] + last["b"]

    # 1) Fused single-kernel path, f32 matmuls (auto-selected for this size).
    out_f32 = jax.block_until_ready(
        sage_forward(x, a_norm, params, compute_dtype=jnp.float32))
    assert out_f32.shape == (N, OUT_C)
    assert jnp.allclose(out_f32, ref, atol=1e-2, rtol=1e-2)

    # 2) Default path: bf16 MXU inputs, f32 accumulation + f32 epilogue.
    out_bf16 = jax.block_until_ready(sage_forward(x, a_norm, params))
    assert out_bf16.shape == (N, OUT_C)
    assert jnp.allclose(out_bf16, ref, atol=3e-2, rtol=3e-2)

    # 3) Per-layer tiled fallback, f32.
    out_tiled = jax.block_until_ready(
        sage_forward_tiled(x, a_norm, params, compute_dtype=jnp.float32))
    assert out_tiled.shape == (N, OUT_C)
    assert jnp.allclose(out_tiled, ref, atol=1e-2, rtol=1e-2)

    # 4) Per-layer tiled fallback with bf16 A / activation streaming.
    out_tiled_bf16 = jax.block_until_ready(
        sage_forward_tiled(x, a_norm, params, compute_dtype=jnp.bfloat16))
    assert out_tiled_bf16.shape == (N, OUT_C)
    assert jnp.allclose(out_tiled_bf16, ref, atol=3e-2, rtol=3e-2)

    print("KERNEL_OK")
</pallas_src>

<mosaic_0001>
module attributes {stable_mosaic.version = 11 : i64} {
  func.func @sage_fused_kernel(%arg0: memref<256x256xf32, #tpu.memory_space<any>>, %arg1: memref<256x64xf32, #tpu.memory_space<vmem>>, %arg2: memref<64x256xf32, #tpu.memory_space<vmem>>, %arg3: memref<1x128xf32, #tpu.memory_space<vmem>>, %arg4: memref<128x256xf32, #tpu.memory_space<vmem>>, %arg5: memref<1x128xf32, #tpu.memory_space<vmem>>, %arg6: memref<128x256xf32, #tpu.memory_space<vmem>>, %arg7: memref<1x128xf32, #tpu.memory_space<vmem>>, %arg8: memref<256x128xf32, #tpu.memory_space<vmem>>, %arg9: memref<256x256xf32, #tpu.memory_space<vmem>>, %arg10: memref<!tpu.dma_semaphore, #tpu.memory_space<semaphore_mem>>) attributes {dimension_semantics = [], scalar_prefetch = 0 : i64, scratch_operands = 2 : i64, tpu.core_type = #tpu.core_type<tc>} {
    tpu.enqueue_dma source(%arg0 : memref<256x256xf32, #tpu.memory_space<any>>) target(%arg9 : memref<256x256xf32, #tpu.memory_space<vmem>>) target_semaphore(%arg10 : memref<!tpu.dma_semaphore, #tpu.memory_space<semaphore_mem>>)
    %c0 = arith.constant 0 : index
    %c0_0 = arith.constant 0 : index
    %0 = vector.load %arg1[%c0, %c0_0] : memref<256x64xf32, #tpu.memory_space<vmem>>, vector<256x64xf32>
    %c0_1 = arith.constant 0 : index
    %c0_2 = arith.constant 0 : index
    %1 = vector.load %arg2[%c0_1, %c0_2] : memref<64x256xf32, #tpu.memory_space<vmem>>, vector<64x256xf32>
    %c0_3 = arith.constant 0 : index
    %c0_4 = arith.constant 0 : index
    %2 = vector.load %arg3[%c0_3, %c0_4] : memref<1x128xf32, #tpu.memory_space<vmem>>, vector<1x128xf32>
    %cst = arith.constant dense<0.000000e+00> : vector<256x256xf32>
    %3 = tpu.matmul %0, %1, %cst {dimension_numbers = #tpu.dot_dimension_numbers<[1], [0], [0], [1], [0, 0, 1, 1], [], []>} : vector<256x64xf32>, vector<64x256xf32>, vector<256x256xf32> -> vector<256x256xf32>
    tpu.wait_dma2 semaphore(%arg10 : memref<!tpu.dma_semaphore, #tpu.memory_space<semaphore_mem>>) src(%arg0 : memref<256x256xf32, #tpu.memory_space<any>>) dst(%arg9 : memref<256x256xf32, #tpu.memory_space<vmem>>)
    %c0_5 = arith.constant 0 : index
    %c0_6 = arith.constant 0 : index
    %4 = vector.load %arg9[%c0_5, %c0_6] : memref<256x256xf32, #tpu.memory_space<vmem>>, vector<256x256xf32>
    %5 = vector.extract_strided_slice %3 {offsets = [0, 0], sizes = [256, 128], strides = [1, 1]} : vector<256x256xf32> to vector<256x128xf32>
    %cst_7 = arith.constant dense<0.000000e+00> : vector<256x128xf32>
    %6 = tpu.matmul %4, %5, %cst_7 {dimension_numbers = #tpu.dot_dimension_numbers<[1], [0], [0], [1], [0, 0, 1, 1], [], []>} : vector<256x256xf32>, vector<256x128xf32>, vector<256x128xf32> -> vector<256x128xf32>
    %7 = vector.extract_strided_slice %3 {offsets = [0, 128], sizes = [256, 128], strides = [1, 1]} : vector<256x256xf32> to vector<256x128xf32>
    %8 = arith.addf %6, %7 : vector<256x128xf32>
    %9 = vector.broadcast %2 : vector<1x128xf32> to vector<256x128xf32>
    %10 = arith.addf %8, %9 : vector<256x128xf32>
    %cst_8 = arith.constant 0.000000e+00 : f32
    %11 = vector.broadcast %cst_8 : f32 to vector<256x128xf32>
    %12 = arith.maximumf %10, %11 : vector<256x128xf32>
    %c0_9 = arith.constant 0 : index
    %c0_10 = arith.constant 0 : index
    %13 = vector.load %arg4[%c0_9, %c0_10] : memref<128x256xf32, #tpu.memory_space<vmem>>, vector<128x256xf32>
    %c0_11 = arith.constant 0 : index
    %c0_12 = arith.constant 0 : index
    %14 = vector.load %arg5[%c0_11, %c0_12] : memref<1x128xf32, #tpu.memory_space<vmem>>, vector<1x128xf32>
    %cst_13 = arith.constant dense<0.000000e+00> : vector<256x256xf32>
    %15 = tpu.matmul %12, %13, %cst_13 {dimension_numbers = #tpu.dot_dimension_numbers<[1], [0], [0], [1], [0, 0, 1, 1], [], []>} : vector<256x128xf32>, vector<128x256xf32>, vector<256x256xf32> -> vector<256x256xf32>
    %16 = vector.extract_strided_slice %15 {offsets = [0, 0], sizes = [256, 128], strides = [1, 1]} : vector<256x256xf32> to vector<256x128xf32>
    %cst_14 = arith.constant dense<0.000000e+00> : vector<256x128xf32>
    %17 = tpu.matmul %4, %16, %cst_14 {dimension_numbers = #tpu.dot_dimension_numbers<[1], [0], [0], [1], [0, 0, 1, 1], [], []>} : vector<256x256xf32>, vector<256x128xf32>, vector<256x128xf32> -> vector<256x128xf32>
    %18 = vector.extract_strided_slice %15 {offsets = [0, 128], sizes = [256, 128], strides = [1, 1]} : vector<256x256xf32> to vector<256x128xf32>
    %19 = arith.addf %17, %18 : vector<256x128xf32>
    %20 = vector.broadcast %14 : vector<1x128xf32> to vector<256x128xf32>
    %21 = arith.addf %19, %20 : vector<256x128xf32>
    %cst_15 = arith.constant 0.000000e+00 : f32
    %22 = vector.broadcast %cst_15 : f32 to vector<256x128xf32>
    %23 = arith.maximumf %21, %22 : vector<256x128xf32>
    %c0_16 = arith.constant 0 : index
    %c0_17 = arith.constant 0 : index
    %24 = vector.load %arg6[%c0_16, %c0_17] : memref<128x256xf32, #tpu.memory_space<vmem>>, vector<128x256xf32>
    %c0_18 = arith.constant 0 : index
    %c0_19 = arith.constant 0 : index
    %25 = vector.load %arg7[%c0_18, %c0_19] : memref<1x128xf32, #tpu.memory_space<vmem>>, vector<1x128xf32>
    %cst_20 = arith.constant dense<0.000000e+00> : vector<256x256xf32>
    %26 = tpu.matmul %23, %24, %cst_20 {dimension_numbers = #tpu.dot_dimension_numbers<[1], [0], [0], [1], [0, 0, 1, 1], [], []>} : vector<256x128xf32>, vector<128x256xf32>, vector<256x256xf32> -> vector<256x256xf32>
    %27 = vector.extract_strided_slice %26 {offsets = [0, 0], sizes = [256, 128], strides = [1, 1]} : vector<256x256xf32> to vector<256x128xf32>
    %cst_21 = arith.constant dense<0.000000e+00> : vector<256x128xf32>
    %28 = tpu.matmul %4, %27, %cst_21 {dimension_numbers = #tpu.dot_dimension_numbers<[1], [0], [0], [1], [0, 0, 1, 1], [], []>} : vector<256x256xf32>, vector<256x128xf32>, vector<256x128xf32> -> vector<256x128xf32>
    %29 = vector.extract_strided_slice %26 {offsets = [0, 128], sizes = [256, 128], strides = [1, 1]} : vector<256x256xf32> to vector<256x128xf32>
    %30 = arith.addf %28, %29 : vector<256x128xf32>
    %31 = vector.broadcast %25 : vector<1x128xf32> to vector<256x128xf32>
    %32 = arith.addf %30, %31 : vector<256x128xf32>
    %c0_22 = arith.constant 0 : index
    %c0_23 = arith.constant 0 : index
    %33 = vector.load %arg8[%c0_22, %c0_23] : memref<256x128xf32, #tpu.memory_space<vmem>>, vector<256x128xf32>
    tpu.vector_store %arg8[%c0_22, %c0_23], %32 {strides = array<i32>} : memref<256x128xf32, #tpu.memory_space<vmem>>, vector<256x128xf32>,
    return
  }
}

</mosaic_0001>

<bundles_post_ra>
// kernel: tpu_custom_call.1
= control target key start
LH: loop header
LB: loop body
LE: loop exit
PB: predicated region body
PF: predicated region fallthrough
CT: control target
= control target key end

     0   :  { %13 = vsyncpa [#allocation5], 0  ;;  %s3746_s0 = inlined_call_operand.hbm [shape: f32[256,256], index: 0, kind: input, shape index: {}]   ;;  %s3747_s1 = inlined_call_operand.hbm [shape: f32[256,64], index: 1, kind: input, shape index: {}]   ;;  %s3748_s2 = inlined_call_operand.hbm [shape: f32[64,256], index: 2, kind: input, shape index: {}]   ;;  %s3749_s3 = inlined_call_operand.hbm [shape: f32[1,128], index: 3, kind: input, shape index: {}]   ;;  %s3750_s4 = inlined_call_operand.hbm [shape: f32[128,256], index: 4, kind: input, shape index: {}]   ;;  %s3751_s5 = inlined_call_operand.hbm [shape: f32[1,128], index: 5, kind: input, shape index: {}]   ;;  %s3752_s6 = inlined_call_operand.hbm [shape: f32[128,256], index: 6, kind: input, shape index: {}]   ;;  %s3753_s7 = inlined_call_operand.hbm [shape: f32[1,128], index: 7, kind: input, shape index: {}]   ;;  %s3754_s8 = inlined_call_operand.hbm [shape: f32[256,128], index: 8, kind: output, shape index: {}]  }
   0x1   :  { %14 = vsyncpa [#allocation8], 0 }
   0x2   :  { %15 = vsyncpa [#allocation11], 0 }
   0x3   :  { %16 = vsyncpa [#allocation14], 0 }
   0x4   :  { %17 = vsyncpa [#allocation6], 0  ;;  %s2671_s27 = smov [#allocation7]   ;;  %s2461_s9 = scalar_lea.hbm %s3748_s2, 2048 }
   0x5   :  { %s35_s28 = sshll.u32 %s2671_s27, 4  ;;  %p2462_p0 = scmp.ne.s32.totalorder %s3748_s2, %s2461_s9  ;;  %s36_s28 = int_to_ptr.vmem [resolvable:$true] %s35_s28 }
   0x6   :  { %p2465_p1 = scmp.lt.u32.totalorder %s2461_s9, %s3748_s2 }
   0x8   :  { %p2467_p2 = pnand %p2465_p1, %p2462_p0 }
   0xa   :  { %2470 = shalt.err (!%p2467_p2)
}
   0xb   :  { %s2471_s14 = scalar_lea.vmem %s36_s28, 2048  ;;  %p2476_p4 = scmp.lt.s32.totalorder %s36_s28, %s36_s28 }
   0xc   :  { %p2472_p3 = scmp.ne.s32.totalorder %s36_s28, %s2471_s14  ;;  %p2477_p5 = scmp.lt.s32.totalorder %s2471_s14, %s2471_s14 }
   0xe   :  { %p2478_p6 = por %p2477_p5, %p2476_p4 }
  0x10   :  { %p2479_p7 = pnand %p2478_p6, %p2472_p3 }
  0x12   :  { %2482 = shalt.err (!%p2479_p7)
}
  0x13   :  { %s2672_s15 = smov 256   ;;  %s2673_s16 = smov 16  }
  0x14   :  { %41 = dma.hbm_to_vmem [thread:$0]  %s3748_s2, 2048, %s36_s28, [#allocation8], %s2672_s15, %s2672_s15, %s2673_s16  }
  0x15   :  { %s2674_s19 = smov [#allocation10]   ;;  %s2675_s21 = smov [#allocation13]  }
  0x16   :  { %s57_s20 = sshll.u32 %s2674_s19, 4  ;;  %s79_s22 = sshll.u32 %s2675_s21, 4  ;;  %s58_s20 = int_to_ptr.vmem [resolvable:$true] %s57_s20  ;;  %s80_s22 = int_to_ptr.vmem [resolvable:$true] %s79_s22 }
  0x17   :  { %s2483_s25 = scalar_lea.hbm %s3750_s4, 4096 }
  0x18   :  { %p2484_p8 = scmp.ne.s32.totalorder %s3750_s4, %s2483_s25  ;;  %p2487_p9 = scmp.lt.u32.totalorder %s2483_s25, %s3750_s4 }
  0x1a   :  { %p2489_p10 = pnand %p2487_p9, %p2484_p8 }
  0x1c   :  { %2492 = shalt.err (!%p2489_p10)
}
  0x1d   :  { %s2493_s2 = scalar_lea.vmem %s58_s20, 4096  ;;  %p2498_p12 = scmp.lt.s32.totalorder %s58_s20, %s58_s20 }
  0x1e   :  { %p2494_p11 = scmp.ne.s32.totalorder %s58_s20, %s2493_s2  ;;  %p2499_p13 = scmp.lt.s32.totalorder %s2493_s2, %s2493_s2 }
  0x20   :  { %p2500_p0 = por %p2499_p13, %p2498_p12 }
  0x22   :  { %p2501_p1 = pnand %p2500_p0, %p2494_p11 }
  0x24   :  { %2504 = shalt.err (!%p2501_p1)
}
  0x25   :  { %63 = dma.hbm_to_vmem [thread:$0]  %s3750_s4, 4096, %s58_s20, [#allocation11], %s2672_s15, %s2672_s15, %s2673_s16  }
  0x26   :  { %s2505_s12 = scalar_lea.hbm %s3752_s6, 4096 }
  0x27   :  { %p2506_p2 = scmp.ne.s32.totalorder %s3752_s6, %s2505_s12  ;;  %p2509_p3 = scmp.lt.u32.totalorder %s2505_s12, %s3752_s6 }
  0x29   :  { %p2511_p4 = pnand %p2509_p3, %p2506_p2 }
  0x2b   :  { %2514 = shalt.err (!%p2511_p4)
}
  0x2c   :  { %s2515_s19 = scalar_lea.vmem %s80_s22, 4096  ;;  %p2520_p6 = scmp.lt.s32.totalorder %s80_s22, %s80_s22 }
  0x2d   :  { %p2516_p5 = scmp.ne.s32.totalorder %s80_s22, %s2515_s19  ;;  %p2521_p7 = scmp.lt.s32.totalorder %s2515_s19, %s2515_s19 }
  0x2f   :  { %p2522_p8 = por %p2521_p7, %p2520_p6 }
  0x31   :  { %p2523_p9 = pnand %p2522_p8, %p2516_p5 }
  0x33   :  { %2526 = shalt.err (!%p2523_p9)
}
  0x34   :  { %85 = dma.hbm_to_vmem [thread:$0]  %s3752_s6, 4096, %s80_s22, [#allocation14], %s2672_s15, %s2672_s15, %s2673_s16  }
  0x35   :  { %s2676_s21 = smov [#allocation4]   ;;  %s2527_s26 = scalar_lea.hbm %s3747_s1, 4096 }
  0x36   :  { %s23_s23 = sshll.u32 %s2676_s21, 4  ;;  %p2528_p10 = scmp.ne.s32.totalorder %s3747_s1, %s2527_s26  ;;  %s24_s23 = int_to_ptr.vmem [resolvable:$true] %s23_s23 }
  0x37   :  { %p2531_p11 = scmp.lt.u32.totalorder %s2527_s26, %s3747_s1 }
  0x39   :  { %p2533_p12 = pnand %p2531_p11, %p2528_p10 }
  0x3b   :  { %2536 = shalt.err (!%p2533_p12)
}
  0x3c   :  { %s2537_s28 = scalar_lea.vmem %s24_s23, 4096  ;;  %p2542_p0 = scmp.lt.s32.totalorder %s24_s23, %s24_s23 }
  0x3d   :  { %p2538_p13 = scmp.ne.s32.totalorder %s24_s23, %s2537_s28  ;;  %p2543_p1 = scmp.lt.s32.totalorder %s2537_s28, %s2537_s28 }
  0x3f   :  { %p2544_p2 = por %p2543_p1, %p2542_p0 }
  0x41   :  { %p2545_p3 = pnand %p2544_p2, %p2538_p13 }
  0x43   :  { %2548 = shalt.err (!%p2545_p3)
}
  0x44   :  { %s2677_s6 = smov 128   ;;  %s2678_s15 = smov 8  }
  0x45   :  { %29 = dma.hbm_to_vmem [thread:$0]  %s3747_s1, 4096, %s24_s23, [#allocation5], %s2677_s6, %s2677_s6, %s2678_s15  }
  0x46   :  { %s2679_s9 = smov [#allocation9]   ;;  %s2680_s11 = smov [#allocation12]  }
  0x47   :  { %s48_s10 = sshll.u32 %s2679_s9, 4  ;;  %s70_s12 = sshll.u32 %s2680_s11, 4  ;;  %s49_s10 = int_to_ptr.vmem [resolvable:$true] %s48_s10  ;;  %s71_s12 = int_to_ptr.vmem [resolvable:$true] %s70_s12 }
  0x48   :  { %s2549_s17 = scalar_lea.hbm %s3749_s3, 16 }
  0x49   :  { %p2550_p4 = scmp.ne.s32.totalorder %s3749_s3, %s2549_s17  ;;  %p2553_p5 = scmp.lt.u32.totalorder %s2549_s17, %s3749_s3 }
  0x4b   :  { %p2555_p6 = pnand %p2553_p5, %p2550_p4 }
  0x4d   :  { %2558 = shalt.err (!%p2555_p6)
}
  0x4e   :  { %s2559_s1 = scalar_lea.vmem %s49_s10, 16  ;;  %s2563_s21 = scalar_lea.vmem %s49_s10, 32 }
  0x4f   :  { %p2560_p7 = scmp.ne.s32.totalorder %s49_s10, %s2559_s1  ;;  %p2564_p8 = scmp.lt.s32.totalorder %s49_s10, %s49_s10 }
  0x50   :  { %p2565_p9 = scmp.lt.s32.totalorder %s2563_s21, %s2559_s1 }
  0x52   :  { %p2566_p10 = por %p2565_p9, %p2564_p8 }
  0x54   :  { %p2567_p11 = pnand %p2566_p10, %p2560_p7 }
  0x56   :  { %2570 = shalt.err (!%p2567_p11)
}
  0x57   :  { %51 = dma.hbm_to_vmem [thread:$0]  %s3749_s3, 16, %s49_s10, [#allocation8]  }
  0x58   :  { %s2571_s27 = scalar_lea.hbm %s3751_s5, 16 }
  0x59   :  { %p2572_p12 = scmp.ne.s32.totalorder %s3751_s5, %s2571_s27  ;;  %p2575_p13 = scmp.lt.u32.totalorder %s2571_s27, %s3751_s5 }
  0x5b   :  { %p2577_p0 = pnand %p2575_p13, %p2572_p12 }
  0x5d   :  { %2580 = shalt.err (!%p2577_p0)
}
  0x5e   :  { %s2581_s16 = scalar_lea.vmem %s71_s12, 16  ;;  %s2585_s22 = scalar_lea.vmem %s71_s12, 32 }
  0x5f   :  { %p2582_p1 = scmp.ne.s32.totalorder %s71_s12, %s2581_s16  ;;  %p2586_p2 = scmp.lt.s32.totalorder %s71_s12, %s71_s12 }
  0x60   :  { %p2587_p3 = scmp.lt.s32.totalorder %s2585_s22, %s2581_s16 }
  0x62   :  { %p2588_p4 = por %p2587_p3, %p2586_p2 }
  0x64   :  { %p2589_p5 = pnand %p2588_p4, %p2582_p1 }
  0x66   :  { %2592 = shalt.err (!%p2589_p5)
}
  0x67   :  { %73 = dma.hbm_to_vmem [thread:$0]  %s3751_s5, 16, %s71_s12, [#allocation11]  }
  0x68   :  { %s2681_s10 = smov [#allocation15]   ;;  %s2593_s17 = scalar_lea.hbm %s3753_s7, 16 }
  0x69   :  { %s92_s11 = sshll.u32 %s2681_s10, 4  ;;  %p2594_p6 = scmp.ne.s32.totalorder %s3753_s7, %s2593_s17  ;;  %s93_s11 = int_to_ptr.vmem [resolvable:$true] %s92_s11 }
  0x6a   :  { %p2597_p7 = scmp.lt.u32.totalorder %s2593_s17, %s3753_s7 }
  0x6c   :  { %p2599_p8 = pnand %p2597_p7, %p2594_p6 }
  0x6e   :  { %2602 = shalt.err (!%p2599_p8)
}
  0x6f   :  { %s2603_s1 = scalar_lea.vmem %s93_s11, 16  ;;  %s2607_s5 = scalar_lea.vmem %s93_s11, 32 }
  0x70   :  { %p2604_p9 = scmp.ne.s32.totalorder %s93_s11, %s2603_s1  ;;  %p2608_p10 = scmp.lt.s32.totalorder %s93_s11, %s93_s11 }
  0x71   :  { %p2609_p11 = scmp.lt.s32.totalorder %s2607_s5, %s2603_s1 }
  0x73   :  { %p2610_p12 = por %p2609_p11, %p2608_p10 }
  0x75   :  { %p2611_p13 = pnand %p2610_p12, %p2604_p9 }
  0x77   :  { %2614 = shalt.err (!%p2611_p13)
}
  0x78   :  { %95 = dma.hbm_to_vmem [thread:$0]  %s3753_s7, 16, %s93_s11, [#allocation14]  }
  0x79   :  { %2659 = dma.done.wait [#allocation5], 4096  }
  0x7a   :  { %2660 = vsyncadd [#allocation5], 4294963200 }
  0x7b   :  { %2661 = dma.done.wait [#allocation8], 2064  }
  0x7c   :  { %2662 = vsyncadd [#allocation8], 4294965232 }
  0x7d   :  { %2663 = dma.done.wait [#allocation11], 4112  }
  0x7e   :  { %2664 = vsyncadd [#allocation11], 4294963184 }
  0x7f   :  { %2665 = dma.done.wait [#allocation14], 4112  }
  0x80   :  { %2666 = vsyncadd [#allocation14], 4294963184  ;;  %v3755_v0 = vmov 0.0   ;;  %v2828_v1 = vld [vmem:[#allocation9] ss:$0 sm:$0xff]  ;;  %v161_v2 = vld [vmem:[#allocation7 + $0x8] sm:$0xff] }
  0x81   :  { %338 = vmatprep.mubr.f32.mxu0 %v3755_v0  ;;  %v163_v3 = vld [vmem:[#allocation7 + $0x18] sm:$0xff]  ;;  %v160_v5 = vld [vmem:[#allocation7] sm:$0xff]  ;;  %v162_v6 = vld [vmem:[#allocation7 + $0x10] sm:$0xff]  ;;  %vm177_vm0 = vcmask 523264   ;;  %s2683_s7 = smov [#allocation2]   ;;  %s2615_s26 = scalar_lea.hbm %s3746_s0, 8192 }
  0x82   :  { %v2126_v4 = vpack.c.bf16 %v163_v3, %v161_v2  ;;  %v165_v7 = vld [vmem:[#allocation7 + $0x28] sm:$0xff]  ;;  %v2128_v8 = vpack.c.bf16 %v162_v6, %v160_v5  ;;  %v167_v9 = vld [vmem:[#allocation7 + $0x38] sm:$0xff]  ;;  %v164_v10 = vld [vmem:[#allocation7 + $0x20] sm:$0xff]  ;;  %s124_s23 = sshll.u32 %s2683_s7, 4  ;;  %p2616_p0 = scmp.ne.s32.totalorder %s3746_s0, %s2615_s26  ;;  %s125_s23 = int_to_ptr.vmem [resolvable:$true] %s124_s23 }
  0x83   :  { %v166_v11 = vld [vmem:[#allocation7 + $0x30] sm:$0xff]  ;;  %v2130_v12 = vpack.c.bf16 %v167_v9, %v165_v7  ;;  %v169_v13 = vld [vmem:[#allocation7 + $0x48] sm:$0xff]  ;;  %v171_v14 = vld [vmem:[#allocation7 + $0x58] sm:$0xff]  ;;  %p2619_p1 = scmp.lt.u32.totalorder %s2615_s26, %s3746_s0 }
  0x84   :  { %2127 = vmatprep.subr.bf16.mxu0 %v2126_v4  ;;  %v2132_v15 = vpack.c.bf16 %v166_v11, %v164_v10  ;;  %v2134_v16 = vpack.c.bf16 %v171_v14, %v169_v13  ;;  %v168_v17 = vld [vmem:[#allocation7 + $0x40] sm:$0xff]  ;;  %v170_v18 = vld [vmem:[#allocation7 + $0x50] sm:$0xff]  ;;  %v173_v19 = vld [vmem:[#allocation7 + $0x68] sm:$0xff] }
  0x85   :  { %2129 = vmatpush1.bf16.msra.mxu0 %v2128_v8  ;;  %v175_v20 = vld [vmem:[#allocation7 + $0x78] sm:$0xff]  ;;  %v2136_v21 = vpack.c.bf16 %v170_v18, %v168_v17  ;;  %v172_v23 = vld [vmem:[#allocation7 + $0x60] sm:$0xff]  ;;  %v174_v24 = vld [vmem:[#allocation7 + $0x70] sm:$0xff]  ;;  %p2621_p2 = pnand %p2619_p1, %p2616_p0 }
  0x86   :  { %2131 = vmatprep.subr.bf16.mxu0 %v2130_v12  ;;  %v2138_v22 = vpack.c.bf16 %v175_v20, %v173_v19  ;;  %v2140_v25 = vpack.c.bf16 %v174_v24, %v172_v23  ;;  %v128_v26 = vld [vmem:[#allocation4] sm:$0xff]  ;;  %v129_v27 = vld [vmem:[#allocation4 + $0x8] sm:$0xff]  ;;  %v130_v28 = vld [vmem:[#allocation4 + $0x10] sm:$0xff] }
  0x87   :  { %v131_v29 = vld [vmem:[#allocation4 + $0x18] sm:$0xff]  ;;  %v132_v30 = vld [vmem:[#allocation4 + $0x20] sm:$0xff]  ;;  %v133_v31 = vld [vmem:[#allocation4 + $0x28] sm:$0xff] }
  0x88   :  { %v134_v32 = vld [vmem:[#allocation4 + $0x30] sm:$0xff]  ;;  %v135_v33 = vld [vmem:[#allocation4 + $0x38] sm:$0xff]  ;;  %v136_v34 = vld [vmem:[#allocation4 + $0x40] sm:$0xff] }
  0x89   :  { %2133 = vmatpush1.bf16.msra.mxu0 %v2132_v15  ;;  %v137_v35 = vld [vmem:[#allocation4 + $0x48] sm:$0xff]  ;;  %v138_v36 = vld [vmem:[#allocation4 + $0x50] sm:$0xff]  ;;  %v139_v37 = vld [vmem:[#allocation4 + $0x58] sm:$0xff] }
  0x8a   :  { %2135 = vmatprep.subr.bf16.mxu0 %v2134_v16  ;;  %v140_v38 = vld [vmem:[#allocation4 + $0x60] sm:$0xff]  ;;  %v141_v39 = vld [vmem:[#allocation4 + $0x68] sm:$0xff]  ;;  %v142_v40 = vld [vmem:[#allocation4 + $0x70] sm:$0xff] }
  0x8b   :  { %v143_v41 = vld [vmem:[#allocation4 + $0x78] sm:$0xff]  ;;  %v144_v42 = vld [vmem:[#allocation4 + $0x80] sm:$0xff]  ;;  %v145_v43 = vld [vmem:[#allocation4 + $0x88] sm:$0xff] }
  0x8c   :  { %v146_v44 = vld [vmem:[#allocation4 + $0x90] sm:$0xff]  ;;  %v147_v45 = vld [vmem:[#allocation4 + $0x98] sm:$0xff]  ;;  %v148_v46 = vld [vmem:[#allocation4 + $0xa0] sm:$0xff] }
  0x8d   :  { %2137 = vmatpush1.bf16.msra.mxu0 %v2136_v21  ;;  %v149_v47 = vld [vmem:[#allocation4 + $0xa8] sm:$0xff]  ;;  %v150_v48 = vld [vmem:[#allocation4 + $0xb0] sm:$0xff]  ;;  %v151_v49 = vld [vmem:[#allocation4 + $0xb8] sm:$0xff] }
  0x8e   :  { %2139 = vmatprep.subr.bf16.mxu0 %v2138_v22  ;;  %v152_v50 = vld [vmem:[#allocation4 + $0xc0] sm:$0xff]  ;;  %v153_v51 = vld [vmem:[#allocation4 + $0xc8] sm:$0xff]  ;;  %v154_v52 = vld [vmem:[#allocation4 + $0xd0] sm:$0xff] }
  0x8f   :  { %v155_v53 = vld [vmem:[#allocation4 + $0xd8] sm:$0xff]  ;;  %v156_v54 = vld [vmem:[#allocation4 + $0xe0] sm:$0xff]  ;;  %v157_v55 = vld [vmem:[#allocation4 + $0xe8] sm:$0xff] }
  0x90   :  { %v158_v56 = vld [vmem:[#allocation4 + $0xf0] sm:$0xff]  ;;  %v159_v57 = vld [vmem:[#allocation4 + $0xf8] sm:$0xff] }
  0x91   :  { %2141 = vmatpush1.bf16.msra.mxu0 %v2140_v25 }
  0x94   :  { %2090 = vmatmul.mubr.msk.f32.vlgmr.msra.gmra.mrb[0].mxu0 %vm177_vm0, %v128_v26 }
  0x95   :  { %344 = vmatprep.mubr.f32.mxu0 %v3755_v0 }
  0x98   :  { %2091 = vmatmul.mubr.msk.f32.gmra.mrb[2].mxu0 %vm177_vm0, %v129_v27 }
  0x99   :  { %350 = vmatprep.mubr.f32.mxu0 %v3755_v0 }
  0x9c   :  { %2092 = vmatmul.mubr.msk.f32.gmra.mrb[4].mxu0 %vm177_vm0, %v130_v28 }
  0x9d   :  { %356 = vmatprep.mubr.f32.mxu0 %v3755_v0 }
  0xa0   :  { %2093 = vmatmul.mubr.msk.f32.gmra.mrb[6].mxu0 %vm177_vm0, %v131_v29 }
  0xa1   :  { %362 = vmatprep.mubr.f32.mxu0 %v3755_v0 }
  0xa4   :  { %2094 = vmatmul.mubr.msk.f32.gmra.mrb[8].mxu0 %vm177_vm0, %v132_v30 }
  0xa5   :  { %368 = vmatprep.mubr.f32.mxu0 %v3755_v0 }
  0xa8   :  { %2095 = vmatmul.mubr.msk.f32.gmra.mrb[10].mxu0 %vm177_vm0, %v133_v31 }
  0xa9   :  { %374 = vmatprep.mubr.f32.mxu0 %v3755_v0 }
  0xac   :  { %2096 = vmatmul.mubr.msk.f32.gmra.mrb[12].mxu0 %vm177_vm0, %v134_v32 }
  0xad   :  { %380 = vmatprep.mubr.f32.mxu0 %v3755_v0 }
  0xb0   :  { %2097 = vmatmul.mubr.msk.f32.gmra.mrb[14].mxu0 %vm177_vm0, %v135_v33 }
  0xb1   :  { %386 = vmatprep.mubr.f32.mxu0 %v3755_v0 }
  0xb4   :  { %2098 = vmatmul.mubr.msk.f32.gmra.mrb[16].mxu0 %vm177_vm0, %v136_v34 }
  0xb5   :  { %392 = vmatprep.mubr.f32.mxu0 %v3755_v0 }
  0xb8   :  { %2099 = vmatmul.mubr.msk.f32.gmra.mrb[18].mxu0 %vm177_vm0, %v137_v35 }
  0xb9   :  { %398 = vmatprep.mubr.f32.mxu0 %v3755_v0 }
  0xbc   :  { %2100 = vmatmul.mubr.msk.f32.gmra.mrb[20].mxu0 %vm177_vm0, %v138_v36 }
  0xbd   :  { %404 = vmatprep.mubr.f32.mxu0 %v3755_v0 }
  0xc0   :  { %2101 = vmatmul.mubr.msk.f32.gmra.mrb[22].mxu0 %vm177_vm0, %v139_v37 }
  0xc1   :  { %410 = vmatprep.mubr.f32.mxu0 %v3755_v0 }
  0xc4   :  { %2102 = vmatmul.mubr.msk.f32.gmra.mrb[24].mxu0 %vm177_vm0, %v140_v38 }
  0xc5   :  { %416 = vmatprep.mubr.f32.mxu0 %v3755_v0 }
  0xc8   :  { %2103 = vmatmul.mubr.msk.f32.gmra.mrb[26].mxu0 %vm177_vm0, %v141_v39 }
  0xc9   :  { %422 = vmatprep.mubr.f32.mxu0 %v3755_v0 }
  0xcc   :  { %2104 = vmatmul.mubr.msk.f32.gmra.mrb[28].mxu0 %vm177_vm0, %v142_v40 }
  0xcd   :  { %428 = vmatprep.mubr.f32.mxu0 %v3755_v0 }
  0xd0   :  { %2105 = vmatmul.mubr.msk.f32.gmra.mrb[30].mxu0 %vm177_vm0, %v143_v41 }
  0xd1   :  { %434 = vmatprep.mubr.f32.mxu0 %v3755_v0 }
  0xd4   :  { %2106 = vmatmul.mubr.msk.f32.gmra.mrb[32].mxu0 %vm177_vm0, %v144_v42 }
  0xd5   :  { %440 = vmatprep.mubr.f32.mxu0 %v3755_v0 }
  0xd8   :  { %2107 = vmatmul.mubr.msk.f32.gmra.mrb[34].mxu0 %vm177_vm0, %v145_v43 }
  0xd9   :  { %446 = vmatprep.mubr.f32.mxu0 %v3755_v0 }
  0xdc   :  { %2108 = vmatmul.mubr.msk.f32.gmra.mrb[36].mxu0 %vm177_vm0, %v146_v44 }
  0xdd   :  { %452 = vmatprep.mubr.f32.mxu0 %v3755_v0 }
  0xe0   :  { %2109 = vmatmul.mubr.msk.f32.gmra.mrb[38].mxu0 %vm177_vm0, %v147_v45 }
  0xe1   :  { %458 = vmatprep.mubr.f32.mxu0 %v3755_v0 }
  0xe4   :  { %2110 = vmatmul.mubr.msk.f32.gmra.mrb[40].mxu0 %vm177_vm0, %v148_v46 }
  0xe5   :  { %464 = vmatprep.mubr.f32.mxu0 %v3755_v0 }
  0xe8   :  { %2111 = vmatmul.mubr.msk.f32.gmra.mrb[42].mxu0 %vm177_vm0, %v149_v47 }
  0xe9   :  { %470 = vmatprep.mubr.f32.mxu0 %v3755_v0 }
  0xec   :  { %2112 = vmatmul.mubr.msk.f32.gmra.mrb[44].mxu0 %vm177_vm0, %v150_v48 }
  0xed   :  { %476 = vmatprep.mubr.f32.mxu0 %v3755_v0 }
  0xf0   :  { %2113 = vmatmul.mubr.msk.f32.gmra.mrb[46].mxu0 %vm177_vm0, %v151_v49 }
  0xf1   :  { %482 = vmatprep.mubr.f32.mxu0 %v3755_v0 }
  0xf4   :  { %2114 = vmatmul.mubr.msk.f32.gmra.mrb[48].mxu0 %vm177_vm0, %v152_v50 }
  0xf5   :  { %488 = vmatprep.mubr.f32.mxu0 %v3755_v0 }
  0xf8   :  { %2115 = vmatmul.mubr.msk.f32.gmra.mrb[50].mxu0 %vm177_vm0, %v153_v51 }
  0xf9   :  { %494 = vmatprep.mubr.f32.mxu0 %v3755_v0 }
  0xfc   :  { %2116 = vmatmul.mubr.msk.f32.gmra.mrb[52].mxu0 %vm177_vm0, %v154_v52 }
  0xfd   :  { %500 = vmatprep.mubr.f32.mxu0 %v3755_v0 }
 0x100   :  { %2117 = vmatmul.mubr.msk.f32.gmra.mrb[54].mxu0 %vm177_vm0, %v155_v53 }
 0x101   :  { %506 = vmatprep.mubr.f32.mxu0 %v3755_v0 }
 0x104   :  { %2118 = vmatmul.mubr.msk.f32.gmra.mrb[56].mxu0 %vm177_vm0, %v156_v54 }
 0x105   :  { %512 = vmatprep.mubr.f32.mxu0 %v3755_v0 }
 0x108   :  { %2119 = vmatmul.mubr.msk.f32.gmra.mrb[58].mxu0 %vm177_vm0, %v157_v55 }
 0x109   :  { %518 = vmatprep.mubr.f32.mxu0 %v3755_v0 }
 0x10c   :  { %2120 = vmatmul.mubr.msk.f32.gmra.mrb[60].mxu0 %vm177_vm0, %v158_v56 }
 0x10d   :  { %524 = vmatprep.mubr.f32.mxu0 %v3755_v0 }
 0x110   :  { %2121 = vmatmul.mubr.msk.f32.gmra.mrb[62].mxu0 %vm177_vm0, %v159_v57 }
 0x111   :  { %2624 = shalt.err (!%p2621_p2)  }
 0x112   :  { %s2625_s28 = scalar_lea.vmem %s125_s23, 8192  ;;  %p2630_p4 = scmp.lt.s32.totalorder %s125_s23, %s125_s23 }
 0x113   :  { %p2626_p3 = scmp.ne.s32.totalorder %s125_s23, %s2625_s28  ;;  %p2631_p5 = scmp.lt.s32.totalorder %s2625_s28, %s2625_s28 }
 0x115   :  { %p2632_p6 = por %p2631_p5, %p2630_p4 }
 0x117   :  { %p2633_p7 = pnand %p2632_p6, %p2626_p3 }
 0x119   :  { %2636 = shalt.err (!%p2633_p7)  }
 0x11a   :  { %127 = dma.hbm_to_vmem [thread:$0]  %s3746_s0, 8192, %s125_s23, [#allocation3] }
 0x167   :  { %v2905_v58 = vpop.f32.mrb[0].mxu0 }
 0x168   :  { %v2907_v59 = vpop.f32.mrb[1].mxu0 }
 0x16b   :  { %v2909_v60 = vpop.f32.mrb[2].mxu0 }
 0x16c   :  { %v2911_v61 = vpop.f32.mrb[3].mxu0 }
 0x16f   :  { %v2913_v62 = vpop.f32.mrb[4].mxu0 }
 0x170   :  { %v2915_v63 = vpop.f32.mrb[5].mxu0 }
 0x173   :  { %v2917_v2 = vpop.f32.mrb[6].mxu0 }
 0x174   :  { %v2919_v3 = vpop.f32.mrb[7].mxu0 }
 0x177   :  { %v2921_v4 = vpop.f32.mrb[8].mxu0 }
 0x178   :  { %v2923_v5 = vpop.f32.mrb[9].mxu0 }
 0x17b   :  { %v2925_v6 = vpop.f32.mrb[10].mxu0 }
 0x17c   :  { %v2927_v7 = vpop.f32.mrb[11].mxu0 }
 0x17f   :  { %v2929_v8 = vpop.f32.mrb[12].mxu0 }
 0x180   :  { %v2931_v9 = vpop.f32.mrb[13].mxu0 }
 0x183   :  { %v2933_v10 = vpop.f32.mrb[14].mxu0 }
 0x184   :  { %v2935_v11 = vpop.f32.mrb[15].mxu0 }
 0x187   :  { %v2937_v12 = vpop.f32.mrb[16].mxu0 }
 0x188   :  { %v2939_v13 = vpop.f32.mrb[17].mxu0 }
 0x18b   :  { %v2941_v14 = vpop.f32.mrb[18].mxu0 }
 0x18c   :  { %v2943_v15 = vpop.f32.mrb[19].mxu0 }
 0x18f   :  { %v2945_v16 = vpop.f32.mrb[20].mxu0 }
 0x190   :  { %v2947_v17 = vpop.f32.mrb[21].mxu0 }
 0x193   :  { %v2949_v18 = vpop.f32.mrb[22].mxu0 }
 0x194   :  { %v2951_v19 = vpop.f32.mrb[23].mxu0 }
 0x197   :  { %v2953_v20 = vpop.f32.mrb[24].mxu0 }
 0x198   :  { %v2955_v21 = vpop.f32.mrb[25].mxu0 }
 0x19b   :  { %v2957_v22 = vpop.f32.mrb[26].mxu0 }
 0x19c   :  { %v2959_v23 = vpop.f32.mrb[27].mxu0 }
 0x19f   :  { %v2961_v24 = vpop.f32.mrb[28].mxu0 }
 0x1a0   :  { %v2963_v25 = vpop.f32.mrb[29].mxu0 }
 0x1a3   :  { %v2965_v26 = vpop.f32.mrb[30].mxu0 }
 0x1a4   :  { %v2967_v27 = vpop.f32.mrb[31].mxu0 }
 0x1a7   :  { %v2969_v28 = vpop.f32.mrb[32].mxu0 }
 0x1a8   :  { %v2971_v29 = vpop.f32.mrb[33].mxu0 }
 0x1ab   :  { %v442_v30 = vpop.f32.mrb[34].mxu0 }
 0x1ac   :  { %v2973_v31 = vpop.f32.mrb[35].mxu0 }
 0x1af   :  { %v2975_v32 = vpop.f32.mrb[36].mxu0 }
 0x1b0   :  { %v2977_v33 = vpop.f32.mrb[37].mxu0 }
 0x1b3   :  { %v454_v34 = vpop.f32.mrb[38].mxu0 }
 0x1b4   :  { %v2979_v35 = vpop.f32.mrb[39].mxu0 }
 0x1b7   :  { %v460_v36 = vpop.f32.mrb[40].mxu0 }
 0x1b8   :  { %v2981_v37 = vpop.f32.mrb[41].mxu0 }
 0x1bb   :  { %v466_v38 = vpop.f32.mrb[42].mxu0 }
 0x1bc   :  { %v2983_v39 = vpop.f32.mrb[43].mxu0 }
 0x1bf   :  { %v472_v40 = vpop.f32.mrb[44].mxu0 }
 0x1c0   :  { %v2985_v41 = vpop.f32.mrb[45].mxu0 }
 0x1c3   :  { %v478_v42 = vpop.f32.mrb[46].mxu0 }
 0x1c4   :  { %v2987_v43 = vpop.f32.mrb[47].mxu0 }
 0x1c7   :  { %v484_v44 = vpop.f32.mrb[48].mxu0 }
 0x1c8   :  { %v2989_v45 = vpop.f32.mrb[49].mxu0 }
 0x1c9   :  { %3782 = vst [vmem:[#allocation27_spill] sm:$0xff] %v2989_v45 }
 0x1cb   :  { %v490_v46 = vpop.f32.mrb[50].mxu0 }
 0x1cc   :  { %v2991_v47 = vpop.f32.mrb[51].mxu0 }
 0x1cd   :  { %3783 = vst [vmem:[#allocation28_spill] sm:$0xff] %v2991_v47  ;;  %v2143_v47 = vpack.c.bf16 %v2909_v60, %v2905_v58 }
 0x1cf   :  { %v496_v48 = vpop.f32.mrb[52].mxu0 }
 0x1d0   :  { %v2993_v49 = vpop.f32.mrb[53].mxu0 }
 0x1d1   :  { %3784 = vst [vmem:[#allocation29_spill] sm:$0xff] %v2993_v49 }
 0x1d3   :  { %v502_v50 = vpop.f32.mrb[54].mxu0 }
 0x1d4   :  { %v2995_v51 = vpop.f32.mrb[55].mxu0 }
 0x1d5   :  { %3785 = vst [vmem:[#allocation30_spill] sm:$0xff] %v2995_v51 }
 0x1d7   :  { %v508_v52 = vpop.f32.mrb[56].mxu0 }
 0x1d8   :  { %v2997_v53 = vpop.f32.mrb[57].mxu0 }
 0x1db   :  { %v514_v54 = vpop.f32.mrb[58].mxu0 }
 0x1dc   :  { %v2999_v55 = vpop.f32.mrb[59].mxu0 }
 0x1dd   :  { %3786 = vst [vmem:[#allocation31_spill] sm:$0xff] %v2999_v55 }
 0x1df   :  { %v520_v56 = vpop.f32.mrb[60].mxu0 }
 0x1e0   :  { %v3001_v57 = vpop.f32.mrb[61].mxu0 }
 0x1e3   :  { %v526_v0 = vpop.f32.mrb[62].mxu0 }
 0x1e4   :  { %v3003_v45 = vpop.f32.mrb[63].mxu0 }
 0x1e5   :  { %3787 = vst [vmem:[#allocation32_spill] sm:$0xff] %v3003_v45 }
 0x1e6   :  { %2667 = dma.done.wait [#allocation3], 8192 }
 0x1e7   :  { %2668 = vsyncadd [#allocation3], 4294959104  ;;  %v3788_v49 = vmov 0.0   ;;  %v3757_v51 = vmov 0.0|0.0   ;;  %v2146_v55 = vpack.c.bf16 %v2917_v2, %v2913_v62  ;;  %v2149_v45 = vpack.c.bf16 %v2925_v6, %v2921_v4  ;;  %v3015_v58 = vld [vmem:[#allocation2 + $0x8] sm:$0xff]  ;;  %s2685_s0 = smov [#allocation16]  }
 0x1e8   :  { %991 = vmatprep.mubr.f32.mxu0 %v3788_v49  ;;  %2142 = vmatprep.subr.bf16.mxu1 %v3757_v51  ;;  %v2152_v60 = vpack.c.bf16 %v2933_v10, %v2929_v8  ;;  %v2155_v62 = vpack.c.bf16 %v2941_v14, %v2937_v12  ;;  %v2158_v2 = vpack.c.bf16 %v2949_v18, %v2945_v16  ;;  %s2069_s3 = sshll.u32 %s2685_s0, 4  ;;  %s2070_s3 = int_to_ptr.vmem [resolvable:$true] %s2069_s3 }
 0x1e9   :  { %2144 = vmatpush1.bf16.msra.mxu1 %v2143_v47  ;;  %663 = vmatprep.mubr.f32.mxu1 %v3015_v58  ;;  %v2161_v4 = vpack.c.bf16 %v2957_v22, %v2953_v20  ;;  %v2164_v6 = vpack.c.bf16 %v2965_v26, %v2961_v24  ;;  %v2167_v8 = vpack.c.bf16 %v442_v30, %v2969_v28  ;;  %v535_v24 = vld [vmem:[#allocation2] sm:$0xff]  ;;  %v538_v26 = vld [vmem:[#allocation2 + $0x18] sm:$0xff]  ;;  %v895_v28 = vld [vmem:[#allocation10 + $0x8] sm:$0xff]  ;;  %s2637_s9 = scalar_lea.vmem %s2070_s3, 4096  ;;  %p2642_p9 = scmp.lt.s32.totalorder %s2070_s3, %s2070_s3 }
 0x1ea   :  { %2145 = vmatprep.subr.bf16.mxu1 %v3757_v51  ;;  %v2170_v10 = vpack.c.bf16 %v454_v34, %v2975_v32  ;;  %v2173_v12 = vpack.c.bf16 %v466_v38, %v460_v36  ;;  %v2176_v14 = vpack.c.bf16 %v478_v42, %v472_v40  ;;  %v2179_v16 = vpack.c.bf16 %v490_v46, %v484_v44  ;;  %v897_v30 = vld [vmem:[#allocation10 + $0x18] sm:$0xff]  ;;  %v894_v32 = vld [vmem:[#allocation10] sm:$0xff]  ;;  %v896_v36 = vld [vmem:[#allocation10 + $0x10] sm:$0xff]  ;;  %p2638_p8 = scmp.ne.s32.totalorder %s2070_s3, %s2637_s9  ;;  %p2643_p10 = scmp.lt.s32.totalorder %s2637_s9, %s2637_s9 }
 0x1eb   :  { %v2182_v18 = vpack.c.bf16 %v502_v50, %v496_v48  ;;  %v2185_v20 = vpack.c.bf16 %v514_v54, %v508_v52  ;;  %v2188_v22 = vpack.c.bf16 %v526_v0, %v520_v56  ;;  %v2190_v34 = vpack.c.bf16 %v897_v30, %v895_v28  ;;  %v899_v38 = vld [vmem:[#allocation10 + $0x28] sm:$0xff]  ;;  %v901_v40 = vld [vmem:[#allocation10 + $0x38] sm:$0xff]  ;;  %v900_v46 = vld [vmem:[#allocation10 + $0x30] sm:$0xff] }
 0x1ec   :  { %v2192_v42 = vpack.c.bf16 %v896_v36, %v894_v32  ;;  %v2194_v44 = vpack.c.bf16 %v901_v40, %v899_v38  ;;  %v903_v47 = vld [vmem:[#allocation10 + $0x48] sm:$0xff]  ;;  %v905_v0 = vld [vmem:[#allocation10 + $0x58] sm:$0xff]  ;;  %v902_v54 = vld [vmem:[#allocation10 + $0x40] sm:$0xff]  ;;  %p2644_p11 = por %p2643_p10, %p2642_p9 }
 0x1ed   :  { %2147 = vmatpush1.bf16.msra.mxu1 %v2146_v55  ;;  %2191 = vmatprep.subr.bf16.mxu0 %v2190_v34  ;;  %v537_v50 = vld [vmem:[#allocation2 + $0x10] sm:$0xff]  ;;  %v2198_v52 = vpack.c.bf16 %v905_v0, %v903_v47  ;;  %v540_v56 = vld [vmem:[#allocation2 + $0x28] sm:$0xff]  ;;  %v917_v32 = vld [vmem:[#allocation10 + $0xb8] sm:$0xff] }
 0x1ee   :  { %2148 = vmatprep.subr.bf16.mxu1 %v3757_v51  ;;  %2193 = vmatpush1.bf16.msra.mxu0 %v2192_v42  ;;  %v904_v55 = vld [vmem:[#allocation10 + $0x50] sm:$0xff]  ;;  %v544_v28 = vld [vmem:[#allocation2 + $0x48] sm:$0xff]  ;;  %v543_v36 = vld [vmem:[#allocation2 + $0x40] sm:$0xff]  ;;  %p2645_p12 = pnand %p2644_p11, %p2638_p8 }
 0x1ef   :  { %2195 = vmatprep.subr.bf16.mxu0 %v2194_v44  ;;  %v915_v30 = vld [vmem:[#allocation10 + $0xa8] sm:$0xff]  ;;  %v914_v40 = vld [vmem:[#allocation10 + $0xa0] sm:$0xff]  ;;  %v916_v42 = vld [vmem:[#allocation10 + $0xb0] sm:$0xff] }
 0x1f0   :  { %v2210_v38 = vpack.c.bf16 %v917_v32, %v915_v30  ;;  %v546_v44 = vld [vmem:[#allocation2 + $0x58] sm:$0xff]  ;;  %v2212_v47 = vpack.c.bf16 %v916_v42, %v914_v40  ;;  %v545_v0 = vld [vmem:[#allocation2 + $0x50] sm:$0xff]  ;;  %v3050_v30 = vld [vmem:[#allocation2 + $0x100] sm:$0xff] }
 0x1f1   :  { %2150 = vmatpush1.bf16.msra.mxu1 %v2149_v45  ;;  %v898_v45 = vld [vmem:[#allocation10 + $0x20] sm:$0xff]  ;;  %v3052_v32 = vld [vmem:[#allocation2 + $0x118] sm:$0xff]  ;;  %v3068_v42 = vld [vmem:[#allocation2 + $0x130] sm:$0xff] }
 0x1f2   :  { %2151 = vmatprep.subr.bf16.mxu1 %v3757_v51  ;;  %v2196_v48 = vpack.c.bf16 %v900_v46, %v898_v45  ;;  %v919_v45 = vld [vmem:[#allocation10 + $0xc8] sm:$0xff]  ;;  %v921_v46 = vld [vmem:[#allocation10 + $0xd8] sm:$0xff] }
 0x1f3   :  { %v3064_v40 = vld [vmem:[#allocation2 + $0x138] sm:$0xff] }
 0x1f4   :  { %2197 = vmatpush1.bf16.msra.mxu0 %v2196_v48  ;;  %v2214_v48 = vpack.c.bf16 %v921_v46, %v919_v45  ;;  %v3074_v45 = vld [vmem:[#allocation2 + $0x140] sm:$0xff]  ;;  %v3076_v46 = vld [vmem:[#allocation2 + $0x158] sm:$0xff] }
 0x1f5   :  { %2153 = vmatpush1.bf16.msra.mxu1 %v2152_v60  ;;  %v907_v60 = vld [vmem:[#allocation10 + $0x68] sm:$0xff]  ;;  %2199 = vmatprep.subr.bf16.mxu0 %v2198_v52  ;;  %v547_v52 = vld [vmem:[#allocation2 + $0x60] sm:$0xff] }
 0x1f6   :  { %2154 = vmatprep.subr.bf16.mxu1 %v3757_v51 }
 0x1f9   :  { %2156 = vmatpush1.bf16.msra.mxu1 %v2155_v62  ;;  %v909_v62 = vld [vmem:[#allocation10 + $0x78] sm:$0xff] }
 0x1fa   :  { %2157 = vmatprep.subr.bf16.mxu1 %v3757_v51 }
 0x1fd   :  { %2159 = vmatpush1.bf16.msra.mxu1 %v2158_v2  ;;  %v2200_v2 = vpack.c.bf16 %v904_v55, %v902_v54  ;;  %v550_v54 = vld [vmem:[#allocation2 + $0x78] sm:$0xff]  ;;  %v549_v55 = vld [vmem:[#allocation2 + $0x70] sm:$0xff] }
 0x1fe   :  { %2160 = vmatprep.subr.bf16.mxu1 %v3757_v51 }
 0x1ff   :  { %2201 = vmatpush1.bf16.msra.mxu0 %v2200_v2  ;;  %v553_v2 = vld [vmem:[#allocation2 + $0x90] sm:$0xff] }
 0x201   :  { %2162 = vmatpush1.bf16.msra.mxu1 %v2161_v4  ;;  %v539_v4 = vld [vmem:[#allocation2 + $0x20] sm:$0xff] }
 0x202   :  { %2163 = vmatprep.subr.bf16.mxu1 %v3757_v51 }
 0x205   :  { %2165 = vmatpush1.bf16.msra.mxu1 %v2164_v6  ;;  %v2202_v6 = vpack.c.bf16 %v909_v62, %v907_v60  ;;  %v551_v60 = vld [vmem:[#allocation2 + $0x80] sm:$0xff]  ;;  %v554_v62 = vld [vmem:[#allocation2 + $0x98] sm:$0xff] }
 0x206   :  { %2166 = vmatprep.subr.bf16.mxu1 %v3757_v51 }
 0x207   :  { %2203 = vmatprep.subr.bf16.mxu0 %v2202_v6  ;;  %v555_v6 = vld [vmem:[#allocation2 + $0xa0] sm:$0xff] }
 0x209   :  { %2168 = vmatpush1.bf16.msra.mxu1 %v2167_v8  ;;  %v906_v8 = vld [vmem:[#allocation10 + $0x60] sm:$0xff] }
 0x20a   :  { %2169 = vmatprep.subr.bf16.mxu1 %v3757_v51 }
 0x20d   :  { %2171 = vmatpush1.bf16.msra.mxu1 %v2170_v10  ;;  %v908_v10 = vld [vmem:[#allocation10 + $0x70] sm:$0xff] }
 0x20e   :  { %2172 = vmatprep.subr.bf16.mxu1 %v3757_v51 }
 0x211   :  { %2174 = vmatpush1.bf16.msra.mxu1 %v2173_v12  ;;  %v542_v12 = vld [vmem:[#allocation2 + $0x38] sm:$0xff] }
 0x212   :  { %2175 = vmatprep.subr.bf16.mxu1 %v3757_v51 }
 0x215   :  { %2177 = vmatpush1.bf16.msra.mxu1 %v2176_v14  ;;  %v911_v14 = vld [vmem:[#allocation10 + $0x88] sm:$0xff] }
 0x216   :  { %2178 = vmatprep.subr.bf16.mxu1 %v3757_v51 }
 0x219   :  { %2180 = vmatpush1.bf16.msra.mxu1 %v2179_v16  ;;  %v913_v16 = vld [vmem:[#allocation10 + $0x98] sm:$0xff] }
 0x21a   :  { %2181 = vmatprep.subr.bf16.mxu1 %v3757_v51 }
 0x21d   :  { %2183 = vmatpush1.bf16.msra.mxu1 %v2182_v18  ;;  %v2204_v18 = vpack.c.bf16 %v908_v10, %v906_v8  ;;  %v558_v8 = vld [vmem:[#allocation2 + $0xb8] sm:$0xff]  ;;  %v557_v10 = vld [vmem:[#allocation2 + $0xb0] sm:$0xff] }
 0x21e   :  { %2184 = vmatprep.subr.bf16.mxu1 %v3757_v51 }
 0x21f   :  { %2205 = vmatpush1.bf16.msra.mxu0 %v2204_v18  ;;  %v561_v18 = vld [vmem:[#allocation2 + $0xd0] sm:$0xff] }
 0x221   :  { %2186 = vmatpush1.bf16.msra.mxu1 %v2185_v20  ;;  %v541_v20 = vld [vmem:[#allocation2 + $0x30] sm:$0xff] }
 0x222   :  { %2187 = vmatprep.subr.bf16.mxu1 %v3757_v51 }
 0x225   :  { %2189 = vmatpush1.bf16.msra.mxu1 %v2188_v22  ;;  %v2206_v22 = vpack.c.bf16 %v913_v16, %v911_v14  ;;  %v559_v14 = vld [vmem:[#allocation2 + $0xc0] sm:$0xff]  ;;  %v562_v16 = vld [vmem:[#allocation2 + $0xd8] sm:$0xff] }
 0x226   :  { %2222 = vmatprep.subr.bf16.mxu1 %v3757_v51 }
 0x227   :  { %2207 = vmatprep.subr.bf16.mxu0 %v2206_v22  ;;  %v563_v22 = vld [vmem:[#allocation2 + $0xe0] sm:$0xff] }
 0x228   :  { %664 = vmatmul.mubr.f32.vlgmr.msra.gmra.mrb[0].mxu1 %v535_v24  ;;  %v910_v24 = vld [vmem:[#allocation10 + $0x80] sm:$0xff] }
 0x229   :  { %668 = vmatprep.mubr.f32.mxu1 %v538_v26  ;;  %v912_v26 = vld [vmem:[#allocation10 + $0x90] sm:$0xff] }
 0x22a   :  { %v2208_v34 = vpack.c.bf16 %v912_v26, %v910_v24  ;;  %v566_v24 = vld [vmem:[#allocation2 + $0xf8] sm:$0xff]  ;;  %v3044_v26 = vld [vmem:[#allocation2 + $0xf0] sm:$0xff] }
 0x22c   :  { %669 = vmatmul.mubr.f32.gmra.mrb[2].mxu1 %v537_v50  ;;  %2209 = vmatpush1.bf16.msra.mxu0 %v2208_v34  ;;  %v548_v50 = vld [vmem:[#allocation2 + $0x68] sm:$0xff]  ;;  %v3056_v34 = vld [vmem:[#allocation2 + $0x110] sm:$0xff] }
 0x22d   :  { %673 = vmatprep.mubr.f32.mxu1 %v540_v56  ;;  %2211 = vmatprep.subr.bf16.mxu0 %v2210_v38  ;;  %v552_v56 = vld [vmem:[#allocation2 + $0x88] sm:$0xff]  ;;  %v3062_v38 = vld [vmem:[#allocation2 + $0x120] sm:$0xff] }
 0x230   :  { %674 = vmatmul.mubr.f32.gmra.mrb[4].mxu1 %v539_v4  ;;  %2213 = vmatpush1.bf16.msra.mxu0 %v2212_v47  ;;  %v556_v4 = vld [vmem:[#allocation2 + $0xa8] sm:$0xff] }
 0x231   :  { %678 = vmatprep.mubr.f32.mxu1 %v542_v12  ;;  %2215 = vmatprep.subr.bf16.mxu0 %v2214_v48  ;;  %v560_v12 = vld [vmem:[#allocation2 + $0xc8] sm:$0xff]  ;;  %v3080_v48 = vld [vmem:[#allocation2 + $0x150] sm:$0xff] }
 0x232   :  { %v918_v47 = vld [vmem:[#allocation10 + $0xc0] sm:$0xff] }
 0x234   :  { %679 = vmatmul.mubr.f32.gmra.mrb[6].mxu1 %v541_v20  ;;  %v564_v20 = vld [vmem:[#allocation2 + $0xe8] sm:$0xff] }
 0x235   :  { %683 = vmatprep.mubr.f32.mxu1 %v544_v28  ;;  %v3046_v28 = vld [vmem:[#allocation2 + $0x108] sm:$0xff] }
 0x238   :  { %684 = vmatmul.mubr.f32.gmra.mrb[8].mxu1 %v543_v36  ;;  %v3058_v36 = vld [vmem:[#allocation2 + $0x128] sm:$0xff] }
 0x239   :  { %688 = vmatprep.mubr.f32.mxu1 %v546_v44  ;;  %v3070_v44 = vld [vmem:[#allocation2 + $0x148] sm:$0xff] }
 0x23c   :  { %689 = vmatmul.mubr.f32.gmra.mrb[10].mxu1 %v545_v0  ;;  %v920_v0 = vld [vmem:[#allocation10 + $0xd0] sm:$0xff] }
 0x23d   :  { %693 = vmatprep.mubr.f32.mxu1 %v548_v50  ;;  %v2216_v50 = vpack.c.bf16 %v920_v0, %v918_v47  ;;  %v3118_v47 = vld [vmem:[#allocation2 + $0x1c8] sm:$0xff]  ;;  %v3122_v0 = vld [vmem:[#allocation2 + $0x1c0] sm:$0xff] }
 0x23e   :  { %3791 = vst [vmem:[#allocation35_spill] sm:$0xff] %v3118_v47  ;;  %3792 = vst [vmem:[#allocation36_spill] sm:$0xff] %v3122_v0 }
 0x23f   :  { %2217 = vmatpush1.bf16.msra.mxu0 %v2216_v50  ;;  %v3124_v50 = vld [vmem:[#allocation2 + $0x1d8] sm:$0xff] }
 0x240   :  { %694 = vmatmul.mubr.f32.gmra.mrb[12].mxu1 %v547_v52  ;;  %v3082_v52 = vld [vmem:[#allocation2 + $0x168] sm:$0xff]  ;;  %3793 = vst [vmem:[#allocation37_spill] sm:$0xff] %v3124_v50 }
 0x241   :  { %698 = vmatprep.mubr.f32.mxu1 %v550_v54  ;;  %v923_v54 = vld [vmem:[#allocation10 + $0xe8] sm:$0xff] }
 0x244   :  { %699 = vmatmul.mubr.f32.gmra.mrb[14].mxu1 %v549_v55  ;;  %v925_v55 = vld [vmem:[#allocation10 + $0xf8] sm:$0xff] }
 0x245   :  { %703 = vmatprep.mubr.f32.mxu1 %v552_v56  ;;  %v2218_v56 = vpack.c.bf16 %v925_v55, %v923_v54  ;;  %v3128_v54 = vld [vmem:[#allocation2 + $0x1d0] sm:$0xff]  ;;  %v3130_v55 = vld [vmem:[#allocation2 + $0x1e8] sm:$0xff] }
 0x246   :  { %3794 = vst [vmem:[#allocation38_spill] sm:$0xff] %v3128_v54  ;;  %3795 = vst [vmem:[#allocation39_spill] sm:$0xff] %v3130_v55 }
 0x247   :  { %2219 = vmatprep.subr.bf16.mxu0 %v2218_v56  ;;  %v3134_v56 = vld [vmem:[#allocation2 + $0x1e0] sm:$0xff] }
 0x248   :  { %704 = vmatmul.mubr.f32.gmra.mrb[16].mxu1 %v551_v60  ;;  %v922_v60 = vld [vmem:[#allocation10 + $0xe0] sm:$0xff]  ;;  %3796 = vst [vmem:[#allocation40_spill] sm:$0xff] %v3134_v56 }
 0x249   :  { %708 = vmatprep.mubr.f32.mxu1 %v554_v62  ;;  %v924_v62 = vld [vmem:[#allocation10 + $0xf0] sm:$0xff] }
 0x24c   :  { %709 = vmatmul.mubr.f32.gmra.mrb[18].mxu1 %v553_v2  ;;  %v3086_v2 = vld [vmem:[#allocation2 + $0x160] sm:$0xff] }
 0x24d   :  { %713 = vmatprep.mubr.f32.mxu1 %v556_v4  ;;  %v2220_v4 = vpack.c.bf16 %v924_v62, %v922_v60  ;;  %v3136_v60 = vld [vmem:[#allocation2 + $0x1f8] sm:$0xff]  ;;  %v3140_v62 = vld [vmem:[#allocation2 + $0x1f0] sm:$0xff] }
 0x24e   :  { %3797 = vst [vmem:[#allocation41_spill] sm:$0xff] %v3136_v60  ;;  %3798 = vst [vmem:[#allocation42_spill] sm:$0xff] %v3140_v62 }
 0x24f   :  { %2221 = vmatpush1.bf16.msra.mxu0 %v2220_v4 }
 0x250   :  { %714 = vmatmul.mubr.f32.gmra.mrb[20].mxu1 %v555_v6  ;;  %v3088_v6 = vld [vmem:[#allocation2 + $0x178] sm:$0xff] }
 0x251   :  { %718 = vmatprep.mubr.f32.mxu1 %v558_v8  ;;  %v3092_v8 = vld [vmem:[#allocation2 + $0x170] sm:$0xff] }
 0x254   :  { %719 = vmatmul.mubr.f32.gmra.mrb[22].mxu1 %v557_v10  ;;  %v3094_v10 = vld [vmem:[#allocation2 + $0x188] sm:$0xff] }
 0x255   :  { %723 = vmatprep.mubr.f32.mxu1 %v560_v12  ;;  %v3098_v12 = vld [vmem:[#allocation2 + $0x180] sm:$0xff] }
 0x258   :  { %724 = vmatmul.mubr.f32.gmra.mrb[24].mxu1 %v559_v14  ;;  %v3100_v14 = vld [vmem:[#allocation2 + $0x198] sm:$0xff] }
 0x259   :  { %728 = vmatprep.mubr.f32.mxu1 %v562_v16  ;;  %v3104_v16 = vld [vmem:[#allocation2 + $0x190] sm:$0xff] }
 0x25c   :  { %729 = vmatmul.mubr.f32.gmra.mrb[26].mxu1 %v561_v18  ;;  %v3106_v18 = vld [vmem:[#allocation2 + $0x1a8] sm:$0xff] }
 0x25d   :  { %733 = vmatprep.mubr.f32.mxu1 %v564_v20  ;;  %v3110_v20 = vld [vmem:[#allocation2 + $0x1a0] sm:$0xff] }
 0x260   :  { %734 = vmatmul.mubr.f32.gmra.mrb[28].mxu1 %v563_v22  ;;  %v3112_v22 = vld [vmem:[#allocation2 + $0x1b8] sm:$0xff] }
 0x261   :  { %738 = vmatprep.mubr.f32.mxu1 %v566_v24  ;;  %3789 = vst [vmem:[#allocation33_spill] sm:$0xff] %v3112_v22  ;;  %v3116_v24 = vld [vmem:[#allocation2 + $0x1b0] sm:$0xff] }
 0x262   :  { %3790 = vst [vmem:[#allocation34_spill] sm:$0xff] %v3116_v24 }
 0x264   :  { %739 = vmatmul.mubr.f32.gmra.mrb[30].mxu1 %v3044_v26 }
 0x265   :  { %743 = vmatprep.mubr.f32.mxu1 %v3046_v28 }
 0x268   :  { %744 = vmatmul.mubr.f32.gmra.mrb[32].mxu1 %v3050_v30 }
 0x269   :  { %748 = vmatprep.mubr.f32.mxu1 %v3052_v32 }
 0x26c   :  { %749 = vmatmul.mubr.f32.gmra.mrb[34].mxu1 %v3056_v34 }
 0x26d   :  { %753 = vmatprep.mubr.f32.mxu1 %v3058_v36 }
 0x270   :  { %754 = vmatmul.mubr.f32.gmra.mrb[36].mxu1 %v3062_v38 }
 0x271   :  { %758 = vmatprep.mubr.f32.mxu1 %v3064_v40 }
 0x274   :  { %759 = vmatmul.mubr.f32.gmra.mrb[38].mxu1 %v3068_v42 }
 0x275   :  { %763 = vmatprep.mubr.f32.mxu1 %v3070_v44 }
 0x278   :  { %764 = vmatmul.mubr.f32.gmra.mrb[40].mxu1 %v3074_v45 }
 0x279   :  { %768 = vmatprep.mubr.f32.mxu1 %v3076_v46 }
 0x27c   :  { %769 = vmatmul.mubr.f32.gmra.mrb[42].mxu1 %v3080_v48 }
 0x27d   :  { %773 = vmatprep.mubr.f32.mxu1 %v3082_v52 }
 0x280   :  { %774 = vmatmul.mubr.f32.gmra.mrb[44].mxu1 %v3086_v2 }
 0x281   :  { %778 = vmatprep.mubr.f32.mxu1 %v3088_v6 }
 0x284   :  { %779 = vmatmul.mubr.f32.gmra.mrb[46].mxu1 %v3092_v8 }
 0x285   :  { %783 = vmatprep.mubr.f32.mxu1 %v3094_v10 }
 0x288   :  { %784 = vmatmul.mubr.f32.gmra.mrb[48].mxu1 %v3098_v12 }
 0x289   :  { %788 = vmatprep.mubr.f32.mxu1 %v3100_v14 }
 0x28c   :  { %789 = vmatmul.mubr.f32.gmra.mrb[50].mxu1 %v3104_v16 }
 0x28d   :  { %793 = vmatprep.mubr.f32.mxu1 %v3106_v18 }
 0x290   :  { %794 = vmatmul.mubr.f32.gmra.mrb[52].mxu1 %v3110_v20 }
 0x291   :  { %798 = vmatprep.mubr.f32.mxu1 %v3112_v22 }
 0x294   :  { %799 = vmatmul.mubr.f32.gmra.mrb[54].mxu1 %v3116_v24 }
 0x295   :  { %803 = vmatprep.mubr.f32.mxu1 %v3118_v47 }
 0x298   :  { %804 = vmatmul.mubr.f32.gmra.mrb[56].mxu1 %v3122_v0 }
 0x299   :  { %808 = vmatprep.mubr.f32.mxu1 %v3124_v50 }
 0x29c   :  { %809 = vmatmul.mubr.f32.gmra.mrb[58].mxu1 %v3128_v54 }
 0x29d   :  { %813 = vmatprep.mubr.f32.mxu1 %v3130_v55 }
 0x2a0   :  { %814 = vmatmul.mubr.f32.gmra.mrb[60].mxu1 %v3134_v56 }
 0x2a1   :  { %818 = vmatprep.mubr.f32.mxu1 %v3136_v60 }
 0x2a4   :  { %819 = vmatmul.mubr.f32.gmra.mrb[62].mxu1 %v3140_v62 }
 0x2a5   :  { %1248 = vmatprep.mubr.f32.mxu1 %v3015_v58 }
 0x2fb   :  { %v665_v4 = vpop.f32.mrb[0].mxu1 }
 0x2fc   :  { %v666_v51 = vadd.f32 %v665_v4, %v2907_v59  ;;  %v667_v54 = vpop.f32.mrb[1].mxu1 }
 0x2fe   :  { %v830_v55 = vadd.f32 %v2828_v1, %v666_v51 }
 0x2ff   :  { %v670_v50 = vpop.f32.mrb[2].mxu1 }
 0x300   :  { %v862_v0 = vmax.f32 %v830_v55, 0.0  ;;  %v671_v47 = vadd.f32 %v670_v50, %v2911_v61  ;;  %v672_v24 = vpop.f32.mrb[3].mxu1 }
 0x302   :  { %v831_v56 = vadd.f32 %v2828_v1, %v671_v47  ;;  %992 = vmatmul.mubr.f32.vlgmr.msra.gmra.mrb[64].mxu0 %v862_v0 }
 0x303   :  { %v675_v60 = vpop.f32.mrb[4].mxu1  ;;  %997 = vmatprep.mubr.f32.mxu0 %v3788_v49 }
 0x304   :  { %v863_v62 = vmax.f32 %v831_v56, 0.0  ;;  %v676_v58 = vadd.f32 %v675_v60, %v2915_v63  ;;  %v677_v22 = vpop.f32.mrb[5].mxu1 }
 0x306   :  { %v832_v59 = vadd.f32 %v2828_v1, %v676_v58  ;;  %998 = vmatmul.mubr.f32.gmra.mrb[66].mxu0 %v863_v62 }
 0x307   :  { %v680_v54 = vpop.f32.mrb[6].mxu1  ;;  %1003 = vmatprep.mubr.f32.mxu0 %v3788_v49 }
 0x308   :  { %v864_v51 = vmax.f32 %v832_v59, 0.0  ;;  %v681_v61 = vadd.f32 %v680_v54, %v2919_v3  ;;  %v682_v24 = vpop.f32.mrb[7].mxu1 }
 0x30a   :  { %v833_v47 = vadd.f32 %v2828_v1, %v681_v61  ;;  %1004 = vmatmul.mubr.f32.gmra.mrb[68].mxu0 %v864_v51 }
 0x30b   :  { %v685_v0 = vpop.f32.mrb[8].mxu1  ;;  %1009 = vmatprep.mubr.f32.mxu0 %v3788_v49 }
 0x30c   :  { %v865_v50 = vmax.f32 %v833_v47, 0.0  ;;  %v686_v63 = vadd.f32 %v685_v0, %v2923_v5  ;;  %v687_v22 = vpop.f32.mrb[9].mxu1 }
 0x30e   :  { %v834_v55 = vadd.f32 %v2828_v1, %v686_v63  ;;  %1010 = vmatmul.mubr.f32.gmra.mrb[70].mxu0 %v865_v50 }
 0x30f   :  { %v690_v56 = vpop.f32.mrb[10].mxu1  ;;  %1015 = vmatprep.mubr.f32.mxu0 %v3788_v49 }
 0x310   :  { %v866_v60 = vmax.f32 %v834_v55, 0.0  ;;  %v691_v3 = vadd.f32 %v690_v56, %v2927_v7  ;;  %v692_v62 = vpop.f32.mrb[11].mxu1 }
 0x312   :  { %v835_v4 = vadd.f32 %v2828_v1, %v691_v3  ;;  %1016 = vmatmul.mubr.f32.gmra.mrb[72].mxu0 %v866_v60 }
 0x313   :  { %v695_v58 = vpop.f32.mrb[12].mxu1  ;;  %1021 = vmatprep.mubr.f32.mxu0 %v3788_v49 }
 0x314   :  { %v867_v59 = vmax.f32 %v835_v4, 0.0  ;;  %v696_v5 = vadd.f32 %v695_v58, %v2931_v9  ;;  %v697_v54 = vpop.f32.mrb[13].mxu1 }
 0x316   :  { %v836_v51 = vadd.f32 %v2828_v1, %v696_v5  ;;  %1022 = vmatmul.mubr.f32.gmra.mrb[74].mxu0 %v867_v59 }
 0x317   :  { %v700_v61 = vpop.f32.mrb[14].mxu1  ;;  %1027 = vmatprep.mubr.f32.mxu0 %v3788_v49 }
 0x318   :  { %v868_v24 = vmax.f32 %v836_v51, 0.0  ;;  %v701_v7 = vadd.f32 %v700_v61, %v2935_v11  ;;  %v702_v47 = vpop.f32.mrb[15].mxu1 }
 0x31a   :  { %v837_v0 = vadd.f32 %v2828_v1, %v701_v7  ;;  %1028 = vmatmul.mubr.f32.gmra.mrb[76].mxu0 %v868_v24 }
 0x31b   :  { %v705_v50 = vpop.f32.mrb[16].mxu1  ;;  %1033 = vmatprep.mubr.f32.mxu0 %v3788_v49 }
 0x31c   :  { %v869_v63 = vmax.f32 %v837_v0, 0.0  ;;  %v706_v9 = vadd.f32 %v705_v50, %v2939_v13  ;;  %v707_v22 = vpop.f32.mrb[17].mxu1 }
 0x31e   :  { %v838_v55 = vadd.f32 %v2828_v1, %v706_v9  ;;  %1034 = vmatmul.mubr.f32.gmra.mrb[78].mxu0 %v869_v63 }
 0x31f   :  { %v710_v56 = vpop.f32.mrb[18].mxu1  ;;  %1039 = vmatprep.mubr.f32.mxu0 %v3788_v49 }
 0x320   :  { %v870_v60 = vmax.f32 %v838_v55, 0.0  ;;  %v711_v11 = vadd.f32 %v710_v56, %v2943_v15  ;;  %v712_v3 = vpop.f32.mrb[19].mxu1 }
 0x322   :  { %v839_v62 = vadd.f32 %v2828_v1, %v711_v11  ;;  %1040 = vmatmul.mubr.f32.gmra.mrb[80].mxu0 %v870_v60 }
 0x323   :  { %v715_v4 = vpop.f32.mrb[20].mxu1  ;;  %1045 = vmatprep.mubr.f32.mxu0 %v3788_v49 }
 0x324   :  { %v871_v58 = vmax.f32 %v839_v62, 0.0  ;;  %v716_v13 = vadd.f32 %v715_v4, %v2947_v17  ;;  %v717_v59 = vpop.f32.mrb[21].mxu1 }
 0x326   :  { %v840_v5 = vadd.f32 %v2828_v1, %v716_v13  ;;  %1046 = vmatmul.mubr.f32.gmra.mrb[82].mxu0 %v871_v58 }
 0x327   :  { %v720_v54 = vpop.f32.mrb[22].mxu1  ;;  %1051 = vmatprep.mubr.f32.mxu0 %v3788_v49 }
 0x328   :  { %v872_v51 = vmax.f32 %v840_v5, 0.0  ;;  %v721_v15 = vadd.f32 %v720_v54, %v2951_v19  ;;  %v722_v61 = vpop.f32.mrb[23].mxu1 }
 0x32a   :  { %v841_v24 = vadd.f32 %v2828_v1, %v721_v15  ;;  %1052 = vmatmul.mubr.f32.gmra.mrb[84].mxu0 %v872_v51 }
 0x32b   :  { %v725_v7 = vpop.f32.mrb[24].mxu1  ;;  %1057 = vmatprep.mubr.f32.mxu0 %v3788_v49 }
 0x32c   :  { %v873_v47 = vmax.f32 %v841_v24, 0.0  ;;  %v726_v17 = vadd.f32 %v725_v7, %v2955_v21  ;;  %v727_v0 = vpop.f32.mrb[25].mxu1 }
 0x32e   :  { %v842_v50 = vadd.f32 %v2828_v1, %v726_v17  ;;  %1058 = vmatmul.mubr.f32.gmra.mrb[86].mxu0 %v873_v47 }
 0x32f   :  { %v730_v63 = vpop.f32.mrb[26].mxu1  ;;  %1063 = vmatprep.mubr.f32.mxu0 %v3788_v49 }
 0x330   :  { %v874_v9 = vmax.f32 %v842_v50, 0.0  ;;  %v731_v19 = vadd.f32 %v730_v63, %v2959_v23  ;;  %v732_v22 = vpop.f32.mrb[27].mxu1 }
 0x332   :  { %v843_v55 = vadd.f32 %v2828_v1, %v731_v19  ;;  %1064 = vmatmul.mubr.f32.gmra.mrb[88].mxu0 %v874_v9 }
 0x333   :  { %v735_v56 = vpop.f32.mrb[28].mxu1  ;;  %1069 = vmatprep.mubr.f32.mxu0 %v3788_v49 }
 0x334   :  { %v875_v60 = vmax.f32 %v843_v55, 0.0  ;;  %v736_v21 = vadd.f32 %v735_v56, %v2963_v25  ;;  %v737_v11 = vpop.f32.mrb[29].mxu1 }
 0x336   :  { %v844_v3 = vadd.f32 %v2828_v1, %v736_v21  ;;  %1070 = vmatmul.mubr.f32.gmra.mrb[90].mxu0 %v875_v60 }
 0x337   :  { %v740_v62 = vpop.f32.mrb[30].mxu1  ;;  %1075 = vmatprep.mubr.f32.mxu0 %v3788_v49 }
 0x338   :  { %v876_v4 = vmax.f32 %v844_v3, 0.0  ;;  %v741_v23 = vadd.f32 %v740_v62, %v2967_v27  ;;  %v742_v58 = vpop.f32.mrb[31].mxu1 }
 0x33a   :  { %v845_v13 = vadd.f32 %v2828_v1, %v741_v23  ;;  %1076 = vmatmul.mubr.f32.gmra.mrb[92].mxu0 %v876_v4 }
 0x33b   :  { %v745_v59 = vpop.f32.mrb[32].mxu1  ;;  %1081 = vmatprep.mubr.f32.mxu0 %v3788_v49 }
 0x33c   :  { %v877_v5 = vmax.f32 %v845_v13, 0.0  ;;  %v746_v25 = vadd.f32 %v745_v59, %v2971_v29  ;;  %v747_v54 = vpop.f32.mrb[33].mxu1 }
 0x33e   :  { %v846_v51 = vadd.f32 %v2828_v1, %v746_v25  ;;  %1082 = vmatmul.mubr.f32.gmra.mrb[94].mxu0 %v877_v5 }
 0x33f   :  { %v750_v15 = vpop.f32.mrb[34].mxu1  ;;  %1087 = vmatprep.mubr.f32.mxu0 %v3788_v49 }
 0x340   :  { %v878_v61 = vmax.f32 %v846_v51, 0.0  ;;  %v751_v27 = vadd.f32 %v750_v15, %v2973_v31  ;;  %v752_v24 = vpop.f32.mrb[35].mxu1 }
 0x342   :  { %v847_v7 = vadd.f32 %v2828_v1, %v751_v27  ;;  %1088 = vmatmul.mubr.f32.gmra.mrb[96].mxu0 %v878_v61  ;;  %v3799_v27 = vld [vmem:[#allocation27_spill] sm:$0xff] }
 0x343   :  { %v755_v47 = vpop.f32.mrb[36].mxu1  ;;  %1093 = vmatprep.mubr.f32.mxu0 %v3788_v49 }
 0x344   :  { %v879_v17 = vmax.f32 %v847_v7, 0.0  ;;  %v756_v29 = vadd.f32 %v755_v47, %v2977_v33  ;;  %v757_v0 = vpop.f32.mrb[37].mxu1 }
 0x346   :  { %v848_v50 = vadd.f32 %v2828_v1, %v756_v29  ;;  %1094 = vmatmul.mubr.f32.gmra.mrb[98].mxu0 %v879_v17  ;;  %v3800_v29 = vld [vmem:[#allocation28_spill] sm:$0xff] }
 0x347   :  { %v760_v63 = vpop.f32.mrb[38].mxu1  ;;  %1099 = vmatprep.mubr.f32.mxu0 %v3788_v49 }
 0x348   :  { %v880_v9 = vmax.f32 %v848_v50, 0.0  ;;  %v761_v31 = vadd.f32 %v760_v63, %v2979_v35  ;;  %v762_v19 = vpop.f32.mrb[39].mxu1 }
 0x34a   :  { %v849_v22 = vadd.f32 %v2828_v1, %v761_v31  ;;  %1100 = vmatmul.mubr.f32.gmra.mrb[100].mxu0 %v880_v9  ;;  %v3801_v31 = vld [vmem:[#allocation29_spill] sm:$0xff] }
 0x34b   :  { %v765_v55 = vpop.f32.mrb[40].mxu1  ;;  %1105 = vmatprep.mubr.f32.mxu0 %v3788_v49 }
 0x34c   :  { %v881_v56 = vmax.f32 %v849_v22, 0.0  ;;  %v766_v33 = vadd.f32 %v765_v55, %v2981_v37  ;;  %v767_v60 = vpop.f32.mrb[41].mxu1 }
 0x34d   :  { %v3802_v60 = vld [vmem:[#allocation30_spill] sm:$0xff] }
 0x34e   :  { %v850_v21 = vadd.f32 %v2828_v1, %v766_v33  ;;  %1106 = vmatmul.mubr.f32.gmra.mrb[102].mxu0 %v881_v56 }
 0x34f   :  { %v770_v11 = vpop.f32.mrb[42].mxu1  ;;  %1111 = vmatprep.mubr.f32.mxu0 %v3788_v49 }
 0x350   :  { %v882_v3 = vmax.f32 %v850_v21, 0.0  ;;  %v771_v35 = vadd.f32 %v770_v11, %v2983_v39  ;;  %v772_v62 = vpop.f32.mrb[43].mxu1 }
 0x352   :  { %v851_v4 = vadd.f32 %v2828_v1, %v771_v35  ;;  %1112 = vmatmul.mubr.f32.gmra.mrb[104].mxu0 %v882_v3 }
 0x353   :  { %v775_v23 = vpop.f32.mrb[44].mxu1  ;;  %1117 = vmatprep.mubr.f32.mxu0 %v3788_v49 }
 0x354   :  { %v883_v58 = vmax.f32 %v851_v4, 0.0  ;;  %v776_v37 = vadd.f32 %v775_v23, %v2985_v41  ;;  %v777_v13 = vpop.f32.mrb[45].mxu1 }
 0x356   :  { %v852_v59 = vadd.f32 %v2828_v1, %v776_v37  ;;  %1118 = vmatmul.mubr.f32.gmra.mrb[106].mxu0 %v883_v58 }
 0x357   :  { %v780_v5 = vpop.f32.mrb[46].mxu1  ;;  %1123 = vmatprep.mubr.f32.mxu0 %v3788_v49 }
 0x358   :  { %v884_v25 = vmax.f32 %v852_v59, 0.0  ;;  %v781_v39 = vadd.f32 %v780_v5, %v2987_v43  ;;  %v782_v54 = vpop.f32.mrb[47].mxu1  ;;  %v3803_v59 = vld [vmem:[#allocation31_spill] sm:$0xff] }
 0x35a   :  { %v853_v51 = vadd.f32 %v2828_v1, %v781_v39  ;;  %1124 = vmatmul.mubr.f32.gmra.mrb[108].mxu0 %v884_v25 }
 0x35b   :  { %v785_v15 = vpop.f32.mrb[48].mxu1  ;;  %1129 = vmatprep.mubr.f32.mxu0 %v3788_v49 }
 0x35c   :  { %v885_v61 = vmax.f32 %v853_v51, 0.0  ;;  %v786_v41 = vadd.f32 %v785_v15, %v3799_v27  ;;  %v787_v24 = vpop.f32.mrb[49].mxu1 }
 0x35d   :  { %v3804_v24 = vld [vmem:[#allocation32_spill] sm:$0xff] }
 0x35e   :  { %v854_v7 = vadd.f32 %v2828_v1, %v786_v41  ;;  %1130 = vmatmul.mubr.f32.gmra.mrb[110].mxu0 %v885_v61 }
 0x35f   :  { %v790_v47 = vpop.f32.mrb[50].mxu1  ;;  %1135 = vmatprep.mubr.f32.mxu0 %v3788_v49 }
 0x360   :  { %v886_v17 = vmax.f32 %v854_v7, 0.0  ;;  %v791_v43 = vadd.f32 %v790_v47, %v3800_v29  ;;  %v792_v0 = vpop.f32.mrb[51].mxu1 }
 0x362   :  { %v855_v50 = vadd.f32 %v2828_v1, %v791_v43  ;;  %1136 = vmatmul.mubr.f32.gmra.mrb[112].mxu0 %v886_v17 }
 0x363   :  { %v795_v63 = vpop.f32.mrb[52].mxu1  ;;  %1141 = vmatprep.mubr.f32.mxu0 %v3788_v49 }
 0x364   :  { %v887_v9 = vmax.f32 %v855_v50, 0.0  ;;  %v796_v19 = vadd.f32 %v795_v63, %v3801_v31  ;;  %v797_v22 = vpop.f32.mrb[53].mxu1  ;;  %v3805_v31 = vmov 0.0|0.0  }
 0x366   :  { %v856_v55 = vadd.f32 %v2828_v1, %v796_v19  ;;  %1142 = vmatmul.mubr.f32.gmra.mrb[114].mxu0 %v887_v9 }
 0x367   :  { %v800_v56 = vpop.f32.mrb[54].mxu1  ;;  %1147 = vmatprep.mubr.f32.mxu0 %v3788_v49 }
 0x368   :  { %v888_v33 = vmax.f32 %v856_v55, 0.0  ;;  %v801_v21 = vadd.f32 %v800_v56, %v3802_v60  ;;  %v802_v11 = vpop.f32.mrb[55].mxu1 }
 0x36a   :  { %v857_v3 = vadd.f32 %v2828_v1, %v801_v21  ;;  %1148 = vmatmul.mubr.f32.gmra.mrb[116].mxu0 %v888_v33 }
 0x36b   :  { %v805_v35 = vpop.f32.mrb[56].mxu1  ;;  %1153 = vmatprep.mubr.f32.mxu0 %v3788_v49 }
 0x36c   :  { %v889_v62 = vmax.f32 %v857_v3, 0.0  ;;  %v806_v4 = vadd.f32 %v805_v35, %v2997_v53  ;;  %v807_v23 = vpop.f32.mrb[57].mxu1 }
 0x36e   :  { %v858_v58 = vadd.f32 %v2828_v1, %v806_v4  ;;  %1154 = vmatmul.mubr.f32.gmra.mrb[118].mxu0 %v889_v62 }
 0x36f   :  { %v810_v37 = vpop.f32.mrb[58].mxu1  ;;  %1159 = vmatprep.mubr.f32.mxu0 %v3788_v49 }
 0x370   :  { %v890_v13 = vmax.f32 %v858_v58, 0.0  ;;  %v811_v5 = vadd.f32 %v810_v37, %v3803_v59  ;;  %v812_v25 = vpop.f32.mrb[59].mxu1 }
 0x372   :  { %v859_v39 = vadd.f32 %v2828_v1, %v811_v5  ;;  %1160 = vmatmul.mubr.f32.gmra.mrb[120].mxu0 %v890_v13 }
 0x373   :  { %v815_v54 = vpop.f32.mrb[60].mxu1  ;;  %1165 = vmatprep.mubr.f32.mxu0 %v3788_v49 }
 0x374   :  { %v891_v51 = vmax.f32 %v859_v39, 0.0  ;;  %v816_v53 = vadd.f32 %v815_v54, %v3001_v57  ;;  %v817_v15 = vpop.f32.mrb[61].mxu1 }
 0x376   :  { %v860_v61 = vadd.f32 %v2828_v1, %v816_v53  ;;  %1166 = vmatmul.mubr.f32.gmra.mrb[122].mxu0 %v891_v51 }
 0x377   :  { %v820_v27 = vpop.f32.mrb[62].mxu1  ;;  %1171 = vmatprep.mubr.f32.mxu0 %v3788_v49 }
 0x378   :  { %v892_v41 = vmax.f32 %v860_v61, 0.0  ;;  %v821_v7 = vadd.f32 %v820_v27, %v3804_v24  ;;  %v822_v47 = vpop.f32.mrb[63].mxu1 }
 0x37a   :  { %v861_v17 = vadd.f32 %v2828_v1, %v821_v7  ;;  %1172 = vmatmul.mubr.f32.gmra.mrb[124].mxu0 %v892_v41 }
 0x37b   :  { %1177 = vmatprep.mubr.f32.mxu0 %v3788_v49 }
 0x37c   :  { %v893_v29 = vmax.f32 %v861_v17, 0.0 }
 0x37e   :  { %1178 = vmatmul.mubr.f32.gmra.mrb[126].mxu0 %v893_v29 }
 0x37f   :  { %1576 = vmatprep.mubr.f32.mxu0 %v3788_v49 }
 0x3d5   :  { %v993_v57 = vpop.f32.mrb[64].mxu0 }
 0x3d6   :  { %v3240_v43 = vpop.f32.mrb[65].mxu0 }
 0x3d9   :  { %v999_v0 = vpop.f32.mrb[66].mxu0 }
 0x3da   :  { %v2223_v50 = vpack.c.bf16 %v999_v0, %v993_v57  ;;  %v3242_v63 = vpop.f32.mrb[67].mxu0 }
 0x3dc   :  { %2224 = vmatpush1.bf16.msra.mxu1 %v2223_v50 }
 0x3dd   :  { %v1005_v9 = vpop.f32.mrb[68].mxu0  ;;  %2225 = vmatprep.subr.bf16.mxu1 %v3805_v31 }
 0x3de   :  { %v3245_v19 = vpop.f32.mrb[69].mxu0 }
 0x3e1   :  { %v1011_v1 = vpop.f32.mrb[70].mxu0 }
 0x3e2   :  { %v2226_v22 = vpack.c.bf16 %v1011_v1, %v1005_v9  ;;  %v3247_v55 = vpop.f32.mrb[71].mxu0 }
 0x3e4   :  { %2227 = vmatpush1.bf16.msra.mxu1 %v2226_v22 }
 0x3e5   :  { %v1017_v56 = vpop.f32.mrb[72].mxu0  ;;  %2228 = vmatprep.subr.bf16.mxu1 %v3805_v31 }
 0x3e6   :  { %v3250_v33 = vpop.f32.mrb[73].mxu0 }
 0x3e9   :  { %v1023_v60 = vpop.f32.mrb[74].mxu0 }
 0x3ea   :  { %v2229_v21 = vpack.c.bf16 %v1023_v60, %v1017_v56  ;;  %v3252_v11 = vpop.f32.mrb[75].mxu0 }
 0x3ec   :  { %2230 = vmatpush1.bf16.msra.mxu1 %v2229_v21 }
 0x3ed   :  { %v1029_v3 = vpop.f32.mrb[76].mxu0  ;;  %2231 = vmatprep.subr.bf16.mxu1 %v3805_v31 }
 0x3ee   :  { %v3255_v35 = vpop.f32.mrb[77].mxu0 }
 0x3f1   :  { %v1035_v62 = vpop.f32.mrb[78].mxu0 }
 0x3f2   :  { %v2232_v4 = vpack.c.bf16 %v1035_v62, %v1029_v3  ;;  %v3257_v23 = vpop.f32.mrb[79].mxu0 }
 0x3f4   :  { %2233 = vmatpush1.bf16.msra.mxu1 %v2232_v4 }
 0x3f5   :  { %v1041_v58 = vpop.f32.mrb[80].mxu0  ;;  %2234 = vmatprep.subr.bf16.mxu1 %v3805_v31 }
 0x3f6   :  { %v3260_v37 = vpop.f32.mrb[81].mxu0 }
 0x3f9   :  { %v1047_v13 = vpop.f32.mrb[82].mxu0 }
 0x3fa   :  { %v2235_v59 = vpack.c.bf16 %v1047_v13, %v1041_v58  ;;  %v3262_v5 = vpop.f32.mrb[83].mxu0 }
 0x3fc   :  { %2236 = vmatpush1.bf16.msra.mxu1 %v2235_v59 }
 0x3fd   :  { %v1053_v25 = vpop.f32.mrb[84].mxu0  ;;  %2237 = vmatprep.subr.bf16.mxu1 %v3805_v31 }
 0x3fe   :  { %v3265_v39 = vpop.f32.mrb[85].mxu0 }
 0x401   :  { %v1059_v54 = vpop.f32.mrb[86].mxu0 }
 0x402   :  { %v2238_v51 = vpack.c.bf16 %v1059_v54, %v1053_v25  ;;  %v3267_v53 = vpop.f32.mrb[87].mxu0 }
 0x404   :  { %2239 = vmatpush1.bf16.msra.mxu1 %v2238_v51 }
 0x405   :  { %v1065_v15 = vpop.f32.mrb[88].mxu0  ;;  %2240 = vmatprep.subr.bf16.mxu1 %v3805_v31 }
 0x406   :  { %v3270_v61 = vpop.f32.mrb[89].mxu0 }
 0x409   :  { %v1071_v27 = vpop.f32.mrb[90].mxu0 }
 0x40a   :  { %v2241_v41 = vpack.c.bf16 %v1071_v27, %v1065_v15  ;;  %v3272_v24 = vpop.f32.mrb[91].mxu0 }
 0x40c   :  { %2242 = vmatpush1.bf16.msra.mxu1 %v2241_v41 }
 0x40d   :  { %v1077_v7 = vpop.f32.mrb[92].mxu0  ;;  %2243 = vmatprep.subr.bf16.mxu1 %v3805_v31 }
 0x40e   :  { %v3275_v47 = vpop.f32.mrb[93].mxu0 }
 0x411   :  { %v1083_v17 = vpop.f32.mrb[94].mxu0 }
 0x412   :  { %v2244_v29 = vpack.c.bf16 %v1083_v17, %v1077_v7  ;;  %v3277_v57 = vpop.f32.mrb[95].mxu0  ;;  %v1480_v7 = vld [vmem:[#allocation13 + $0x8] sm:$0xff]  ;;  %v1482_v17 = vld [vmem:[#allocation13 + $0x18] sm:$0xff] }
 0x414   :  { %2245 = vmatpush1.bf16.msra.mxu1 %v2244_v29  ;;  %v2270_v29 = vpack.c.bf16 %v1482_v17, %v1480_v7  ;;  %v1484_v17 = vld [vmem:[#allocation13 + $0x28] sm:$0xff] }
 0x415   :  { %v1089_v0 = vpop.f32.mrb[96].mxu0  ;;  %2246 = vmatprep.subr.bf16.mxu1 %v3805_v31 }
 0x416   :  { %v3280_v50 = vpop.f32.mrb[97].mxu0  ;;  %2271 = vmatprep.subr.bf16.mxu0 %v2270_v29  ;;  %v1483_v29 = vld [vmem:[#allocation13 + $0x20] sm:$0xff] }
 0x419   :  { %v1095_v9 = vpop.f32.mrb[98].mxu0 }
 0x41a   :  { %v2247_v1 = vpack.c.bf16 %v1095_v9, %v1089_v0  ;;  %v3282_v22 = vpop.f32.mrb[99].mxu0  ;;  %v1479_v0 = vld [vmem:[#allocation13] sm:$0xff]  ;;  %v1481_v9 = vld [vmem:[#allocation13 + $0x10] sm:$0xff] }
 0x41c   :  { %2248 = vmatpush1.bf16.msra.mxu1 %v2247_v1 }
 0x41d   :  { %v1101_v56 = vpop.f32.mrb[100].mxu0  ;;  %2249 = vmatprep.subr.bf16.mxu1 %v3805_v31 }
 0x41e   :  { %v3285_v60 = vpop.f32.mrb[101].mxu0 }
 0x421   :  { %v1107_v21 = vpop.f32.mrb[102].mxu0 }
 0x422   :  { %v2250_v3 = vpack.c.bf16 %v1107_v21, %v1101_v56  ;;  %v3287_v62 = vpop.f32.mrb[103].mxu0  ;;  %v2272_v56 = vpack.c.bf16 %v1481_v9, %v1479_v0  ;;  %v1486_v0 = vld [vmem:[#allocation13 + $0x38] sm:$0xff] }
 0x423   :  { %v2274_v9 = vpack.c.bf16 %v1486_v0, %v1484_v17 }
 0x424   :  { %2251 = vmatpush1.bf16.msra.mxu1 %v2250_v3  ;;  %2273 = vmatpush1.bf16.msra.mxu0 %v2272_v56  ;;  %v1485_v56 = vld [vmem:[#allocation13 + $0x30] sm:$0xff] }
 0x425   :  { %v1113_v4 = vpop.f32.mrb[104].mxu0  ;;  %2252 = vmatprep.subr.bf16.mxu1 %v3805_v31  ;;  %2275 = vmatprep.subr.bf16.mxu0 %v2274_v9 }
 0x426   :  { %v3290_v58 = vpop.f32.mrb[105].mxu0 }
 0x429   :  { %v1119_v13 = vpop.f32.mrb[106].mxu0 }
 0x42a   :  { %v2253_v59 = vpack.c.bf16 %v1119_v13, %v1113_v4  ;;  %v3292_v25 = vpop.f32.mrb[107].mxu0 }
 0x42c   :  { %2254 = vmatpush1.bf16.msra.mxu1 %v2253_v59 }
 0x42d   :  { %v1125_v54 = vpop.f32.mrb[108].mxu0  ;;  %2255 = vmatprep.subr.bf16.mxu1 %v3805_v31 }
 0x42e   :  { %v3295_v51 = vpop.f32.mrb[109].mxu0 }
 0x42f   :  { %3806 = vst [vmem:[#allocation27_spill] sm:$0xff] %v3295_v51  ;;  %v1496_v51 = vld [vmem:[#allocation13 + $0x88] sm:$0xff] }
 0x431   :  { %v1131_v15 = vpop.f32.mrb[110].mxu0 }
 0x432   :  { %v2256_v27 = vpack.c.bf16 %v1131_v15, %v1125_v54  ;;  %v3297_v41 = vpop.f32.mrb[111].mxu0 }
 0x433   :  { %3807 = vst [vmem:[#allocation28_spill] sm:$0xff] %v3297_v41  ;;  %v1493_v41 = vld [vmem:[#allocation13 + $0x70] sm:$0xff] }
 0x434   :  { %2257 = vmatpush1.bf16.msra.mxu1 %v2256_v27 }
 0x435   :  { %v1137_v1 = vpop.f32.mrb[112].mxu0  ;;  %2258 = vmatprep.subr.bf16.mxu1 %v3805_v31 }
 0x436   :  { %v3300_v21 = vpop.f32.mrb[113].mxu0 }
 0x437   :  { %3808 = vst [vmem:[#allocation29_spill] sm:$0xff] %v3300_v21 }
 0x439   :  { %v1143_v3 = vpop.f32.mrb[114].mxu0 }
 0x43a   :  { %v2259_v4 = vpack.c.bf16 %v1143_v3, %v1137_v1  ;;  %v3302_v13 = vpop.f32.mrb[115].mxu0  ;;  %v2276_v1 = vpack.c.bf16 %v1485_v56, %v1483_v29  ;;  %v1490_v29 = vld [vmem:[#allocation13 + $0x58] sm:$0xff]  ;;  %v1487_v56 = vld [vmem:[#allocation13 + $0x40] sm:$0xff] }
 0x43b   :  { %3809 = vst [vmem:[#allocation30_spill] sm:$0xff] %v3302_v13 }
 0x43c   :  { %2260 = vmatpush1.bf16.msra.mxu1 %v2259_v4  ;;  %2277 = vmatpush1.bf16.msra.mxu0 %v2276_v1  ;;  %v1489_v1 = vld [vmem:[#allocation13 + $0x50] sm:$0xff] }
 0x43d   :  { %v1149_v59 = vpop.f32.mrb[116].mxu0  ;;  %2261 = vmatprep.subr.bf16.mxu1 %v3805_v31 }
 0x43e   :  { %v3305_v54 = vpop.f32.mrb[117].mxu0 }
 0x43f   :  { %3810 = vst [vmem:[#allocation31_spill] sm:$0xff] %v3305_v54 }
 0x441   :  { %v1155_v15 = vpop.f32.mrb[118].mxu0 }
 0x442   :  { %v2262_v27 = vpack.c.bf16 %v1155_v15, %v1149_v59  ;;  %v3307_v7 = vpop.f32.mrb[119].mxu0 }
 0x443   :  { %3811 = vst [vmem:[#allocation32_spill] sm:$0xff] %v3307_v7  ;;  %v1488_v7 = vld [vmem:[#allocation13 + $0x48] sm:$0xff] }
 0x444   :  { %2263 = vmatpush1.bf16.msra.mxu1 %v2262_v27  ;;  %v2278_v9 = vpack.c.bf16 %v1490_v29, %v1488_v7  ;;  %v1497_v29 = vld [vmem:[#allocation13 + $0x90] sm:$0xff] }
 0x445   :  { %v1161_v21 = vpop.f32.mrb[120].mxu0  ;;  %2264 = vmatprep.subr.bf16.mxu1 %v3805_v31 }
 0x446   :  { %v3310_v3 = vpop.f32.mrb[121].mxu0  ;;  %2279 = vmatprep.subr.bf16.mxu0 %v2278_v9 }
 0x447   :  { %3812 = vst [vmem:[#allocation43_spill] sm:$0xff] %v3310_v3  ;;  %v1492_v3 = vld [vmem:[#allocation13 + $0x68] sm:$0xff] }
 0x449   :  { %v1167_v4 = vpop.f32.mrb[122].mxu0 }
 0x44a   :  { %v2265_v54 = vpack.c.bf16 %v1167_v4, %v1161_v21  ;;  %v3312_v13 = vpop.f32.mrb[123].mxu0  ;;  %v1494_v21 = vld [vmem:[#allocation13 + $0x78] sm:$0xff]  ;;  %v2280_v4 = vpack.c.bf16 %v1489_v1, %v1487_v56  ;;  %v1500_v56 = vld [vmem:[#allocation13 + $0xa8] sm:$0xff] }
 0x44b   :  { %3813 = vst [vmem:[#allocation44_spill] sm:$0xff] %v3312_v13  ;;  %v2282_v13 = vpack.c.bf16 %v1494_v21, %v1492_v3  ;;  %v1495_v3 = vld [vmem:[#allocation13 + $0x80] sm:$0xff]  ;;  %v1502_v1 = vld [vmem:[#allocation13 + $0xb8] sm:$0xff]  ;;  %v3326_v21 = vld [vmem:[#allocation2 + $0x10] sm:$0xff] }
 0x44c   :  { %2266 = vmatpush1.bf16.msra.mxu1 %v2265_v54  ;;  %v1491_v54 = vld [vmem:[#allocation13 + $0x60] sm:$0xff]  ;;  %2281 = vmatpush1.bf16.msra.mxu0 %v2280_v4  ;;  %3818 = vst [vmem:[#allocation49_spill] sm:$0xff] %v3326_v21  ;;  %v2288_v9 = vpack.c.bf16 %v1497_v29, %v1495_v3  ;;  %v1505_v29 = vld [vmem:[#allocation13 + $0xd0] sm:$0xff] }
 0x44d   :  { %v1173_v59 = vpop.f32.mrb[124].mxu0  ;;  %2267 = vmatprep.subr.bf16.mxu1 %v3805_v31  ;;  %2283 = vmatprep.subr.bf16.mxu0 %v2282_v13  ;;  %v1499_v4 = vld [vmem:[#allocation13 + $0xa0] sm:$0xff]  ;;  %v1504_v13 = vld [vmem:[#allocation13 + $0xc8] sm:$0xff] }
 0x44e   :  { %v3315_v15 = vpop.f32.mrb[125].mxu0  ;;  %v1503_v3 = vld [vmem:[#allocation13 + $0xc0] sm:$0xff] }
 0x44f   :  { %3814 = vst [vmem:[#allocation45_spill] sm:$0xff] %v3315_v15  ;;  %v1498_v15 = vld [vmem:[#allocation13 + $0x98] sm:$0xff] }
 0x450   :  { %v2286_v7 = vpack.c.bf16 %v1498_v15, %v1496_v51  ;;  %v1506_v51 = vld [vmem:[#allocation13 + $0xd8] sm:$0xff] }
 0x451   :  { %v1179_v27 = vpop.f32.mrb[126].mxu0  ;;  %v3332_v15 = vld [vmem:[#allocation2 + $0x20] sm:$0xff] }
 0x452   :  { %v2268_v17 = vpack.c.bf16 %v1179_v27, %v1173_v59  ;;  %v3317_v0 = vpop.f32.mrb[127].mxu0  ;;  %v3320_v59 = vld [vmem:[#allocation2] sm:$0xff]  ;;  %v2284_v27 = vpack.c.bf16 %v1493_v41, %v1491_v54  ;;  %v2290_v41 = vpack.c.bf16 %v1502_v1, %v1500_v56  ;;  %v1501_v54 = vld [vmem:[#allocation13 + $0xb0] sm:$0xff] }
 0x453   :  { %3815 = vst [vmem:[#allocation46_spill] sm:$0xff] %v3317_v0  ;;  %3816 = vst [vmem:[#allocation47_spill] sm:$0xff] %v3320_v59  ;;  %v3329_v0 = vld [vmem:[#allocation2 + $0x28] sm:$0xff]  ;;  %v1510_v56 = vld [vmem:[#allocation13 + $0xf8] sm:$0xff] }
 0x454   :  { %2269 = vmatpush1.bf16.msra.mxu1 %v2268_v17  ;;  %v3323_v17 = vld [vmem:[#allocation2 + $0x18] sm:$0xff]  ;;  %2285 = vmatpush1.bf16.msra.mxu0 %v2284_v27  ;;  %3819 = vst [vmem:[#allocation50_spill] sm:$0xff] %v3329_v0  ;;  %v2294_v27 = vpack.c.bf16 %v1506_v51, %v1504_v13  ;;  %v3338_v1 = vld [vmem:[#allocation2 + $0x30] sm:$0xff] }
 0x455   :  { %2350 = vmatprep.subr.bf16.mxu1 %v3805_v31  ;;  %3817 = vst [vmem:[#allocation48_spill] sm:$0xff] %v3323_v17  ;;  %2287 = vmatprep.subr.bf16.mxu0 %v2286_v7  ;;  %v1508_v7 = vld [vmem:[#allocation13 + $0xe8] sm:$0xff]  ;;  %v3347_v51 = vld [vmem:[#allocation2 + $0x58] sm:$0xff] }
 0x456   :  { %3822 = vst [vmem:[#allocation53_spill] sm:$0xff] %v3347_v51 }
 0x457   :  { %1249 = vmatmul.mubr.f32.vlgmr.msra.gmra.mrb[64].mxu1 %v3320_v59  ;;  %v3335_v59 = vld [vmem:[#allocation2 + $0x38] sm:$0xff] }
 0x458   :  { %1253 = vmatprep.mubr.f32.mxu1 %v3323_v17  ;;  %2289 = vmatpush1.bf16.msra.mxu0 %v2288_v9  ;;  %v2292_v17 = vpack.c.bf16 %v1501_v54, %v1499_v4  ;;  %v2298_v9 = vpack.c.bf16 %v1510_v56, %v1508_v7  ;;  %v1507_v4 = vld [vmem:[#allocation13 + $0xe0] sm:$0xff]  ;;  %v1509_v54 = vld [vmem:[#allocation13 + $0xf0] sm:$0xff] }
 0x459   :  { %2291 = vmatprep.subr.bf16.mxu0 %v2290_v41  ;;  %v3344_v41 = vld [vmem:[#allocation2 + $0x40] sm:$0xff]  ;;  %v2300_v13 = vpack.c.bf16 %v1509_v54, %v1507_v4  ;;  %v3366_v7 = vld [vmem:[#allocation2 + $0x88] sm:$0xff]  ;;  %v3375_v4 = vld [vmem:[#allocation2 + $0x90] sm:$0xff] }
 0x45a   :  { %3821 = vst [vmem:[#allocation52_spill] sm:$0xff] %v3344_v41  ;;  %v3369_v56 = vld [vmem:[#allocation2 + $0x80] sm:$0xff]  ;;  %v3378_v54 = vld [vmem:[#allocation2 + $0xa8] sm:$0xff] }
 0x45b   :  { %1254 = vmatmul.mubr.f32.gmra.mrb[66].mxu1 %v3326_v21  ;;  %v3341_v21 = vld [vmem:[#allocation2 + $0x48] sm:$0xff]  ;;  %3824 = vst [vmem:[#allocation55_spill] sm:$0xff] %v3378_v54 }
 0x45c   :  { %1258 = vmatprep.mubr.f32.mxu1 %v3329_v0  ;;  %2293 = vmatpush1.bf16.msra.mxu0 %v2292_v17  ;;  %v2296_v0 = vpack.c.bf16 %v1505_v29, %v1503_v3  ;;  %3820 = vst [vmem:[#allocation51_spill] sm:$0xff] %v3341_v21  ;;  %v3350_v17 = vld [vmem:[#allocation2 + $0x50] sm:$0xff]  ;;  %v3357_v3 = vld [vmem:[#allocation2 + $0x60] sm:$0xff] }
 0x45d   :  { %2295 = vmatprep.subr.bf16.mxu0 %v2294_v27  ;;  %3823 = vst [vmem:[#allocation54_spill] sm:$0xff] %v3350_v17  ;;  %v3353_v27 = vld [vmem:[#allocation2 + $0x68] sm:$0xff]  ;;  %v3363_v29 = vld [vmem:[#allocation2 + $0x70] sm:$0xff] }
 0x45f   :  { %1259 = vmatmul.mubr.f32.gmra.mrb[68].mxu1 %v3332_v15 }
 0x460   :  { %1263 = vmatprep.mubr.f32.mxu1 %v3335_v59  ;;  %2297 = vmatpush1.bf16.msra.mxu0 %v2296_v0  ;;  %v3360_v0 = vld [vmem:[#allocation2 + $0x78] sm:$0xff] }
 0x461   :  { %2299 = vmatprep.subr.bf16.mxu0 %v2298_v9  ;;  %v3372_v9 = vld [vmem:[#allocation2 + $0x98] sm:$0xff] }
 0x463   :  { %1264 = vmatmul.mubr.f32.gmra.mrb[70].mxu1 %v3338_v1 }
 0x464   :  { %1268 = vmatprep.mubr.f32.mxu1 %v3341_v21  ;;  %2301 = vmatpush1.bf16.msra.mxu0 %v2300_v13  ;;  %v3381_v13 = vld [vmem:[#allocation2 + $0xa0] sm:$0xff] }
 0x465   :  { %2302 = vmatprep.subr.bf16.mxu0 %v3805_v31  ;;  %3825 = vst [vmem:[#allocation56_spill] sm:$0xff] %v3381_v13  ;;  %v3393_v21 = vld [vmem:[#allocation2 + $0xc0] sm:$0xff] }
 0x467   :  { %1269 = vmatmul.mubr.f32.gmra.mrb[72].mxu1 %v3344_v41  ;;  %v3390_v41 = vld [vmem:[#allocation2 + $0xc8] sm:$0xff] }
 0x468   :  { %1273 = vmatprep.mubr.f32.mxu1 %v3347_v51  ;;  %v3387_v51 = vld [vmem:[#allocation2 + $0xb0] sm:$0xff]  ;;  %3828 = vst [vmem:[#allocation59_spill] sm:$0xff] %v3390_v41 }
 0x469   :  { %3827 = vst [vmem:[#allocation58_spill] sm:$0xff] %v3387_v51 }
 0x46b   :  { %1274 = vmatmul.mubr.f32.gmra.mrb[74].mxu1 %v3350_v17  ;;  %v3384_v17 = vld [vmem:[#allocation2 + $0xb8] sm:$0xff] }
 0x46c   :  { %1278 = vmatprep.mubr.f32.mxu1 %v3353_v27  ;;  %3826 = vst [vmem:[#allocation57_spill] sm:$0xff] %v3384_v17 }
 0x46f   :  { %1279 = vmatmul.mubr.f32.gmra.mrb[76].mxu1 %v3357_v3 }
 0x470   :  { %1283 = vmatprep.mubr.f32.mxu1 %v3360_v0 }
 0x473   :  { %1284 = vmatmul.mubr.f32.gmra.mrb[78].mxu1 %v3363_v29 }
 0x474   :  { %1288 = vmatprep.mubr.f32.mxu1 %v3366_v7 }
 0x477   :  { %1289 = vmatmul.mubr.f32.gmra.mrb[80].mxu1 %v3369_v56 }
 0x478   :  { %1293 = vmatprep.mubr.f32.mxu1 %v3372_v9 }
 0x47b   :  { %1294 = vmatmul.mubr.f32.gmra.mrb[82].mxu1 %v3375_v4 }
 0x47c   :  { %1298 = vmatprep.mubr.f32.mxu1 %v3378_v54  ;;  %v3396_v54 = vld [vmem:[#allocation2 + $0xd8] sm:$0xff] }
 0x47f   :  { %1299 = vmatmul.mubr.f32.gmra.mrb[84].mxu1 %v3381_v13  ;;  %v3399_v13 = vld [vmem:[#allocation2 + $0xd0] sm:$0xff] }
 0x480   :  { %1303 = vmatprep.mubr.f32.mxu1 %v3384_v17  ;;  %v3402_v17 = vld [vmem:[#allocation2 + $0xe8] sm:$0xff] }
 0x483   :  { %1304 = vmatmul.mubr.f32.gmra.mrb[86].mxu1 %v3387_v51  ;;  %v3405_v51 = vld [vmem:[#allocation2 + $0xe0] sm:$0xff] }
 0x484   :  { %1308 = vmatprep.mubr.f32.mxu1 %v3390_v41  ;;  %v3408_v41 = vld [vmem:[#allocation2 + $0xf8] sm:$0xff] }
 0x487   :  { %1309 = vmatmul.mubr.f32.gmra.mrb[88].mxu1 %v3393_v21 }
 0x488   :  { %1313 = vmatprep.mubr.f32.mxu1 %v3396_v54 }
 0x48b   :  { %1314 = vmatmul.mubr.f32.gmra.mrb[90].mxu1 %v3399_v13 }
 0x48c   :  { %1318 = vmatprep.mubr.f32.mxu1 %v3402_v17 }
 0x48f   :  { %1319 = vmatmul.mubr.f32.gmra.mrb[92].mxu1 %v3405_v51 }
 0x490   :  { %1323 = vmatprep.mubr.f32.mxu1 %v3408_v41 }
 0x493   :  { %1324 = vmatmul.mubr.f32.gmra.mrb[94].mxu1 %v3044_v26  ;;  %v3829_v26 = vld [vmem:[#allocation33_spill] sm:$0xff] }
 0x494   :  { %1328 = vmatprep.mubr.f32.mxu1 %v3046_v28  ;;  %v3830_v28 = vld [vmem:[#allocation34_spill] sm:$0xff] }
 0x497   :  { %1329 = vmatmul.mubr.f32.gmra.mrb[96].mxu1 %v3050_v30  ;;  %v3831_v30 = vld [vmem:[#allocation35_spill] sm:$0xff] }
 0x498   :  { %1333 = vmatprep.mubr.f32.mxu1 %v3052_v32  ;;  %v3832_v32 = vld [vmem:[#allocation36_spill] sm:$0xff] }
 0x49b   :  { %1334 = vmatmul.mubr.f32.gmra.mrb[98].mxu1 %v3056_v34  ;;  %v3833_v34 = vld [vmem:[#allocation37_spill] sm:$0xff] }
 0x49c   :  { %1338 = vmatprep.mubr.f32.mxu1 %v3058_v36  ;;  %v3834_v36 = vld [vmem:[#allocation38_spill] sm:$0xff] }
 0x49f   :  { %1339 = vmatmul.mubr.f32.gmra.mrb[100].mxu1 %v3062_v38  ;;  %v3835_v38 = vld [vmem:[#allocation39_spill] sm:$0xff] }
 0x4a0   :  { %1343 = vmatprep.mubr.f32.mxu1 %v3064_v40  ;;  %v3836_v40 = vld [vmem:[#allocation40_spill] sm:$0xff] }
 0x4a3   :  { %1344 = vmatmul.mubr.f32.gmra.mrb[102].mxu1 %v3068_v42  ;;  %v3837_v42 = vld [vmem:[#allocation41_spill] sm:$0xff] }
 0x4a4   :  { %1348 = vmatprep.mubr.f32.mxu1 %v3070_v44  ;;  %v3838_v44 = vld [vmem:[#allocation42_spill] sm:$0xff] }
 0x4a7   :  { %1349 = vmatmul.mubr.f32.gmra.mrb[104].mxu1 %v3074_v45  ;;  %v3445_v45 = vld [vmem:[#allocation12] ss:$0 sm:$0xff] }
 0x4a8   :  { %1353 = vmatprep.mubr.f32.mxu1 %v3076_v46 }
 0x4ab   :  { %1354 = vmatmul.mubr.f32.gmra.mrb[106].mxu1 %v3080_v48 }
 0x4ac   :  { %1358 = vmatprep.mubr.f32.mxu1 %v3082_v52 }
 0x4af   :  { %1359 = vmatmul.mubr.f32.gmra.mrb[108].mxu1 %v3086_v2 }
 0x4b0   :  { %1363 = vmatprep.mubr.f32.mxu1 %v3088_v6 }
 0x4b3   :  { %1364 = vmatmul.mubr.f32.gmra.mrb[110].mxu1 %v3092_v8 }
 0x4b4   :  { %1368 = vmatprep.mubr.f32.mxu1 %v3094_v10 }
 0x4b7   :  { %1369 = vmatmul.mubr.f32.gmra.mrb[112].mxu1 %v3098_v12 }
 0x4b8   :  { %1373 = vmatprep.mubr.f32.mxu1 %v3100_v14 }
 0x4bb   :  { %1374 = vmatmul.mubr.f32.gmra.mrb[114].mxu1 %v3104_v16 }
 0x4bc   :  { %1378 = vmatprep.mubr.f32.mxu1 %v3106_v18 }
 0x4bf   :  { %1379 = vmatmul.mubr.f32.gmra.mrb[116].mxu1 %v3110_v20 }
 0x4c0   :  { %1383 = vmatprep.mubr.f32.mxu1 %v3829_v26 }
 0x4c3   :  { %1384 = vmatmul.mubr.f32.gmra.mrb[118].mxu1 %v3830_v28 }
 0x4c4   :  { %1388 = vmatprep.mubr.f32.mxu1 %v3831_v30 }
 0x4c7   :  { %1389 = vmatmul.mubr.f32.gmra.mrb[120].mxu1 %v3832_v32 }
 0x4c8   :  { %1393 = vmatprep.mubr.f32.mxu1 %v3833_v34 }
 0x4cb   :  { %1394 = vmatmul.mubr.f32.gmra.mrb[122].mxu1 %v3834_v36 }
 0x4cc   :  { %1398 = vmatprep.mubr.f32.mxu1 %v3835_v38 }
 0x4cf   :  { %1399 = vmatmul.mubr.f32.gmra.mrb[124].mxu1 %v3836_v40 }
 0x4d0   :  { %1403 = vmatprep.mubr.f32.mxu1 %v3837_v42 }
 0x4d3   :  { %1404 = vmatmul.mubr.f32.gmra.mrb[126].mxu1 %v3838_v44 }
 0x4d4   :  { %1863 = vmatprep.mubr.f32.mxu1 %v3353_v27 }
 0x52a   :  { %v1250_v46 = vpop.f32.mrb[64].mxu1 }
 0x52b   :  { %v1251_v48 = vadd.f32 %v1250_v46, %v3240_v43  ;;  %v1252_v52 = vpop.f32.mrb[65].mxu1 }
 0x52d   :  { %v1415_v2 = vadd.f32 %v3445_v45, %v1251_v48 }
 0x52e   :  { %v1255_v6 = vpop.f32.mrb[66].mxu1 }
 0x52f   :  { %v1447_v8 = vmax.f32 %v1415_v2, 0.0  ;;  %v1256_v10 = vadd.f32 %v1255_v6, %v3242_v63  ;;  %v1257_v12 = vpop.f32.mrb[67].mxu1 }
 0x531   :  { %v1416_v14 = vadd.f32 %v3445_v45, %v1256_v10  ;;  %1577 = vmatmul.mubr.f32.vlgmr.msra.gmra.mrb[128].mxu0 %v1447_v8 }
 0x532   :  { %v1260_v16 = vpop.f32.mrb[68].mxu1  ;;  %1582 = vmatprep.mubr.f32.mxu0 %v3788_v49 }
 0x533   :  { %v1448_v18 = vmax.f32 %v1416_v14, 0.0  ;;  %v1261_v20 = vadd.f32 %v1260_v16, %v3245_v19  ;;  %v1262_v27 = vpop.f32.mrb[69].mxu1 }
 0x535   :  { %v1417_v43 = vadd.f32 %v3445_v45, %v1261_v20  ;;  %1583 = vmatmul.mubr.f32.gmra.mrb[130].mxu0 %v1448_v18 }
 0x536   :  { %v1265_v26 = vpop.f32.mrb[70].mxu1  ;;  %1588 = vmatprep.mubr.f32.mxu0 %v3788_v49 }
 0x537   :  { %v1449_v28 = vmax.f32 %v1417_v43, 0.0  ;;  %v1266_v63 = vadd.f32 %v1265_v26, %v3247_v55  ;;  %v1267_v30 = vpop.f32.mrb[71].mxu1 }
 0x539   :  { %v1418_v32 = vadd.f32 %v3445_v45, %v1266_v63  ;;  %1589 = vmatmul.mubr.f32.gmra.mrb[132].mxu0 %v1449_v28 }
 0x53a   :  { %v1270_v34 = vpop.f32.mrb[72].mxu1  ;;  %1594 = vmatprep.mubr.f32.mxu0 %v3788_v49 }
 0x53b   :  { %v1450_v36 = vmax.f32 %v1418_v32, 0.0  ;;  %v1271_v19 = vadd.f32 %v1270_v34, %v3250_v33  ;;  %v1272_v38 = vpop.f32.mrb[73].mxu1 }
 0x53d   :  { %v1419_v40 = vadd.f32 %v3445_v45, %v1271_v19  ;;  %1595 = vmatmul.mubr.f32.gmra.mrb[134].mxu0 %v1450_v36 }
 0x53e   :  { %v1275_v42 = vpop.f32.mrb[74].mxu1  ;;  %1600 = vmatprep.mubr.f32.mxu0 %v3788_v49 }
 0x53f   :  { %v1451_v44 = vmax.f32 %v1419_v40, 0.0  ;;  %v1276_v55 = vadd.f32 %v1275_v42, %v3252_v11  ;;  %v1277_v46 = vpop.f32.mrb[75].mxu1 }
 0x541   :  { %v1420_v48 = vadd.f32 %v3445_v45, %v1276_v55  ;;  %1601 = vmatmul.mubr.f32.gmra.mrb[136].mxu0 %v1451_v44 }
 0x542   :  { %v1280_v52 = vpop.f32.mrb[76].mxu1  ;;  %1606 = vmatprep.mubr.f32.mxu0 %v3788_v49 }
 0x543   :  { %v1452_v2 = vmax.f32 %v1420_v48, 0.0  ;;  %v1281_v33 = vadd.f32 %v1280_v52, %v3255_v35  ;;  %v1282_v6 = vpop.f32.mrb[77].mxu1 }
 0x545   :  { %v1421_v8 = vadd.f32 %v3445_v45, %v1281_v33  ;;  %1607 = vmatmul.mubr.f32.gmra.mrb[138].mxu0 %v1452_v2 }
 0x546   :  { %v1285_v10 = vpop.f32.mrb[78].mxu1  ;;  %1612 = vmatprep.mubr.f32.mxu0 %v3788_v49 }
 0x547   :  { %v1453_v12 = vmax.f32 %v1421_v8, 0.0  ;;  %v1286_v11 = vadd.f32 %v1285_v10, %v3257_v23  ;;  %v1287_v14 = vpop.f32.mrb[79].mxu1 }
 0x549   :  { %v1422_v16 = vadd.f32 %v3445_v45, %v1286_v11  ;;  %1613 = vmatmul.mubr.f32.gmra.mrb[140].mxu0 %v1453_v12 }
 0x54a   :  { %v1290_v18 = vpop.f32.mrb[80].mxu1  ;;  %1618 = vmatprep.mubr.f32.mxu0 %v3788_v49 }
 0x54b   :  { %v1454_v20 = vmax.f32 %v1422_v16, 0.0  ;;  %v1291_v35 = vadd.f32 %v1290_v18, %v3260_v37  ;;  %v1292_v27 = vpop.f32.mrb[81].mxu1 }
 0x54d   :  { %v1423_v43 = vadd.f32 %v3445_v45, %v1291_v35  ;;  %1619 = vmatmul.mubr.f32.gmra.mrb[142].mxu0 %v1454_v20 }
 0x54e   :  { %v1295_v26 = vpop.f32.mrb[82].mxu1  ;;  %1624 = vmatprep.mubr.f32.mxu0 %v3788_v49 }
 0x54f   :  { %v1455_v28 = vmax.f32 %v1423_v43, 0.0  ;;  %v1296_v23 = vadd.f32 %v1295_v26, %v3262_v5  ;;  %v1297_v63 = vpop.f32.mrb[83].mxu1 }
 0x551   :  { %v1424_v30 = vadd.f32 %v3445_v45, %v1296_v23  ;;  %1625 = vmatmul.mubr.f32.gmra.mrb[144].mxu0 %v1455_v28 }
 0x552   :  { %v1300_v32 = vpop.f32.mrb[84].mxu1  ;;  %1630 = vmatprep.mubr.f32.mxu0 %v3788_v49 }
 0x553   :  { %v1456_v34 = vmax.f32 %v1424_v30, 0.0  ;;  %v1301_v37 = vadd.f32 %v1300_v32, %v3265_v39  ;;  %v1302_v36 = vpop.f32.mrb[85].mxu1 }
 0x555   :  { %v1425_v19 = vadd.f32 %v3445_v45, %v1301_v37  ;;  %1631 = vmatmul.mubr.f32.gmra.mrb[146].mxu0 %v1456_v34 }
 0x556   :  { %v1305_v38 = vpop.f32.mrb[86].mxu1  ;;  %1636 = vmatprep.mubr.f32.mxu0 %v3788_v49 }
 0x557   :  { %v1457_v40 = vmax.f32 %v1425_v19, 0.0  ;;  %v1306_v5 = vadd.f32 %v1305_v38, %v3267_v53  ;;  %v1307_v42 = vpop.f32.mrb[87].mxu1 }
 0x559   :  { %v1426_v44 = vadd.f32 %v3445_v45, %v1306_v5  ;;  %1637 = vmatmul.mubr.f32.gmra.mrb[148].mxu0 %v1457_v40 }
 0x55a   :  { %v1310_v55 = vpop.f32.mrb[88].mxu1  ;;  %1642 = vmatprep.mubr.f32.mxu0 %v3788_v49 }
 0x55b   :  { %v1458_v46 = vmax.f32 %v1426_v44, 0.0  ;;  %v1311_v39 = vadd.f32 %v1310_v55, %v3270_v61  ;;  %v1312_v48 = vpop.f32.mrb[89].mxu1 }
 0x55d   :  { %v1427_v52 = vadd.f32 %v3445_v45, %v1311_v39  ;;  %1643 = vmatmul.mubr.f32.gmra.mrb[150].mxu0 %v1458_v46 }
 0x55e   :  { %v1315_v2 = vpop.f32.mrb[90].mxu1  ;;  %1648 = vmatprep.mubr.f32.mxu0 %v3788_v49 }
 0x55f   :  { %v1459_v33 = vmax.f32 %v1427_v52, 0.0  ;;  %v1316_v53 = vadd.f32 %v1315_v2, %v3272_v24  ;;  %v1317_v6 = vpop.f32.mrb[91].mxu1 }
 0x561   :  { %v1428_v8 = vadd.f32 %v3445_v45, %v1316_v53  ;;  %1649 = vmatmul.mubr.f32.gmra.mrb[152].mxu0 %v1459_v33 }
 0x562   :  { %v1320_v10 = vpop.f32.mrb[92].mxu1  ;;  %1654 = vmatprep.mubr.f32.mxu0 %v3788_v49 }
 0x563   :  { %v1460_v12 = vmax.f32 %v1428_v8, 0.0  ;;  %v1321_v61 = vadd.f32 %v1320_v10, %v3275_v47  ;;  %v1322_v11 = vpop.f32.mrb[93].mxu1  ;;  %v3839_v8 = vld [vmem:[#allocation27_spill] sm:$0xff] }
 0x565   :  { %v1429_v14 = vadd.f32 %v3445_v45, %v1321_v61  ;;  %1655 = vmatmul.mubr.f32.gmra.mrb[154].mxu0 %v1460_v12 }
 0x566   :  { %v1325_v16 = vpop.f32.mrb[94].mxu1  ;;  %1660 = vmatprep.mubr.f32.mxu0 %v3788_v49 }
 0x567   :  { %v1461_v18 = vmax.f32 %v1429_v14, 0.0  ;;  %v1326_v24 = vadd.f32 %v1325_v16, %v3277_v57  ;;  %v1327_v20 = vpop.f32.mrb[95].mxu1  ;;  %v3840_v14 = vld [vmem:[#allocation28_spill] sm:$0xff] }
 0x569   :  { %v1430_v35 = vadd.f32 %v3445_v45, %v1326_v24  ;;  %1661 = vmatmul.mubr.f32.gmra.mrb[156].mxu0 %v1461_v18 }
 0x56a   :  { %v1330_v27 = vpop.f32.mrb[96].mxu1  ;;  %1666 = vmatprep.mubr.f32.mxu0 %v3788_v49 }
 0x56b   :  { %v1462_v43 = vmax.f32 %v1430_v35, 0.0  ;;  %v1331_v47 = vadd.f32 %v1330_v27, %v3280_v50  ;;  %v1332_v26 = vpop.f32.mrb[97].mxu1  ;;  %v3841_v35 = vld [vmem:[#allocation29_spill] sm:$0xff] }
 0x56d   :  { %v1431_v28 = vadd.f32 %v3445_v45, %v1331_v47  ;;  %1667 = vmatmul.mubr.f32.gmra.mrb[158].mxu0 %v1462_v43 }
 0x56e   :  { %v1335_v23 = vpop.f32.mrb[98].mxu1  ;;  %1672 = vmatprep.mubr.f32.mxu0 %v3788_v49 }
 0x56f   :  { %v1463_v63 = vmax.f32 %v1431_v28, 0.0  ;;  %v1336_v57 = vadd.f32 %v1335_v23, %v3282_v22  ;;  %v1337_v30 = vpop.f32.mrb[99].mxu1  ;;  %v3842_v23 = vld [vmem:[#allocation30_spill] sm:$0xff] }
 0x571   :  { %v1432_v32 = vadd.f32 %v3445_v45, %v1336_v57  ;;  %1673 = vmatmul.mubr.f32.gmra.mrb[160].mxu0 %v1463_v63 }
 0x572   :  { %v1340_v34 = vpop.f32.mrb[100].mxu1  ;;  %1678 = vmatprep.mubr.f32.mxu0 %v3788_v49 }
 0x573   :  { %v1464_v37 = vmax.f32 %v1432_v32, 0.0  ;;  %v1341_v50 = vadd.f32 %v1340_v34, %v3285_v60  ;;  %v1342_v36 = vpop.f32.mrb[101].mxu1 }
 0x575   :  { %v1433_v19 = vadd.f32 %v3445_v45, %v1341_v50  ;;  %1679 = vmatmul.mubr.f32.gmra.mrb[162].mxu0 %v1464_v37  ;;  %v3843_v37 = vld [vmem:[#allocation31_spill] sm:$0xff] }
 0x576   :  { %v1345_v38 = vpop.f32.mrb[102].mxu1  ;;  %1684 = vmatprep.mubr.f32.mxu0 %v3788_v49 }
 0x577   :  { %v1465_v40 = vmax.f32 %v1433_v19, 0.0  ;;  %v1346_v22 = vadd.f32 %v1345_v38, %v3287_v62  ;;  %v1347_v5 = vpop.f32.mrb[103].mxu1 }
 0x579   :  { %v1434_v42 = vadd.f32 %v3445_v45, %v1346_v22  ;;  %1685 = vmatmul.mubr.f32.gmra.mrb[164].mxu0 %v1465_v40  ;;  %v3844_v22 = vld [vmem:[#allocation32_spill] sm:$0xff] }
 0x57a   :  { %v1350_v44 = vpop.f32.mrb[104].mxu1  ;;  %1690 = vmatprep.mubr.f32.mxu0 %v3788_v49 }
 0x57b   :  { %v1466_v55 = vmax.f32 %v1434_v42, 0.0  ;;  %v1351_v60 = vadd.f32 %v1350_v44, %v3290_v58  ;;  %v1352_v46 = vpop.f32.mrb[105].mxu1 }
 0x57c   :  { %v3845_v46 = vld [vmem:[#allocation43_spill] sm:$0xff] }
 0x57d   :  { %v1435_v39 = vadd.f32 %v3445_v45, %v1351_v60  ;;  %1691 = vmatmul.mubr.f32.gmra.mrb[166].mxu0 %v1466_v55 }
 0x57e   :  { %v1355_v48 = vpop.f32.mrb[106].mxu1  ;;  %1696 = vmatprep.mubr.f32.mxu0 %v3788_v49 }
 0x57f   :  { %v1467_v52 = vmax.f32 %v1435_v39, 0.0  ;;  %v1356_v62 = vadd.f32 %v1355_v48, %v3292_v25  ;;  %v1357_v2 = vpop.f32.mrb[107].mxu1 }
 0x581   :  { %v1436_v33 = vadd.f32 %v3445_v45, %v1356_v62  ;;  %1697 = vmatmul.mubr.f32.gmra.mrb[168].mxu0 %v1467_v52 }
 0x582   :  { %v1360_v53 = vpop.f32.mrb[108].mxu1  ;;  %1702 = vmatprep.mubr.f32.mxu0 %v3788_v49 }
 0x583   :  { %v1468_v6 = vmax.f32 %v1436_v33, 0.0  ;;  %v1361_v58 = vadd.f32 %v1360_v53, %v3839_v8  ;;  %v1362_v10 = vpop.f32.mrb[109].mxu1  ;;  %v3846_v33 = vld [vmem:[#allocation44_spill] sm:$0xff] }
 0x585   :  { %v1437_v12 = vadd.f32 %v3445_v45, %v1361_v58  ;;  %1703 = vmatmul.mubr.f32.gmra.mrb[170].mxu0 %v1468_v6 }
 0x586   :  { %v1365_v61 = vpop.f32.mrb[110].mxu1  ;;  %1708 = vmatprep.mubr.f32.mxu0 %v3788_v49 }
 0x587   :  { %v1469_v11 = vmax.f32 %v1437_v12, 0.0  ;;  %v1366_v25 = vadd.f32 %v1365_v61, %v3840_v14  ;;  %v1367_v16 = vpop.f32.mrb[111].mxu1  ;;  %v3847_v12 = vld [vmem:[#allocation45_spill] sm:$0xff] }
 0x589   :  { %v1438_v18 = vadd.f32 %v3445_v45, %v1366_v25  ;;  %1709 = vmatmul.mubr.f32.gmra.mrb[172].mxu0 %v1469_v11 }
 0x58a   :  { %v1370_v24 = vpop.f32.mrb[112].mxu1  ;;  %1714 = vmatprep.mubr.f32.mxu0 %v3788_v49 }
 0x58b   :  { %v1470_v20 = vmax.f32 %v1438_v18, 0.0  ;;  %v1371_v27 = vadd.f32 %v1370_v24, %v3841_v35  ;;  %v1372_v43 = vpop.f32.mrb[113].mxu1  ;;  %v3848_v18 = vld [vmem:[#allocation46_spill] sm:$0xff] }
 0x58c   :  { %v2427_v43 = vld [vmem:[#allocation2 + $0x8] sm:$0xff] }
 0x58d   :  { %v1439_v47 = vadd.f32 %v3445_v45, %v1371_v27  ;;  %1715 = vmatmul.mubr.f32.gmra.mrb[174].mxu0 %v1470_v20 }
 0x58e   :  { %v1375_v26 = vpop.f32.mrb[114].mxu1  ;;  %1720 = vmatprep.mubr.f32.mxu0 %v3788_v49 }
 0x58f   :  { %v1471_v28 = vmax.f32 %v1439_v47, 0.0  ;;  %v1376_v63 = vadd.f32 %v1375_v26, %v3842_v23  ;;  %v1377_v57 = vpop.f32.mrb[115].mxu1 }
 0x591   :  { %v1440_v30 = vadd.f32 %v3445_v45, %v1376_v63  ;;  %1721 = vmatmul.mubr.f32.gmra.mrb[176].mxu0 %v1471_v28 }
 0x592   :  { %v1380_v32 = vpop.f32.mrb[116].mxu1  ;;  %1726 = vmatprep.mubr.f32.mxu0 %v3788_v49 }
 0x593   :  { %v1472_v34 = vmax.f32 %v1440_v30, 0.0  ;;  %v1381_v50 = vadd.f32 %v1380_v32, %v3843_v37  ;;  %v1382_v36 = vpop.f32.mrb[117].mxu1 }
 0x595   :  { %v1441_v19 = vadd.f32 %v3445_v45, %v1381_v50  ;;  %1727 = vmatmul.mubr.f32.gmra.mrb[178].mxu0 %v1472_v34 }
 0x596   :  { %v1385_v38 = vpop.f32.mrb[118].mxu1  ;;  %1732 = vmatprep.mubr.f32.mxu0 %v3788_v49 }
 0x597   :  { %v1473_v40 = vmax.f32 %v1441_v19, 0.0  ;;  %v1386_v5 = vadd.f32 %v1385_v38, %v3844_v22  ;;  %v1387_v42 = vpop.f32.mrb[119].mxu1 }
 0x599   :  { %v1442_v44 = vadd.f32 %v3445_v45, %v1386_v5  ;;  %1733 = vmatmul.mubr.f32.gmra.mrb[180].mxu0 %v1473_v40 }
 0x59a   :  { %v1390_v55 = vpop.f32.mrb[120].mxu1  ;;  %1738 = vmatprep.mubr.f32.mxu0 %v3788_v49 }
 0x59b   :  { %v1474_v60 = vmax.f32 %v1442_v44, 0.0  ;;  %v1391_v39 = vadd.f32 %v1390_v55, %v3845_v46  ;;  %v1392_v48 = vpop.f32.mrb[121].mxu1 }
 0x59d   :  { %v1443_v52 = vadd.f32 %v3445_v45, %v1391_v39  ;;  %1739 = vmatmul.mubr.f32.gmra.mrb[182].mxu0 %v1474_v60 }
 0x59e   :  { %v1395_v62 = vpop.f32.mrb[122].mxu1  ;;  %1744 = vmatprep.mubr.f32.mxu0 %v3788_v49 }
 0x59f   :  { %v1475_v2 = vmax.f32 %v1443_v52, 0.0  ;;  %v1396_v53 = vadd.f32 %v1395_v62, %v3846_v33  ;;  %v1397_v6 = vpop.f32.mrb[123].mxu1 }
 0x5a1   :  { %v1444_v8 = vadd.f32 %v3445_v45, %v1396_v53  ;;  %1745 = vmatmul.mubr.f32.gmra.mrb[184].mxu0 %v1475_v2 }
 0x5a2   :  { %v1400_v58 = vpop.f32.mrb[124].mxu1  ;;  %1750 = vmatprep.mubr.f32.mxu0 %v3788_v49 }
 0x5a3   :  { %v1476_v10 = vmax.f32 %v1444_v8, 0.0  ;;  %v1401_v61 = vadd.f32 %v1400_v58, %v3847_v12  ;;  %v1402_v11 = vpop.f32.mrb[125].mxu1 }
 0x5a5   :  { %v1445_v14 = vadd.f32 %v3445_v45, %v1401_v61  ;;  %1751 = vmatmul.mubr.f32.gmra.mrb[186].mxu0 %v1476_v10 }
 0x5a6   :  { %v1405_v25 = vpop.f32.mrb[126].mxu1  ;;  %1756 = vmatprep.mubr.f32.mxu0 %v3788_v49 }
 0x5a7   :  { %v1477_v16 = vmax.f32 %v1445_v14, 0.0  ;;  %v1406_v24 = vadd.f32 %v1405_v25, %v3848_v18  ;;  %v1407_v20 = vpop.f32.mrb[127].mxu1 }
 0x5a9   :  { %v1446_v35 = vadd.f32 %v3445_v45, %v1406_v24  ;;  %1757 = vmatmul.mubr.f32.gmra.mrb[188].mxu0 %v1477_v16 }
 0x5aa   :  { %1762 = vmatprep.mubr.f32.mxu0 %v3788_v49 }
 0x5ab   :  { %v1478_v27 = vmax.f32 %v1446_v35, 0.0 }
 0x5ad   :  { %1763 = vmatmul.mubr.f32.gmra.mrb[190].mxu0 %v1478_v27 }
 0x5ae   :  { %1833 = vmatprep.mubr.f32.mxu0 %v2427_v43 }
 0x604   :  { %v1578_v47 = vpop.f32.mrb[128].mxu0 }
 0x605   :  { %v3542_v26 = vpop.f32.mrb[129].mxu0 }
 0x608   :  { %v1584_v28 = vpop.f32.mrb[130].mxu0 }
 0x609   :  { %v2303_v23 = vpack.c.bf16 %v1584_v28, %v1578_v47  ;;  %v3544_v63 = vpop.f32.mrb[131].mxu0 }
 0x60b   :  { %2304 = vmatpush1.bf16.msra.mxu0 %v2303_v23  ;;  %2366 = vmatpush1.bf16.msra.mxu1 %v2303_v23 }
 0x60c   :  { %v1590_v57 = vpop.f32.mrb[132].mxu0  ;;  %2305 = vmatprep.subr.bf16.mxu0 %v3805_v31  ;;  %2351 = vmatprep.subr.bf16.mxu1 %v3805_v31 }
 0x60d   :  { %v3548_v45 = vpop.f32.mrb[133].mxu0 }
 0x610   :  { %v1596_v49 = vpop.f32.mrb[134].mxu0 }
 0x611   :  { %v2306_v30 = vpack.c.bf16 %v1596_v49, %v1590_v57  ;;  %v3550_v32 = vpop.f32.mrb[135].mxu0 }
 0x613   :  { %2307 = vmatpush1.bf16.msra.mxu0 %v2306_v30  ;;  %2367 = vmatpush1.bf16.msra.mxu1 %v2306_v30 }
 0x614   :  { %v1602_v34 = vpop.f32.mrb[136].mxu0  ;;  %2308 = vmatprep.subr.bf16.mxu0 %v3805_v31  ;;  %2352 = vmatprep.subr.bf16.mxu1 %v3805_v31 }
 0x615   :  { %v3554_v37 = vpop.f32.mrb[137].mxu0 }
 0x618   :  { %v1608_v50 = vpop.f32.mrb[138].mxu0 }
 0x619   :  { %v2309_v36 = vpack.c.bf16 %v1608_v50, %v1602_v34  ;;  %v3556_v19 = vpop.f32.mrb[139].mxu0 }
 0x61b   :  { %2310 = vmatpush1.bf16.msra.mxu0 %v2309_v36  ;;  %2368 = vmatpush1.bf16.msra.mxu1 %v2309_v36 }
 0x61c   :  { %v1614_v38 = vpop.f32.mrb[140].mxu0  ;;  %2311 = vmatprep.subr.bf16.mxu0 %v3805_v31  ;;  %2353 = vmatprep.subr.bf16.mxu1 %v3805_v31 }
 0x61d   :  { %v3560_v40 = vpop.f32.mrb[141].mxu0 }
 0x620   :  { %v1620_v22 = vpop.f32.mrb[142].mxu0 }
 0x621   :  { %v2312_v5 = vpack.c.bf16 %v1620_v22, %v1614_v38  ;;  %v3562_v42 = vpop.f32.mrb[143].mxu0 }
 0x623   :  { %2313 = vmatpush1.bf16.msra.mxu0 %v2312_v5  ;;  %2369 = vmatpush1.bf16.msra.mxu1 %v2312_v5 }
 0x624   :  { %v1626_v44 = vpop.f32.mrb[144].mxu0  ;;  %2314 = vmatprep.subr.bf16.mxu0 %v3805_v31  ;;  %2354 = vmatprep.subr.bf16.mxu1 %v3805_v31 }
 0x625   :  { %v3566_v55 = vpop.f32.mrb[145].mxu0 }
 0x628   :  { %v1632_v60 = vpop.f32.mrb[146].mxu0 }
 0x629   :  { %v2315_v46 = vpack.c.bf16 %v1632_v60, %v1626_v44  ;;  %v3568_v39 = vpop.f32.mrb[147].mxu0 }
 0x62b   :  { %2316 = vmatpush1.bf16.msra.mxu0 %v2315_v46  ;;  %2370 = vmatpush1.bf16.msra.mxu1 %v2315_v46 }
 0x62c   :  { %v1638_v48 = vpop.f32.mrb[148].mxu0  ;;  %2317 = vmatprep.subr.bf16.mxu0 %v3805_v31  ;;  %2355 = vmatprep.subr.bf16.mxu1 %v3805_v31 }
 0x62d   :  { %v3572_v52 = vpop.f32.mrb[149].mxu0 }
 0x630   :  { %v1644_v62 = vpop.f32.mrb[150].mxu0 }
 0x631   :  { %v2318_v2 = vpack.c.bf16 %v1644_v62, %v1638_v48  ;;  %v3574_v33 = vpop.f32.mrb[151].mxu0 }
 0x633   :  { %2319 = vmatpush1.bf16.msra.mxu0 %v2318_v2  ;;  %2371 = vmatpush1.bf16.msra.mxu1 %v2318_v2 }
 0x634   :  { %v1650_v53 = vpop.f32.mrb[152].mxu0  ;;  %2320 = vmatprep.subr.bf16.mxu0 %v3805_v31  ;;  %2356 = vmatprep.subr.bf16.mxu1 %v3805_v31 }
 0x635   :  { %v3578_v6 = vpop.f32.mrb[153].mxu0 }
 0x638   :  { %v1656_v8 = vpop.f32.mrb[154].mxu0 }
 0x639   :  { %v2321_v58 = vpack.c.bf16 %v1656_v8, %v1650_v53  ;;  %v3580_v10 = vpop.f32.mrb[155].mxu0 }
 0x63b   :  { %2322 = vmatpush1.bf16.msra.mxu0 %v2321_v58  ;;  %2372 = vmatpush1.bf16.msra.mxu1 %v2321_v58 }
 0x63c   :  { %v1662_v12 = vpop.f32.mrb[156].mxu0  ;;  %2323 = vmatprep.subr.bf16.mxu0 %v3805_v31  ;;  %2357 = vmatprep.subr.bf16.mxu1 %v3805_v31 }
 0x63d   :  { %v3584_v61 = vpop.f32.mrb[157].mxu0 }
 0x640   :  { %v1668_v11 = vpop.f32.mrb[158].mxu0 }
 0x641   :  { %v2324_v14 = vpack.c.bf16 %v1668_v11, %v1662_v12  ;;  %v3586_v25 = vpop.f32.mrb[159].mxu0 }
 0x643   :  { %2325 = vmatpush1.bf16.msra.mxu0 %v2324_v14  ;;  %2373 = vmatpush1.bf16.msra.mxu1 %v2324_v14 }
 0x644   :  { %v1674_v16 = vpop.f32.mrb[160].mxu0  ;;  %2326 = vmatprep.subr.bf16.mxu0 %v3805_v31  ;;  %2358 = vmatprep.subr.bf16.mxu1 %v3805_v31 }
 0x645   :  { %v3590_v18 = vpop.f32.mrb[161].mxu0 }
 0x648   :  { %v1680_v24 = vpop.f32.mrb[162].mxu0 }
 0x649   :  { %v2327_v20 = vpack.c.bf16 %v1680_v24, %v1674_v16  ;;  %v3592_v35 = vpop.f32.mrb[163].mxu0 }
 0x64b   :  { %2328 = vmatpush1.bf16.msra.mxu0 %v2327_v20  ;;  %2374 = vmatpush1.bf16.msra.mxu1 %v2327_v20 }
 0x64c   :  { %v1686_v27 = vpop.f32.mrb[164].mxu0  ;;  %2329 = vmatprep.subr.bf16.mxu0 %v3805_v31  ;;  %2359 = vmatprep.subr.bf16.mxu1 %v3805_v31 }
 0x64d   :  { %v3596_v43 = vpop.f32.mrb[165].mxu0 }
 0x650   :  { %v1692_v47 = vpop.f32.mrb[166].mxu0 }
 0x651   :  { %v2330_v28 = vpack.c.bf16 %v1692_v47, %v1686_v27  ;;  %v3598_v23 = vpop.f32.mrb[167].mxu0 }
 0x653   :  { %2331 = vmatpush1.bf16.msra.mxu0 %v2330_v28  ;;  %2375 = vmatpush1.bf16.msra.mxu1 %v2330_v28 }
 0x654   :  { %v1698_v57 = vpop.f32.mrb[168].mxu0  ;;  %2332 = vmatprep.subr.bf16.mxu0 %v3805_v31  ;;  %2360 = vmatprep.subr.bf16.mxu1 %v3805_v31 }
 0x655   :  { %v3602_v49 = vpop.f32.mrb[169].mxu0 }
 0x658   :  { %v1704_v30 = vpop.f32.mrb[170].mxu0 }
 0x659   :  { %v2333_v34 = vpack.c.bf16 %v1704_v30, %v1698_v57  ;;  %v3604_v50 = vpop.f32.mrb[171].mxu0 }
 0x65b   :  { %2334 = vmatpush1.bf16.msra.mxu0 %v2333_v34  ;;  %2376 = vmatpush1.bf16.msra.mxu1 %v2333_v34 }
 0x65c   :  { %v1710_v36 = vpop.f32.mrb[172].mxu0  ;;  %2335 = vmatprep.subr.bf16.mxu0 %v3805_v31  ;;  %2361 = vmatprep.subr.bf16.mxu1 %v3805_v31 }
 0x65d   :  { %v3608_v38 = vpop.f32.mrb[173].mxu0 }
 0x660   :  { %v1716_v22 = vpop.f32.mrb[174].mxu0 }
 0x661   :  { %v2336_v5 = vpack.c.bf16 %v1716_v22, %v1710_v36  ;;  %v3610_v44 = vpop.f32.mrb[175].mxu0  ;;  %v3849_v36 = vld [vmem:[#allocation47_spill] sm:$0xff]  ;;  %v3850_v22 = vld [vmem:[#allocation48_spill] sm:$0xff] }
 0x663   :  { %2337 = vmatpush1.bf16.msra.mxu0 %v2336_v5  ;;  %2377 = vmatpush1.bf16.msra.mxu1 %v2336_v5  ;;  %v3851_v5 = vld [vmem:[#allocation49_spill] sm:$0xff] }
 0x664   :  { %v1722_v60 = vpop.f32.mrb[176].mxu0  ;;  %2338 = vmatprep.subr.bf16.mxu0 %v3805_v31  ;;  %2362 = vmatprep.subr.bf16.mxu1 %v3805_v31 }
 0x665   :  { %v3614_v46 = vpop.f32.mrb[177].mxu0 }
 0x668   :  { %v1728_v48 = vpop.f32.mrb[178].mxu0 }
 0x669   :  { %v2339_v62 = vpack.c.bf16 %v1728_v48, %v1722_v60  ;;  %v3616_v2 = vpop.f32.mrb[179].mxu0  ;;  %v3856_v60 = vld [vmem:[#allocation56_spill] sm:$0xff]  ;;  %v2430_v48 = vld [vmem:[#allocation2 + $0x100] sm:$0xff] }
 0x66b   :  { %2340 = vmatpush1.bf16.msra.mxu0 %v2339_v62  ;;  %2378 = vmatpush1.bf16.msra.mxu1 %v2339_v62  ;;  %v2431_v62 = vld [vmem:[#allocation2 + $0x118] sm:$0xff] }
 0x66c   :  { %v1734_v53 = vpop.f32.mrb[180].mxu0  ;;  %2341 = vmatprep.subr.bf16.mxu0 %v3805_v31  ;;  %2363 = vmatprep.subr.bf16.mxu1 %v3805_v31 }
 0x66d   :  { %v3620_v8 = vpop.f32.mrb[181].mxu0 }
 0x670   :  { %v1740_v58 = vpop.f32.mrb[182].mxu0 }
 0x671   :  { %v2342_v12 = vpack.c.bf16 %v1740_v58, %v1734_v53  ;;  %v3622_v11 = vpop.f32.mrb[183].mxu0  ;;  %v2432_v53 = vld [vmem:[#allocation2 + $0x110] sm:$0xff]  ;;  %v2439_v58 = vld [vmem:[#allocation2 + $0x158] sm:$0xff] }
 0x673   :  { %2343 = vmatpush1.bf16.msra.mxu0 %v2342_v12  ;;  %2379 = vmatpush1.bf16.msra.mxu1 %v2342_v12  ;;  %v2440_v12 = vld [vmem:[#allocation2 + $0x150] sm:$0xff] }
 0x674   :  { %v1746_v14 = vpop.f32.mrb[184].mxu0  ;;  %2344 = vmatprep.subr.bf16.mxu0 %v3805_v31  ;;  %2364 = vmatprep.subr.bf16.mxu1 %v3805_v31 }
 0x675   :  { %v3626_v16 = vpop.f32.mrb[185].mxu0 }
 0x678   :  { %v1752_v24 = vpop.f32.mrb[186].mxu0 }
 0x679   :  { %v2345_v20 = vpack.c.bf16 %v1752_v24, %v1746_v14  ;;  %v3628_v27 = vpop.f32.mrb[187].mxu0  ;;  %v2441_v14 = vld [vmem:[#allocation2 + $0x168] sm:$0xff]  ;;  %v2442_v24 = vld [vmem:[#allocation2 + $0x160] sm:$0xff] }
 0x67b   :  { %2346 = vmatpush1.bf16.msra.mxu0 %v2345_v20  ;;  %2380 = vmatpush1.bf16.msra.mxu1 %v2345_v20  ;;  %v2443_v20 = vld [vmem:[#allocation2 + $0x178] sm:$0xff] }
 0x67c   :  { %v1758_v47 = vpop.f32.mrb[188].mxu0  ;;  %2347 = vmatprep.subr.bf16.mxu0 %v3805_v31  ;;  %2365 = vmatprep.subr.bf16.mxu1 %v3805_v31  ;;  %v3852_v31 = vld [vmem:[#allocation50_spill] sm:$0xff] }
 0x67d   :  { %v3632_v28 = vpop.f32.mrb[189].mxu0 }
 0x680   :  { %v1764_v57 = vpop.f32.mrb[190].mxu0 }
 0x681   :  { %v2348_v30 = vpack.c.bf16 %v1764_v57, %v1758_v47  ;;  %v3634_v34 = vpop.f32.mrb[191].mxu0  ;;  %v2444_v47 = vld [vmem:[#allocation2 + $0x170] sm:$0xff]  ;;  %v2445_v57 = vld [vmem:[#allocation2 + $0x188] sm:$0xff] }
 0x683   :  { %2349 = vmatpush1.bf16.msra.mxu0 %v2348_v30  ;;  %2381 = vmatpush1.bf16.msra.mxu1 %v2348_v30  ;;  %v2446_v30 = vld [vmem:[#allocation2 + $0x180] sm:$0xff] }
 0x686   :  { %1834 = vmatmul.mubr.f32.vlgmr.msra.gmra.mrb[192].mxu0 %v3849_v36  ;;  %1864 = vmatmul.mubr.f32.vlgmr.msra.gmra.mrb[128].mxu1 %v3357_v3  ;;  %v3853_v3 = vld [vmem:[#allocation51_spill] sm:$0xff]  ;;  %v2447_v36 = vld [vmem:[#allocation2 + $0x198] sm:$0xff] }
 0x687   :  { %1838 = vmatprep.mubr.f32.mxu0 %v3850_v22  ;;  %1868 = vmatprep.mubr.f32.mxu1 %v3360_v0  ;;  %v3854_v0 = vld [vmem:[#allocation55_spill] sm:$0xff]  ;;  %v2448_v22 = vld [vmem:[#allocation2 + $0x190] sm:$0xff] }
 0x68a   :  { %1839 = vmatmul.mubr.f32.gmra.mrb[194].mxu0 %v3851_v5  ;;  %1869 = vmatmul.mubr.f32.gmra.mrb[130].mxu1 %v3363_v29  ;;  %v3855_v29 = vld [vmem:[#allocation52_spill] sm:$0xff] }
 0x68b   :  { %1843 = vmatprep.mubr.f32.mxu0 %v3852_v31  ;;  %1873 = vmatprep.mubr.f32.mxu1 %v3366_v7  ;;  %v3857_v7 = vld [vmem:[#allocation53_spill] sm:$0xff]  ;;  %v2449_v5 = vld [vmem:[#allocation2 + $0x1a8] sm:$0xff]  ;;  %v2450_v31 = vld [vmem:[#allocation2 + $0x1a0] sm:$0xff] }
 0x68e   :  { %1844 = vmatmul.mubr.f32.gmra.mrb[196].mxu0 %v3332_v15  ;;  %1874 = vmatmul.mubr.f32.gmra.mrb[132].mxu1 %v3369_v56  ;;  %v3858_v15 = vld [vmem:[#allocation57_spill] sm:$0xff]  ;;  %v3859_v56 = vld [vmem:[#allocation54_spill] sm:$0xff] }
 0x68f   :  { %1848 = vmatprep.mubr.f32.mxu0 %v3335_v59  ;;  %1878 = vmatprep.mubr.f32.mxu1 %v3372_v9  ;;  %v3860_v59 = vld [vmem:[#allocation58_spill] sm:$0xff]  ;;  %v3861_v9 = vld [vmem:[#allocation59_spill] sm:$0xff] }
 0x692   :  { %1849 = vmatmul.mubr.f32.gmra.mrb[198].mxu0 %v3338_v1  ;;  %1879 = vmatmul.mubr.f32.gmra.mrb[134].mxu1 %v3375_v4  ;;  %v2428_v1 = vld [vmem:[#allocation2 + $0xf0] sm:$0xff]  ;;  %v2429_v4 = vld [vmem:[#allocation2 + $0x108] sm:$0xff] }
 0x693   :  { %1853 = vmatprep.mubr.f32.mxu0 %v3853_v3  ;;  %1883 = vmatprep.mubr.f32.mxu1 %v3854_v0  ;;  %v2451_v3 = vld [vmem:[#allocation2 + $0x1b8] sm:$0xff]  ;;  %v2452_v0 = vld [vmem:[#allocation2 + $0x1b0] sm:$0xff] }
 0x696   :  { %1854 = vmatmul.mubr.f32.gmra.mrb[200].mxu0 %v3855_v29  ;;  %1884 = vmatmul.mubr.f32.gmra.mrb[136].mxu1 %v3856_v60  ;;  %v2453_v29 = vld [vmem:[#allocation2 + $0x1c8] sm:$0xff]  ;;  %v2454_v60 = vld [vmem:[#allocation2 + $0x1c0] sm:$0xff] }
 0x697   :  { %1858 = vmatprep.mubr.f32.mxu0 %v3857_v7  ;;  %1888 = vmatprep.mubr.f32.mxu1 %v3858_v15  ;;  %v2455_v7 = vld [vmem:[#allocation2 + $0x1d8] sm:$0xff]  ;;  %v2456_v15 = vld [vmem:[#allocation2 + $0x1d0] sm:$0xff] }
 0x69a   :  { %1859 = vmatmul.mubr.f32.gmra.mrb[202].mxu0 %v3859_v56  ;;  %1889 = vmatmul.mubr.f32.gmra.mrb[138].mxu1 %v3860_v59  ;;  %v2457_v56 = vld [vmem:[#allocation2 + $0x1e8] sm:$0xff]  ;;  %v2458_v59 = vld [vmem:[#allocation2 + $0x1e0] sm:$0xff] }
 0x69b   :  { %1893 = vmatprep.mubr.f32.mxu1 %v3861_v9  ;;  %v2459_v9 = vld [vmem:[#allocation2 + $0x1f8] sm:$0xff] }
 0x69e   :  { %1894 = vmatmul.mubr.f32.gmra.mrb[140].mxu1 %v3393_v21  ;;  %v2433_v21 = vld [vmem:[#allocation2 + $0x128] sm:$0xff] }
 0x69f   :  { %1898 = vmatprep.mubr.f32.mxu1 %v3396_v54  ;;  %v2434_v54 = vld [vmem:[#allocation2 + $0x120] sm:$0xff] }
 0x6a2   :  { %1899 = vmatmul.mubr.f32.gmra.mrb[142].mxu1 %v3399_v13  ;;  %v2435_v13 = vld [vmem:[#allocation2 + $0x138] sm:$0xff] }
 0x6a3   :  { %1903 = vmatprep.mubr.f32.mxu1 %v3402_v17  ;;  %v2436_v17 = vld [vmem:[#allocation2 + $0x130] sm:$0xff] }
 0x6a6   :  { %1904 = vmatmul.mubr.f32.gmra.mrb[144].mxu1 %v3405_v51  ;;  %v2437_v51 = vld [vmem:[#allocation2 + $0x148] sm:$0xff] }
 0x6a7   :  { %1908 = vmatprep.mubr.f32.mxu1 %v3408_v41  ;;  %v2438_v41 = vld [vmem:[#allocation2 + $0x140] sm:$0xff] }
 0x6aa   :  { %1909 = vmatmul.mubr.f32.gmra.mrb[146].mxu1 %v2428_v1  ;;  %v2460_v1 = vld [vmem:[#allocation2 + $0x1f0] sm:$0xff] }
 0x6ab   :  { %1913 = vmatprep.mubr.f32.mxu1 %v2429_v4  ;;  %v3665_v4 = vld [vmem:[#allocation15] ss:$0 sm:$0xff] }
 0x6ae   :  { %1914 = vmatmul.mubr.f32.gmra.mrb[148].mxu1 %v2430_v48 }
 0x6af   :  { %1918 = vmatprep.mubr.f32.mxu1 %v2431_v62 }
 0x6b2   :  { %1919 = vmatmul.mubr.f32.gmra.mrb[150].mxu1 %v2432_v53 }
 0x6b3   :  { %1923 = vmatprep.mubr.f32.mxu1 %v2433_v21 }
 0x6b6   :  { %1924 = vmatmul.mubr.f32.gmra.mrb[152].mxu1 %v2434_v54 }
 0x6b7   :  { %1928 = vmatprep.mubr.f32.mxu1 %v2435_v13 }
 0x6ba   :  { %1929 = vmatmul.mubr.f32.gmra.mrb[154].mxu1 %v2436_v17 }
 0x6bb   :  { %1933 = vmatprep.mubr.f32.mxu1 %v2437_v51 }
 0x6be   :  { %1934 = vmatmul.mubr.f32.gmra.mrb[156].mxu1 %v2438_v41 }
 0x6bf   :  { %1938 = vmatprep.mubr.f32.mxu1 %v2439_v58 }
 0x6c2   :  { %1939 = vmatmul.mubr.f32.gmra.mrb[158].mxu1 %v2440_v12 }
 0x6c3   :  { %1943 = vmatprep.mubr.f32.mxu1 %v2441_v14 }
 0x6c6   :  { %1944 = vmatmul.mubr.f32.gmra.mrb[160].mxu1 %v2442_v24 }
 0x6c7   :  { %1948 = vmatprep.mubr.f32.mxu1 %v2443_v20 }
 0x6ca   :  { %1949 = vmatmul.mubr.f32.gmra.mrb[162].mxu1 %v2444_v47 }
 0x6cb   :  { %1953 = vmatprep.mubr.f32.mxu1 %v2445_v57 }
 0x6ce   :  { %1954 = vmatmul.mubr.f32.gmra.mrb[164].mxu1 %v2446_v30 }
 0x6cf   :  { %1958 = vmatprep.mubr.f32.mxu1 %v2447_v36 }
 0x6d2   :  { %1959 = vmatmul.mubr.f32.gmra.mrb[166].mxu1 %v2448_v22 }
 0x6d3   :  { %1963 = vmatprep.mubr.f32.mxu1 %v2449_v5 }
 0x6d6   :  { %1964 = vmatmul.mubr.f32.gmra.mrb[168].mxu1 %v2450_v31 }
 0x6d7   :  { %1968 = vmatprep.mubr.f32.mxu1 %v2451_v3 }
 0x6da   :  { %1969 = vmatmul.mubr.f32.gmra.mrb[170].mxu1 %v2452_v0 }
 0x6db   :  { %1973 = vmatprep.mubr.f32.mxu1 %v2453_v29 }
 0x6de   :  { %1974 = vmatmul.mubr.f32.gmra.mrb[172].mxu1 %v2454_v60 }
 0x6df   :  { %1978 = vmatprep.mubr.f32.mxu1 %v2455_v7 }
 0x6e2   :  { %1979 = vmatmul.mubr.f32.gmra.mrb[174].mxu1 %v2456_v15 }
 0x6e3   :  { %1983 = vmatprep.mubr.f32.mxu1 %v2457_v56 }
 0x6e6   :  { %1984 = vmatmul.mubr.f32.gmra.mrb[176].mxu1 %v2458_v59 }
 0x6e7   :  { %1988 = vmatprep.mubr.f32.mxu1 %v2459_v9 }
 0x6ea   :  { %1989 = vmatmul.mubr.f32.gmra.mrb[178].mxu1 %v2460_v1 }
 0x759   :  { %v1835_v48 = vpop.f32.mrb[192].mxu0  ;;  %v1865_v62 = vpop.f32.mrb[128].mxu1 }
 0x75a   :  { %v1836_v53 = vadd.f32 %v1835_v48, %v3542_v26  ;;  %v1866_v21 = vadd.f32 %v1865_v62, %v3560_v40  ;;  %v1837_v54 = vpop.f32.mrb[193].mxu0  ;;  %v1867_v13 = vpop.f32.mrb[129].mxu1 }
 0x75c   :  { %v2000_v17 = vadd.f32 %v3665_v4, %v1836_v53  ;;  %v2006_v51 = vadd.f32 %v3665_v4, %v1866_v21 }
 0x75d   :  { %v1840_v41 = vpop.f32.mrb[194].mxu0  ;;  %v1870_v58 = vpop.f32.mrb[130].mxu1 }
 0x75e   :  { %2032 = vst [vmem:[#allocation16] sm:$0xff] %v2000_v17  ;;  %2038 = vst [vmem:[#allocation16 + $0x30] sm:$0xff] %v2006_v51  ;;  %v1841_v12 = vadd.f32 %v1840_v41, %v3544_v63  ;;  %v1871_v14 = vadd.f32 %v1870_v58, %v3562_v42  ;;  %v1842_v24 = vpop.f32.mrb[195].mxu0  ;;  %v1872_v20 = vpop.f32.mrb[131].mxu1 }
 0x760   :  { %v2001_v26 = vadd.f32 %v3665_v4, %v1841_v12  ;;  %v2007_v40 = vadd.f32 %v3665_v4, %v1871_v14 }
 0x761   :  { %v1845_v47 = vpop.f32.mrb[196].mxu0  ;;  %v1875_v57 = vpop.f32.mrb[132].mxu1 }
 0x762   :  { %2033 = vst [vmem:[#allocation16 + $0x8] sm:$0xff] %v2001_v26  ;;  %2039 = vst [vmem:[#allocation16 + $0x38] sm:$0xff] %v2007_v40  ;;  %v1846_v30 = vadd.f32 %v1845_v47, %v3548_v45  ;;  %v1876_v36 = vadd.f32 %v1875_v57, %v3566_v55  ;;  %v1847_v22 = vpop.f32.mrb[197].mxu0  ;;  %v1877_v5 = vpop.f32.mrb[133].mxu1 }
 0x764   :  { %v2002_v63 = vadd.f32 %v3665_v4, %v1846_v30  ;;  %v2008_v42 = vadd.f32 %v3665_v4, %v1876_v36 }
 0x765   :  { %v1850_v31 = vpop.f32.mrb[198].mxu0  ;;  %v1880_v3 = vpop.f32.mrb[134].mxu1 }
 0x766   :  { %2034 = vst [vmem:[#allocation16 + $0x10] sm:$0xff] %v2002_v63  ;;  %2040 = vst [vmem:[#allocation16 + $0x40] sm:$0xff] %v2008_v42  ;;  %v1851_v0 = vadd.f32 %v1850_v31, %v3550_v32  ;;  %v1881_v29 = vadd.f32 %v1880_v3, %v3568_v39  ;;  %v1852_v60 = vpop.f32.mrb[199].mxu0  ;;  %v1882_v7 = vpop.f32.mrb[135].mxu1 }
 0x768   :  { %v2003_v45 = vadd.f32 %v3665_v4, %v1851_v0  ;;  %v2009_v55 = vadd.f32 %v3665_v4, %v1881_v29 }
 0x769   :  { %v1855_v15 = vpop.f32.mrb[200].mxu0  ;;  %v1885_v56 = vpop.f32.mrb[136].mxu1 }
 0x76a   :  { %2035 = vst [vmem:[#allocation16 + $0x18] sm:$0xff] %v2003_v45  ;;  %2041 = vst [vmem:[#allocation16 + $0x48] sm:$0xff] %v2009_v55  ;;  %v1856_v59 = vadd.f32 %v1855_v15, %v3554_v37  ;;  %v1886_v9 = vadd.f32 %v1885_v56, %v3572_v52  ;;  %v1857_v1 = vpop.f32.mrb[201].mxu0  ;;  %v1887_v48 = vpop.f32.mrb[137].mxu1 }
 0x76c   :  { %v2004_v32 = vadd.f32 %v3665_v4, %v1856_v59  ;;  %v2010_v39 = vadd.f32 %v3665_v4, %v1886_v9 }
 0x76d   :  { %v1860_v62 = vpop.f32.mrb[202].mxu0  ;;  %v1890_v53 = vpop.f32.mrb[138].mxu1 }
 0x76e   :  { %2036 = vst [vmem:[#allocation16 + $0x20] sm:$0xff] %v2004_v32  ;;  %2042 = vst [vmem:[#allocation16 + $0x50] sm:$0xff] %v2010_v39  ;;  %v1861_v21 = vadd.f32 %v1860_v62, %v3556_v19  ;;  %v1891_v54 = vadd.f32 %v1890_v53, %v3574_v33  ;;  %v1892_v13 = vpop.f32.mrb[139].mxu1  ;;  %v1862_v17 = vpop.f32.mrb[203].mxu0 }
 0x770   :  { %v2005_v37 = vadd.f32 %v3665_v4, %v1861_v21  ;;  %v2011_v52 = vadd.f32 %v3665_v4, %v1891_v54 }
 0x771   :  { %v1895_v51 = vpop.f32.mrb[140].mxu1 }
 0x772   :  { %2037 = vst [vmem:[#allocation16 + $0x28] sm:$0xff] %v2005_v37  ;;  %2043 = vst [vmem:[#allocation16 + $0x58] sm:$0xff] %v2011_v52  ;;  %v1896_v41 = vadd.f32 %v1895_v51, %v3578_v6  ;;  %v1897_v58 = vpop.f32.mrb[141].mxu1 }
 0x774   :  { %v2012_v12 = vadd.f32 %v3665_v4, %v1896_v41 }
 0x775   :  { %v1900_v14 = vpop.f32.mrb[142].mxu1 }
 0x776   :  { %2044 = vst [vmem:[#allocation16 + $0x60] sm:$0xff] %v2012_v12  ;;  %v1901_v19 = vadd.f32 %v1900_v14, %v3580_v10  ;;  %v1902_v24 = vpop.f32.mrb[143].mxu1 }
 0x778   :  { %v2013_v33 = vadd.f32 %v3665_v4, %v1901_v19 }
 0x779   :  { %v1905_v20 = vpop.f32.mrb[144].mxu1 }
 0x77a   :  { %2045 = vst [vmem:[#allocation16 + $0x68] sm:$0xff] %v2013_v33  ;;  %v1906_v26 = vadd.f32 %v1905_v20, %v3584_v61  ;;  %v1907_v40 = vpop.f32.mrb[145].mxu1 }
 0x77c   :  { %v2014_v47 = vadd.f32 %v3665_v4, %v1906_v26 }
 0x77d   :  { %v1910_v57 = vpop.f32.mrb[146].mxu1 }
 0x77e   :  { %2046 = vst [vmem:[#allocation16 + $0x70] sm:$0xff] %v2014_v47  ;;  %v1911_v6 = vadd.f32 %v1910_v57, %v3586_v25  ;;  %v1912_v30 = vpop.f32.mrb[147].mxu1 }
 0x780   :  { %v2015_v36 = vadd.f32 %v3665_v4, %v1911_v6 }
 0x781   :  { %v1915_v22 = vpop.f32.mrb[148].mxu1 }
 0x782   :  { %2047 = vst [vmem:[#allocation16 + $0x78] sm:$0xff] %v2015_v36  ;;  %v1916_v10 = vadd.f32 %v1915_v22, %v3590_v18  ;;  %v1917_v5 = vpop.f32.mrb[149].mxu1 }
 0x784   :  { %v2016_v63 = vadd.f32 %v3665_v4, %v1916_v10 }
 0x785   :  { %v1920_v42 = vpop.f32.mrb[150].mxu1 }
 0x786   :  { %2048 = vst [vmem:[#allocation16 + $0x80] sm:$0xff] %v2016_v63  ;;  %v1921_v61 = vadd.f32 %v1920_v42, %v3592_v35  ;;  %v1922_v31 = vpop.f32.mrb[151].mxu1 }
 0x788   :  { %v2017_v3 = vadd.f32 %v3665_v4, %v1921_v61 }
 0x789   :  { %v1925_v0 = vpop.f32.mrb[152].mxu1 }
 0x78a   :  { %2049 = vst [vmem:[#allocation16 + $0x88] sm:$0xff] %v2017_v3  ;;  %v1926_v25 = vadd.f32 %v1925_v0, %v3596_v43  ;;  %v1927_v29 = vpop.f32.mrb[153].mxu1 }
 0x78c   :  { %v2018_v60 = vadd.f32 %v3665_v4, %v1926_v25 }
 0x78d   :  { %v1930_v7 = vpop.f32.mrb[154].mxu1 }
 0x78e   :  { %2050 = vst [vmem:[#allocation16 + $0x90] sm:$0xff] %v2018_v60  ;;  %v1931_v18 = vadd.f32 %v1930_v7, %v3598_v23  ;;  %v1932_v45 = vpop.f32.mrb[155].mxu1 }
 0x790   :  { %v2019_v55 = vadd.f32 %v3665_v4, %v1931_v18 }
 0x791   :  { %v1935_v15 = vpop.f32.mrb[156].mxu1 }
 0x792   :  { %2051 = vst [vmem:[#allocation16 + $0x98] sm:$0xff] %v2019_v55  ;;  %v1936_v35 = vadd.f32 %v1935_v15, %v3602_v49  ;;  %v1937_v56 = vpop.f32.mrb[157].mxu1 }
 0x794   :  { %v2020_v59 = vadd.f32 %v3665_v4, %v1936_v35 }
 0x795   :  { %v1940_v9 = vpop.f32.mrb[158].mxu1 }
 0x796   :  { %2052 = vst [vmem:[#allocation16 + $0xa0] sm:$0xff] %v2020_v59  ;;  %v1941_v43 = vadd.f32 %v1940_v9, %v3604_v50  ;;  %v1942_v1 = vpop.f32.mrb[159].mxu1 }
 0x798   :  { %v2021_v48 = vadd.f32 %v3665_v4, %v1941_v43 }
 0x799   :  { %v1945_v32 = vpop.f32.mrb[160].mxu1 }
 0x79a   :  { %2053 = vst [vmem:[#allocation16 + $0xa8] sm:$0xff] %v2021_v48  ;;  %v1946_v23 = vadd.f32 %v1945_v32, %v3608_v38  ;;  %v1947_v39 = vpop.f32.mrb[161].mxu1 }
 0x79c   :  { %v2022_v62 = vadd.f32 %v3665_v4, %v1946_v23 }
 0x79d   :  { %v1950_v53 = vpop.f32.mrb[162].mxu1 }
 0x79e   :  { %2054 = vst [vmem:[#allocation16 + $0xb0] sm:$0xff] %v2022_v62  ;;  %v1951_v49 = vadd.f32 %v1950_v53, %v3610_v44  ;;  %v1952_v21 = vpop.f32.mrb[163].mxu1 }
 0x7a0   :  { %v2023_v54 = vadd.f32 %v3665_v4, %v1951_v49 }
 0x7a1   :  { %v1955_v13 = vpop.f32.mrb[164].mxu1 }
 0x7a2   :  { %2055 = vst [vmem:[#allocation16 + $0xb8] sm:$0xff] %v2023_v54  ;;  %v1956_v50 = vadd.f32 %v1955_v13, %v3614_v46  ;;  %v1957_v17 = vpop.f32.mrb[165].mxu1 }
 0x7a4   :  { %v2024_v37 = vadd.f32 %v3665_v4, %v1956_v50 }
 0x7a5   :  { %v1960_v52 = vpop.f32.mrb[166].mxu1 }
 0x7a6   :  { %2056 = vst [vmem:[#allocation16 + $0xc0] sm:$0xff] %v2024_v37  ;;  %v1961_v38 = vadd.f32 %v1960_v52, %v3616_v2  ;;  %v1962_v51 = vpop.f32.mrb[167].mxu1 }
 0x7a8   :  { %v2025_v41 = vadd.f32 %v3665_v4, %v1961_v38 }
 0x7a9   :  { %v1965_v58 = vpop.f32.mrb[168].mxu1 }
 0x7aa   :  { %2057 = vst [vmem:[#allocation16 + $0xc8] sm:$0xff] %v2025_v41  ;;  %v1966_v44 = vadd.f32 %v1965_v58, %v3620_v8  ;;  %v1967_v12 = vpop.f32.mrb[169].mxu1 }
 0x7ac   :  { %v2026_v14 = vadd.f32 %v3665_v4, %v1966_v44 }
 0x7ad   :  { %v1970_v19 = vpop.f32.mrb[170].mxu1 }
 0x7ae   :  { %2058 = vst [vmem:[#allocation16 + $0xd0] sm:$0xff] %v2026_v14  ;;  %v1971_v46 = vadd.f32 %v1970_v19, %v3622_v11  ;;  %v1972_v24 = vpop.f32.mrb[171].mxu1 }
 0x7b0   :  { %v2027_v33 = vadd.f32 %v3665_v4, %v1971_v46 }
 0x7b1   :  { %v1975_v20 = vpop.f32.mrb[172].mxu1 }
 0x7b2   :  { %2059 = vst [vmem:[#allocation16 + $0xd8] sm:$0xff] %v2027_v33  ;;  %v1976_v2 = vadd.f32 %v1975_v20, %v3626_v16  ;;  %v1977_v26 = vpop.f32.mrb[173].mxu1 }
 0x7b4   :  { %v2028_v40 = vadd.f32 %v3665_v4, %v1976_v2 }
 0x7b5   :  { %v1980_v47 = vpop.f32.mrb[174].mxu1 }
 0x7b6   :  { %2060 = vst [vmem:[#allocation16 + $0xe0] sm:$0xff] %v2028_v40  ;;  %v1981_v8 = vadd.f32 %v1980_v47, %v3628_v27  ;;  %v1982_v57 = vpop.f32.mrb[175].mxu1 }
 0x7b8   :  { %v2029_v6 = vadd.f32 %v3665_v4, %v1981_v8 }
 0x7b9   :  { %v1985_v30 = vpop.f32.mrb[176].mxu1 }
 0x7ba   :  { %2061 = vst [vmem:[#allocation16 + $0xe8] sm:$0xff] %v2029_v6  ;;  %v1986_v11 = vadd.f32 %v1985_v30, %v3632_v28  ;;  %v1987_v36 = vpop.f32.mrb[177].mxu1 }
 0x7bc   :  { %v2030_v22 = vadd.f32 %v3665_v4, %v1986_v11 }
 0x7bd   :  { %v1990_v10 = vpop.f32.mrb[178].mxu1 }
 0x7be   :  { %2062 = vst [vmem:[#allocation16 + $0xf0] sm:$0xff] %v2030_v22  ;;  %v1991_v16 = vadd.f32 %v1990_v10, %v3634_v34  ;;  %v1992_v5 = vpop.f32.mrb[179].mxu1 }
 0x7c0   :  { %v2031_v63 = vadd.f32 %v3665_v4, %v1991_v16 }
 0x7c2   :  { %2063 = vst [vmem:[#allocation16 + $0xf8] sm:$0xff] %v2031_v63 }
 0x7c3   :  { %2648 = shalt.err (!%p2645_p12)
}
 0x7c4   :  { %s2649_s13 = scalar_lea.hbm %s3754_s8, 4096 }
 0x7c5   :  { %p2650_p13 = scmp.ne.s32.totalorder %s3754_s8, %s2649_s13  ;;  %p2653_p0 = scmp.lt.u32.totalorder %s2649_s13, %s3754_s8 }
 0x7c7   :  { %p2655_p1 = pnand %p2653_p0, %p2650_p13 }
 0x7c9   :  { %2658 = shalt.err (!%p2655_p1)
}
 0x7ca   :  { %2075 = dma.vmem_to_hbm [thread:$0]  %s2070_s3, 4096, %s3754_s8, [#allocation6], %s2677_s6, %s2677_s6, %s2678_s15  }
 0x7cb   :  { %2669 = dma.done.wait [#allocation6], 4096  }
 0x7cc   :  { %2670 = vsyncadd [#allocation6], 4294963200 }
 0x7cd   :  { %2079 = vsyncpa [#allocation5], 1 }
 0x7ce   :  { %2080 = vsyncpa [#allocation8], 1 }
 0x7cf   :  { %2081 = vsyncpa [#allocation11], 1 }
 0x7d0   :  { %2082 = vsyncpa [#allocation14], 1 }
 0x7d1   :  { %2083 = vsyncpa [#allocation6], 1 }
 0x7d2   :  { %2084 = vsyncmov [#allocation3] }
 0x7d5   :  { %s2085_s1 = vpop.sfrf %2084 }
 0x7d6   :  { %p2125_p2 = scmp.ne.s32.totalorder %s2085_s1, 0 }
 0x7d8   :  { %2089 = shalt.err (%p2125_p2)  }

</bundles_post_ra>
